<compile_context>
chip_gen: v7x
topology: tpu7x:2x2x1
jax: 0.10.0
libtpu: 0.0.40
codegen_flags: <defaults>
</compile_context>

<pallas_src>
import jax
import jax.numpy as jnp
from jax.experimental import pallas as pl
from jax.experimental.pallas import tpu as pltpu


def encoder5d_kernel(x_ref, w1_ref, b1_ref, w2_ref, b2_ref,
                     w3a_ref, w3b_ref, b3_ref, w4_ref, b4_ref, o_ref):
    TG, C = o_ref.shape            # groups per step, encoder_channel
    M = x_ref.shape[0]             # TG * N rows
    N = M // TG

    x = x_ref[...]                                                   # (M, 5) bf16

    # first_conv: Conv1d(5,128,1) + BN(128) [folded] + ReLU
    h1 = jnp.dot(x, w1_ref[...], preferred_element_type=jnp.float32) + b1_ref[...]
    h1 = jnp.maximum(h1, 0.0)                                        # (M, 128) f32

    # Conv1d(128, 256, 1)
    f = jnp.dot(h1.astype(jnp.bfloat16), w2_ref[...],
                preferred_element_type=jnp.float32) + b2_ref[...]    # (M, 256) f32

    # per-group global max (row-axis-only reshape; lane layout untouched)
    g = jnp.max(f.reshape(TG, N, 256), axis=1)                       # (TG, 256) f32

    # second_conv: Conv1d(512,512,1) + BN(512) [folded] + ReLU.
    # concat([global, local], channel) @ W3  ==  g @ W3[:256] + f @ W3[256:]
    gg = jnp.dot(g.astype(jnp.bfloat16), w3a_ref[...],
                 preferred_element_type=jnp.float32)                 # (TG, 512)
    ff = jnp.dot(f.astype(jnp.bfloat16), w3b_ref[...],
                 preferred_element_type=jnp.float32)                 # (M, 512)
    h2 = ff.reshape(TG, N, 512) + gg[:, None, :] + b3_ref[...]       # (TG, N, 512)
    h2 = jnp.maximum(h2, 0.0)

    # Conv1d(512, encoder_channel, 1)
    f2 = jnp.dot(h2.reshape(M, 512).astype(jnp.bfloat16), w4_ref[...],
                 preferred_element_type=jnp.float32) + b4_ref[...]   # (M, C)

    # final per-group max
    o_ref[...] = jnp.max(f2.reshape(TG, N, C), axis=1)               # (TG, C)


def _choose_group_block(BG, N):
    """Pick TG so TG*N fills the MXU (>=256 rows) while keeping >=2 grid steps
    when possible (v7x: shard across both TensorCores)."""
    TG = max(1, min(BG, pl.cdiv(256, N)))
    while TG > 1 and pl.cdiv(BG, TG) < 2:
        TG = max(1, TG // 2)
    return TG


def encoder_5d_forward(point_groups, params, encoder_channel, group_block=None):
    """point_groups: (B, G, N, 5) float32  ->  (B, G, encoder_channel) float32."""
    (w1f, b1f, w2, b2, w3a, w3b, b3f, w4, b4) = params
    B, G, N, D = point_groups.shape
    assert D == 5
    BG = B * G
    C = encoder_channel

    TG = group_block if group_block is not None else _choose_group_block(BG, N)
    num_steps = pl.cdiv(BG, TG)
    BG_pad = num_steps * TG

    bf = jnp.bfloat16
    x = point_groups.reshape(BG * N, 5).astype(bf)
    if BG_pad != BG:
        x = jnp.pad(x, ((0, (BG_pad - BG) * N), (0, 0)))             # zero groups, sliced off later

    # matmul operands in bf16 (MXU), biases stay f32 (VPU adds in f32)
    w1b, w2b, w3ab, w3bb, w4b = (w.astype(bf) for w in (w1f, w2, w3a, w3b, w4))

    weight_elems = 5 * 128 + 128 * 256 + 2 * 256 * 512 + 512 * C
    bias_elems = 128 + 256 + 512 + C
    flops = 2 * BG_pad * N * (5 * 128 + 128 * 256 + 256 * 512 + 512 * C) \
        + 2 * BG_pad * 256 * 512
    bytes_accessed = (BG_pad * N * 5 * 2 + weight_elems * 2
                      + bias_elems * 4 + BG_pad * C * 4)
    cost = pl.CostEstimate(flops=flops, transcendentals=0,
                           bytes_accessed=bytes_accessed)

    out = pl.pallas_call(
        encoder5d_kernel,
        out_shape=jax.ShapeDtypeStruct((BG_pad, C), jnp.float32),
        grid_spec=pltpu.PrefetchScalarGridSpec(
            num_scalar_prefetch=0,
            grid=(num_steps,),
            in_specs=[
                pl.BlockSpec((TG * N, 5), lambda i: (i, 0)),    # TG groups of points
                pl.BlockSpec((5, 128), lambda i: (0, 0)),       # W1 (BN1 folded)
                pl.BlockSpec((1, 128), lambda i: (0, 0)),       # b1 (BN1 folded)
                pl.BlockSpec((128, 256), lambda i: (0, 0)),     # W2
                pl.BlockSpec((1, 256), lambda i: (0, 0)),       # b2
                pl.BlockSpec((256, 512), lambda i: (0, 0)),     # W3[:256]  (global part)
                pl.BlockSpec((256, 512), lambda i: (0, 0)),     # W3[256:]  (local part)
                pl.BlockSpec((1, 512), lambda i: (0, 0)),       # b3 (BN2 folded)
                pl.BlockSpec((512, C), lambda i: (0, 0)),       # W4
                pl.BlockSpec((1, C), lambda i: (0, 0)),         # b4
            ],
            out_specs=pl.BlockSpec((TG, C), lambda i: (i, 0)),  # dense (TG, C) slab
        ),
        compiler_params=pltpu.CompilerParams(
            dimension_semantics=("parallel",)),
        cost_estimate=cost,
    )(x, w1b, b1f, w2b, b2, w3ab, w3bb, b3f, w4b, b4)

    return out[:BG].reshape(B, G, C)


def make_params(encoder_channel, key):
    """Deterministic synthetic parameters; BN (eval mode) folded into conv weights."""
    C = encoder_channel
    ks = jax.random.split(key, 20)
    nrm = lambda k, shp, s=0.05: s * jax.random.normal(k, shp, dtype=jnp.float32)

    # Conv weights stored as (Cin, Cout)  (PyTorch Conv1d weight is (Cout, Cin, 1)).
    w1 = nrm(ks[0], (5, 128));    b1 = nrm(ks[1], (128,))
    w2 = nrm(ks[2], (128, 256));  b2 = nrm(ks[3], (256,))
    w3 = nrm(ks[4], (512, 512));  b3 = nrm(ks[5], (512,))
    w4 = nrm(ks[6], (512, C));    b4 = nrm(ks[7], (C,))

    eps = 1e-5
    # BatchNorm1d(128)
    g1 = 1.0 + nrm(ks[8], (128,), 0.1);  be1 = nrm(ks[9], (128,), 0.1)
    m1 = nrm(ks[10], (128,), 0.1)
    v1 = 0.5 + jax.random.uniform(ks[11], (128,), dtype=jnp.float32)
    # BatchNorm1d(512)
    g3 = 1.0 + nrm(ks[12], (512,), 0.1); be3 = nrm(ks[13], (512,), 0.1)
    m3 = nrm(ks[14], (512,), 0.1)
    v3 = 0.5 + jax.random.uniform(ks[15], (512,), dtype=jnp.float32)

    s1 = g1 / jnp.sqrt(v1 + eps)
    w1f = w1 * s1[None, :]
    b1f = (b1 - m1) * s1 + be1

    s3 = g3 / jnp.sqrt(v3 + eps)
    w3f = w3 * s3[None, :]
    b3f = (b3 - m3) * s3 + be3

    w3a, w3b = w3f[:256], w3f[256:]
    params = (w1f, b1f[None, :], w2, b2[None, :],
              w3a, w3b, b3f[None, :], w4, b4[None, :])
    return params


def reference_forward(point_groups, params, encoder_channel):
    """Pure-JAX reference mirroring the PyTorch forward (folded eval-mode BN,
    bf16 matmul inputs with f32 accumulation — same precision as the kernel)."""
    (w1f, b1f, w2, b2, w3a, w3b, b3f, w4, b4) = params
    B, G, N, _ = point_groups.shape
    bf = jnp.bfloat16

    def mm(a, w):
        return jnp.einsum("bnc,cd->bnd", a.astype(bf), w.astype(bf),
                          preferred_element_type=jnp.float32)

    x = point_groups.reshape(B * G, N, 5)
    h1 = jax.nn.relu(mm(x, w1f) + b1f)                               # (BG, N, 128)
    f = mm(h1, w2) + b2                                              # (BG, N, 256)
    g = jnp.max(f, axis=1, keepdims=True)                            # (BG, 1, 256)
    feat = jnp.concatenate([jnp.broadcast_to(g, f.shape), f], axis=-1)  # (BG, N, 512)
    w3f = jnp.concatenate([w3a, w3b], axis=0)                        # (512, 512)
    h2 = jax.nn.relu(mm(feat, w3f) + b3f)                            # (BG, N, 512)
    f2 = mm(h2, w4) + b4                                             # (BG, N, C)
    return jnp.max(f2, axis=1).reshape(B, G, encoder_channel)


if __name__ == "__main__":
    # Small but representative shapes; G=17 deliberately exercises the
    # pad-to-multiple-of-TG path (BG=34 -> BG_pad=40 with TG=8).
    B, G, N = 2, 17, 32
    encoder_channel = 128

    key = jax.random.PRNGKey(0)
    k_pg, k_par = jax.random.split(key)
    point_groups = jax.random.normal(k_pg, (B, G, N, 5), dtype=jnp.float32)
    params = make_params(encoder_channel, k_par)

    out = encoder_5d_forward(point_groups, params, encoder_channel)
    out = jax.block_until_ready(out)

    ref = jax.block_until_ready(reference_forward(point_groups, params, encoder_channel))
    assert out.shape == (B, G, encoder_channel)
    assert jnp.allclose(out, ref, rtol=1e-2, atol=1e-2), "mismatch vs pure-JAX reference"

    print("KERNEL_OK")
</pallas_src>

<mosaic_0001>
module attributes {stable_mosaic.version = 11 : i64} {
  func.func @encoder5d_kernel(%arg0: i32, %arg1: memref<256x5xbf16, #tpu.memory_space<vmem>>, %arg2: memref<5x128xbf16, #tpu.memory_space<vmem>>, %arg3: memref<1x128xf32, #tpu.memory_space<vmem>>, %arg4: memref<128x256xbf16, #tpu.memory_space<vmem>>, %arg5: memref<1x256xf32, #tpu.memory_space<vmem>>, %arg6: memref<256x512xbf16, #tpu.memory_space<vmem>>, %arg7: memref<256x512xbf16, #tpu.memory_space<vmem>>, %arg8: memref<1x512xf32, #tpu.memory_space<vmem>>, %arg9: memref<512x128xbf16, #tpu.memory_space<vmem>>, %arg10: memref<1x128xf32, #tpu.memory_space<vmem>>, %arg11: memref<8x128xf32, #tpu.memory_space<vmem>>) attributes {dimension_semantics = [#tpu.dimension_semantics<parallel>], iteration_bounds = array<i64: 5>, scalar_prefetch = 0 : i64, scratch_operands = 0 : i64, tpu.core_type = #tpu.core_type<tc>, window_params = [{transform_indices = @transform_0, window_bounds = array<i64: 256, 5>}, {pipeline_mode = #tpu.pipeline_mode<synchronous>, transform_indices = @transform_1, window_bounds = array<i64: 5, 128>}, {pipeline_mode = #tpu.pipeline_mode<synchronous>, transform_indices = @transform_2, window_bounds = array<i64: 1, 128>}, {pipeline_mode = #tpu.pipeline_mode<synchronous>, transform_indices = @transform_3, window_bounds = array<i64: 128, 256>}, {pipeline_mode = #tpu.pipeline_mode<synchronous>, transform_indices = @transform_4, window_bounds = array<i64: 1, 256>}, {pipeline_mode = #tpu.pipeline_mode<synchronous>, transform_indices = @transform_5, window_bounds = array<i64: 256, 512>}, {pipeline_mode = #tpu.pipeline_mode<synchronous>, transform_indices = @transform_6, window_bounds = array<i64: 256, 512>}, {pipeline_mode = #tpu.pipeline_mode<synchronous>, transform_indices = @transform_7, window_bounds = array<i64: 1, 512>}, {pipeline_mode = #tpu.pipeline_mode<synchronous>, transform_indices = @transform_8, window_bounds = array<i64: 512, 128>}, {pipeline_mode = #tpu.pipeline_mode<synchronous>, transform_indices = @transform_9, window_bounds = array<i64: 1, 128>}, {transform_indices = @transform_10, window_bounds = array<i64: 8, 128>}]} {
    %c0 = arith.constant 0 : index
    %c0_0 = arith.constant 0 : index
    %0 = vector.load %arg1[%c0, %c0_0] : memref<256x5xbf16, #tpu.memory_space<vmem>>, vector<256x5xbf16>
    %c0_1 = arith.constant 0 : index
    %c0_2 = arith.constant 0 : index
    %1 = vector.load %arg2[%c0_1, %c0_2] : memref<5x128xbf16, #tpu.memory_space<vmem>>, vector<5x128xbf16>
    %cst = arith.constant dense<0.000000e+00> : vector<256x128xf32>
    %2 = tpu.matmul %0, %1, %cst {dimension_numbers = #tpu.dot_dimension_numbers<[1], [0], [0], [1], [0, 0, 1, 1], [], []>} : vector<256x5xbf16>, vector<5x128xbf16>, vector<256x128xf32> -> vector<256x128xf32>
    %c0_3 = arith.constant 0 : index
    %c0_4 = arith.constant 0 : index
    %3 = vector.load %arg3[%c0_3, %c0_4] : memref<1x128xf32, #tpu.memory_space<vmem>>, vector<1x128xf32>
    %4 = vector.broadcast %3 : vector<1x128xf32> to vector<256x128xf32>
    %5 = arith.addf %2, %4 : vector<256x128xf32>
    %cst_5 = arith.constant 0.000000e+00 : f32
    %6 = vector.broadcast %cst_5 : f32 to vector<256x128xf32>
    %7 = arith.maximumf %5, %6 : vector<256x128xf32>
    %8 = arith.truncf %7 : vector<256x128xf32> to vector<256x128xbf16>
    %c0_6 = arith.constant 0 : index
    %c0_7 = arith.constant 0 : index
    %9 = vector.load %arg4[%c0_6, %c0_7] : memref<128x256xbf16, #tpu.memory_space<vmem>>, vector<128x256xbf16>
    %cst_8 = arith.constant dense<0.000000e+00> : vector<256x256xf32>
    %10 = tpu.matmul %8, %9, %cst_8 {dimension_numbers = #tpu.dot_dimension_numbers<[1], [0], [0], [1], [0, 0, 1, 1], [], []>} : vector<256x128xbf16>, vector<128x256xbf16>, vector<256x256xf32> -> vector<256x256xf32>
    %c0_9 = arith.constant 0 : index
    %c0_10 = arith.constant 0 : index
    %11 = vector.load %arg5[%c0_9, %c0_10] : memref<1x256xf32, #tpu.memory_space<vmem>>, vector<1x256xf32>
    %12 = vector.broadcast %11 : vector<1x256xf32> to vector<256x256xf32>
    %13 = arith.addf %10, %12 : vector<256x256xf32>
    %14 = vector.shape_cast %13 : vector<256x256xf32> to vector<8x32x256xf32>
    %cst_11 = arith.constant dense<0xFF800000> : vector<8x256xf32>
    %15 = vector.multi_reduction <maximumf>, %14, %cst_11 [1] : vector<8x32x256xf32> to vector<8x256xf32>
    %16 = arith.truncf %15 : vector<8x256xf32> to vector<8x256xbf16>
    %c0_12 = arith.constant 0 : index
    %c0_13 = arith.constant 0 : index
    %17 = vector.load %arg6[%c0_12, %c0_13] : memref<256x512xbf16, #tpu.memory_space<vmem>>, vector<256x512xbf16>
    %cst_14 = arith.constant dense<0.000000e+00> : vector<8x512xf32>
    %18 = tpu.matmul %16, %17, %cst_14 {dimension_numbers = #tpu.dot_dimension_numbers<[1], [0], [0], [1], [0, 0, 1, 1], [], []>} : vector<8x256xbf16>, vector<256x512xbf16>, vector<8x512xf32> -> vector<8x512xf32>
    %19 = arith.truncf %13 : vector<256x256xf32> to vector<256x256xbf16>
    %c0_15 = arith.constant 0 : index
    %c0_16 = arith.constant 0 : index
    %20 = vector.load %arg7[%c0_15, %c0_16] : memref<256x512xbf16, #tpu.memory_space<vmem>>, vector<256x512xbf16>
    %cst_17 = arith.constant dense<0.000000e+00> : vector<256x512xf32>
    %21 = tpu.matmul %19, %20, %cst_17 {dimension_numbers = #tpu.dot_dimension_numbers<[1], [0], [0], [1], [0, 0, 1, 1], [], []>} : vector<256x256xbf16>, vector<256x512xbf16>, vector<256x512xf32> -> vector<256x512xf32>
    %22 = vector.shape_cast %21 : vector<256x512xf32> to vector<8x32x512xf32>
    %23 = vector.shape_cast %18 : vector<8x512xf32> to vector<8x1x512xf32>
    %24 = vector.broadcast %23 : vector<8x1x512xf32> to vector<8x32x512xf32>
    %25 = arith.addf %22, %24 : vector<8x32x512xf32>
    %c0_18 = arith.constant 0 : index
    %c0_19 = arith.constant 0 : index
    %26 = vector.load %arg8[%c0_18, %c0_19] : memref<1x512xf32, #tpu.memory_space<vmem>>, vector<1x512xf32>
    %27 = vector.shape_cast %26 : vector<1x512xf32> to vector<1x1x512xf32>
    %28 = vector.broadcast %27 : vector<1x1x512xf32> to vector<8x32x512xf32>
    %29 = arith.addf %25, %28 : vector<8x32x512xf32>
    %cst_20 = arith.constant 0.000000e+00 : f32
    %30 = vector.broadcast %cst_20 : f32 to vector<8x32x512xf32>
    %31 = arith.maximumf %29, %30 : vector<8x32x512xf32>
    %32 = vector.shape_cast %31 : vector<8x32x512xf32> to vector<256x512xf32>
    %33 = arith.truncf %32 : vector<256x512xf32> to vector<256x512xbf16>
    %c0_21 = arith.constant 0 : index
    %c0_22 = arith.constant 0 : index
    %34 = vector.load %arg9[%c0_21, %c0_22] : memref<512x128xbf16, #tpu.memory_space<vmem>>, vector<512x128xbf16>
    %cst_23 = arith.constant dense<0.000000e+00> : vector<256x128xf32>
    %35 = tpu.matmul %33, %34, %cst_23 {dimension_numbers = #tpu.dot_dimension_numbers<[1], [0], [0], [1], [0, 0, 1, 1], [], []>} : vector<256x512xbf16>, vector<512x128xbf16>, vector<256x128xf32> -> vector<256x128xf32>
    %c0_24 = arith.constant 0 : index
    %c0_25 = arith.constant 0 : index
    %36 = vector.load %arg10[%c0_24, %c0_25] : memref<1x128xf32, #tpu.memory_space<vmem>>, vector<1x128xf32>
    %37 = vector.broadcast %36 : vector<1x128xf32> to vector<256x128xf32>
    %38 = arith.addf %35, %37 : vector<256x128xf32>
    %39 = vector.shape_cast %38 : vector<256x128xf32> to vector<8x32x128xf32>
    %cst_26 = arith.constant dense<0xFF800000> : vector<8x128xf32>
    %40 = vector.multi_reduction <maximumf>, %39, %cst_26 [1] : vector<8x32x128xf32> to vector<8x128xf32>
    %c0_27 = arith.constant 0 : index
    %c0_28 = arith.constant 0 : index
    %41 = vector.load %arg11[%c0_27, %c0_28] : memref<8x128xf32, #tpu.memory_space<vmem>>, vector<8x128xf32>
    tpu.vector_store %arg11[%c0_27, %c0_28], %40 {strides = array<i32>} : memref<8x128xf32, #tpu.memory_space<vmem>>, vector<8x128xf32>,
    return
  }
  func.func @transform_0(%arg0: i32) -> (i32, i32) {
    %c0_i32 = arith.constant 0 : i32
    %c0_i32_0 = arith.constant 0 : i32
    return %arg0, %c0_i32 : i32, i32
  }
  func.func @transform_1(%arg0: i32) -> (i32, i32) {
    %c0_i32 = arith.constant 0 : i32
    %c0_i32_0 = arith.constant 0 : i32
    %c0_i32_1 = arith.constant 0 : i32
    return %c0_i32, %c0_i32_0 : i32, i32
  }
  func.func @transform_2(%arg0: i32) -> (i32, i32) {
    %c0_i32 = arith.constant 0 : i32
    %c0_i32_0 = arith.constant 0 : i32
    %c0_i32_1 = arith.constant 0 : i32
    return %c0_i32, %c0_i32_0 : i32, i32
  }
  func.func @transform_3(%arg0: i32) -> (i32, i32) {
    %c0_i32 = arith.constant 0 : i32
    %c0_i32_0 = arith.constant 0 : i32
    %c0_i32_1 = arith.constant 0 : i32
    return %c0_i32, %c0_i32_0 : i32, i32
  }
  func.func @transform_4(%arg0: i32) -> (i32, i32) {
    %c0_i32 = arith.constant 0 : i32
    %c0_i32_0 = arith.constant 0 : i32
    %c0_i32_1 = arith.constant 0 : i32
    return %c0_i32, %c0_i32_0 : i32, i32
  }
  func.func @transform_5(%arg0: i32) -> (i32, i32) {
    %c0_i32 = arith.constant 0 : i32
    %c0_i32_0 = arith.constant 0 : i32
    %c0_i32_1 = arith.constant 0 : i32
    return %c0_i32, %c0_i32_0 : i32, i32
  }
  func.func @transform_6(%arg0: i32) -> (i32, i32) {
    %c0_i32 = arith.constant 0 : i32
    %c0_i32_0 = arith.constant 0 : i32
    %c0_i32_1 = arith.constant 0 : i32
    return %c0_i32, %c0_i32_0 : i32, i32
  }
  func.func @transform_7(%arg0: i32) -> (i32, i32) {
    %c0_i32 = arith.constant 0 : i32
    %c0_i32_0 = arith.constant 0 : i32
    %c0_i32_1 = arith.constant 0 : i32
    return %c0_i32, %c0_i32_0 : i32, i32
  }
  func.func @transform_8(%arg0: i32) -> (i32, i32) {
    %c0_i32 = arith.constant 0 : i32
    %c0_i32_0 = arith.constant 0 : i32
    %c0_i32_1 = arith.constant 0 : i32
    return %c0_i32, %c0_i32_0 : i32, i32
  }
  func.func @transform_9(%arg0: i32) -> (i32, i32) {
    %c0_i32 = arith.constant 0 : i32
    %c0_i32_0 = arith.constant 0 : i32
    %c0_i32_1 = arith.constant 0 : i32
    return %c0_i32, %c0_i32_0 : i32, i32
  }
  func.func @transform_10(%arg0: i32) -> (i32, i32) {
    %c0_i32 = arith.constant 0 : i32
    %c0_i32_0 = arith.constant 0 : i32
    return %arg0, %c0_i32 : i32, i32
  }
}

</mosaic_0001>

<bundles_post_ra>
// kernel: tpu_custom_call.1
= control target key start
LH: loop header
LB: loop body
LE: loop exit
PB: predicated region body
PF: predicated region fallthrough
CT: control target
= control target key end

     0   :  { %15 = vsyncpa [#allocation3], 0  ;;  %s6576_s0 = inlined_call_operand.vmem [shape: bf16[1280,5], index: 0, kind: input, shape index: {}]   ;;  %s6577_s1 = inlined_call_operand.vmem [shape: bf16[5,128], index: 1, kind: input, shape index: {}]   ;;  %s6578_s2 = inlined_call_operand.vmem [shape: f32[1,128], index: 2, kind: input, shape index: {}]   ;;  %s6579_s3 = inlined_call_operand.vmem [shape: bf16[128,256], index: 3, kind: input, shape index: {}]   ;;  %s6580_s4 = inlined_call_operand.vmem [shape: f32[1,256], index: 4, kind: input, shape index: {}]   ;;  %s6581_s5 = inlined_call_operand.vmem [shape: bf16[256,512], index: 5, kind: input, shape index: {}]   ;;  %s6582_s6 = inlined_call_operand.hbm [shape: bf16[256,512], index: 6, kind: input, shape index: {}]   ;;  %s6583_s7 = inlined_call_operand.vmem [shape: f32[1,512], index: 7, kind: input, shape index: {}]   ;;  %s6584_s8 = inlined_call_operand.hbm [shape: bf16[512,128], index: 8, kind: input, shape index: {}]   ;;  %s6585_s9 = inlined_call_operand.vmem [shape: f32[1,128], index: 9, kind: input, shape index: {}]   ;;  %s6586_s10 = inlined_call_operand.hbm [shape: f32[40,128], index: 10, kind: output, shape index: {}]  }
   0x1   :  { %16 = vsyncpa [#allocation6], 0 }
   0x2   :  { %17 = vsyncpa [#allocation4], 0 }
   0x3   :  { %19 = vsyncpa [#allocation4 + $0x1], 0  ;;  %s5073_s13 = smov 0   ;;  %s5075_s14 = smov 0  }
   0x4   :  { %s5077_s15 = smov 0   ;;  %s5079_s16 = smov 0  }
   0x5 LB: > { %6606 = sst [smem:[#allocation11_spill]] %s5002_s15  ;;  %s5094_s17 = sadd.s32 4294967295, %s5006_s16   ;;  %s5006_s16 = sphi %s5079_s16, %s6726_s16   ;;  %s5002_s15 = sphi %s5077_s15, %s6728_s15   ;;  %s4998_s14 = sphi %s5075_s14, %s6730_s14   ;;  %s4994_s13 = sphi %s5073_s13, %s6729_s13  }
   0x6   : > { %s4033_s18 = sadd.s32 4294967294, %s5006_s16   ;;  %s5098_s19 = sadd.s32 1, %s5006_s16  }
   0x7   : > { %6607 = sst [smem:[#allocation12_spill]] %s5098_s19  ;;  %s247_s20 = sadd.s32 1, %s5002_s15 }
   0x8   : > { %s244_s21 = ssub.s32 %s5006_s16, %s5098_s19  ;;  %p257_p0 = scmp.ne.s32.totalorder %s5002_s15, %s4998_s14 }
   0x9   : > { %p245_p1 = scmp.eq.s32.totalorder %s244_s21, 0  ;;  %p258_p2 = scmp.eq.s32.totalorder %s5094_s17, 4 }
   0xa   : > { %p263_p3 = scmp.ne.s32.totalorder %s4998_s14, %s4994_s13  ;;  %p264_p4 = scmp.eq.s32.totalorder %s4033_s18, 4 }
   0xb   : > { %s5109_s22 = scalar_select %p245_p1, %s5002_s15, %s247_s20  }
   0xc   : > { %p5111_p5 = por %p258_p2, %p257_p0  ;;  %p5115_p6 = por %p264_p4, %p263_p3 }
   0xd   : > { %6608 = sst [smem:[#allocation13_spill]] %s5109_s22  ;;  %p4034_p7 = scmp.ge.s32.totalorder %s5006_s16, 1 }
   0xe   : > { %s6609_s23 = scalar_select %p5111_p5, 1, 0 }
   0xf   : > { %s6610_s24 = scalar_select %p5115_p6, 1, 0 }
  0x10   : > { %p271_p8 = scmp.lt.s32.totalorder %s5006_s16, 6  ;;  %p6587_p9 = scmp.eq.s32.totalorder %s5094_s17, 0 }
  0x11   : > { %6611 = sst [smem:[#allocation14_spill]] %s6610_s24  ;;  %s5008_s26 = smov [#allocation2]  }
  0x12   : > { %p5122_p10 = pnand %p4034_p7, %p271_p8  ;;  %s298_s27 = sshll.u32 %s5008_s26, 4  ;;  %s299_s27 = int_to_ptr.vmem [resolvable:$true] %s298_s27 }
  0x13   : > { %s5009_s29 = smov [#allocation5]   ;;  %s4880_s18 = scalar_lea.hbm %s6582_s6, 8192 }
  0x14   : > { %s6612_s25 = scalar_select %p5122_p10, 1, 0 }
  0x15   : > { %p4559_p11 = pneg %p5122_p10  ;;  %s314_s30 = sshll.u32 %s5009_s29, 4  ;;  %s5134_s30 = int_to_ptr.vmem [resolvable:$true] %s314_s30 }
  0x16   : > { %p4881_p13 = scmp.ne.s32.totalorder %s6582_s6, %s4880_s18  ;;  %p4887_p3 = scmp.lt.u32.totalorder %s4880_s18, %s6582_s6 }
  0x17   : > { %p5130_p12 = pnand %p6587_p9, %p4559_p11 }
  0x19   : > { %p4882_p0 = pneg %p5130_p12 }
  0x1b   : > { %p4883_p1 = pnand %p4882_p0, %p4881_p13 }
  0x1d   : > { %p4884_p2 = pneg %p4883_p1 }
  0x1f   : > { %p4889_p4 = pnand %p4887_p3, %p4884_p2 }
  0x21   : > { %4892 = shalt.err (!%p4889_p4)
}
  0x22   : > { %s4893_s29 = scalar_lea.vmem %s299_s27, 8192  ;;  %p4901_p9 = scmp.lt.s32.totalorder %s299_s27, %s299_s27 }
  0x23   : > { %p4894_p7 = scmp.ne.s32.totalorder %s299_s27, %s4893_s29  ;;  %p4902_p6 = scmp.lt.s32.totalorder %s4893_s29, %s4893_s29 }
  0x25   : > { %p4896_p8 = pnand %p4894_p7, %p4882_p0  ;;  %p4903_p5 = por %p4902_p6, %p4901_p9 }
  0x27   : > { %p4897_p11 = pneg %p4896_p8 }
  0x29   : > { %p4904_p10 = pnand %p4903_p5, %p4897_p11 }
  0x2b   : > { %4907 = shalt.err (!%p4904_p10)
}
  0x2c   : > { %s5010_s11 = smov 256   ;;  %s5011_s12 = smov 16  }
  0x2d   : > { %4562 = dma.hbm_to_vmem [thread:$0]  (!%p5130_p12), %s6582_s6, 8192, %s299_s27, [#allocation3], %s5010_s11, %s5010_s11, %s5011_s12  }
  0x2e   : > { %s4908_s26 = scalar_lea.hbm %s6584_s8, 4096 }
  0x2f   : > { %p4909_p13 = scmp.ne.s32.totalorder %s6584_s8, %s4908_s26  ;;  %p4915_p9 = scmp.lt.u32.totalorder %s4908_s26, %s6584_s8 }
  0x31   : > { %p4911_p5 = pnand %p4909_p13, %p4882_p0 }
  0x33   : > { %p4912_p6 = pneg %p4911_p5 }
  0x35   : > { %p4917_p10 = pnand %p4915_p9, %p4912_p6 }
  0x37   : > { %4920 = shalt.err (!%p4917_p10)
}
  0x38   : > { %s4921_s27 = scalar_lea.vmem %s5134_s30, 4096  ;;  %p4929_p4 = scmp.lt.s32.totalorder %s5134_s30, %s5134_s30 }
  0x39   : > { %p4922_p1 = scmp.ne.s32.totalorder %s5134_s30, %s4921_s27  ;;  %p4930_p7 = scmp.lt.s32.totalorder %s4921_s27, %s4921_s27 }
  0x3b   : > { %p4924_p2 = pnand %p4922_p1, %p4882_p0  ;;  %p4931_p8 = por %p4930_p7, %p4929_p4 }
  0x3d   : > { %p4925_p3 = pneg %p4924_p2 }
  0x3f   : > { %p4932_p11 = pnand %p4931_p8, %p4925_p3 }
  0x41   : > { %4935 = shalt.err (!%p4932_p11)
}
  0x42   : > { %s5012_s15 = smov 64   ;;  %s5013_s19 = smov 4  }
  0x43   : > { %4565 = dma.hbm_to_vmem [thread:$0]  (!%p5130_p12), %s6584_s8, 4096, %s5134_s30, [#allocation6], %s5012_s15, %s5012_s15, %s5013_s19  }
  0x44   : > { %p6614_p13 = scmp.ne.s32.totalorder %s6612_s25, 0 }
  0x46   : > { %342 = sbr.rel (%p6614_p13) target bundleno = 1392 (0x570), region = 60 }
  0x4d   : > { %p6615_p0 = scmp.eq.s32.totalorder %s5094_s17, 0 }
  0x4f   : > { %4981 = dma.done.wait (%p6615_p0), [#allocation3], 8192   ;;  %p6616_p5 = pmov %p6615_p0 }
  0x50   : > { %p6617_p6 = pmov %p6615_p0 }
  0x51   : > { %4983 = vsyncadd (%p6616_p5), [#allocation3], 4294959104 }
  0x52   : > { %4985 = dma.done.wait (%p6617_p6), [#allocation6], 4096   ;;  %p6618_p9 = pmov %p6615_p0 }
  0x53   : > { %vm560_vm0 = vcmask 1041408   ;;  %s4042_s28 = sshll.u32 %s5094_s17, 5  ;;  %vm561_vm1 = vcmask 1042432   ;;  %v5014_v0 = vmov 65535   ;;  %vm511_vm2 = vcmask 39936   ;;  %s381_s15 = sand.u32 1, %s4998_s14  }
  0x54   : > { %4987 = vsyncadd (%p6618_p9), [#allocation6], 4294963200  ;;  %p385_p10 = scmp.lt.s32.totalorder %s4042_s28, 159  ;;  %v562_v1 = vsel %vm560_vm0, 4294967295, %v5014_v0  ;;  %v423_v3 = vld [vmem:[%s6577_s1] sm:$0x7] }
  0x55   : > { %v563_v2 = vsel %vm561_vm1, %v562_v1, 0  ;;  %v4632_v10 = vld [vmem:[%s6579_s3 + $0x4] ss:$8 sps:$4 sm:$0xff]   ;;  %v4634_v11 = vld [vmem:[%s6579_s3] ss:$8 sps:$4 sm:$0xff]   ;;  %v5015_v37 = vmov 0  }
  0x56   : > { %s6732_s28 = smov (!%p385_p10, %s4042_s28), 159  ;;  %v565_v4 = vand.u32 %v563_v2, %v423_v3  ;;  %v4635_v13 = vld [vmem:[%s6579_s3 + $0x14] ss:$8 sps:$4 sm:$0xff]   ;;  %884 = vmatprep.subr.bf16.mxu1 %v4632_v10  ;;  %v4637_v15 = vld [vmem:[%s6579_s3 + $0x10] ss:$8 sps:$4 sm:$0xff]   ;;  %916 = vmatprep.mubr.bf16.mxu1 %v5015_v37  ;;  %vm1333_vm3 = vcmask 1041409  }
  0x57   : > { %s4043_s25 = sshll.u32 %s6732_s28, 2  ;;  %885 = vmatpush1.bf16.msra.mxu1 %v4634_v11  ;;  %v4638_v16 = vld [vmem:[%s6579_s3 + $0x24] ss:$8 sps:$4 sm:$0xff]   ;;  %v4640_v17 = vld [vmem:[%s6579_s3 + $0x20] ss:$8 sps:$4 sm:$0xff]   ;;  %vm1335_vm4 = vcmask 1042434  }
  0x58   : > { %s5197_s22 = scalar_lea.vmem %s6576_s0, %s4043_s25  ;;  %4499 = vmatprep.subr.bf16.mxu0 %v565_v4  ;;  %886 = vmatprep.subr.bf16.mxu1 %v4635_v13  ;;  %v4641_v18 = vld [vmem:[%s6579_s3 + $0x34] ss:$8 sps:$4 sm:$0xff]   ;;  %v4643_v21 = vld [vmem:[%s6579_s3 + $0x30] ss:$8 sps:$4 sm:$0xff]   ;;  %v4644_v22 = vld [vmem:[%s6579_s3 + $0x44] ss:$8 sps:$4 sm:$0xff]  }
  0x59   : > { %v4616_v5 = vld [vmem:[%s5197_s22] sm:$0xff]   ;;  %v4617_v6 = vld [vmem:[%s5197_s22 + $0x8] sm:$0xff]   ;;  %4500 = vmatpush3.bf16.msra.mxu0 %v565_v4  ;;  %v4618_v7 = vld [vmem:[%s5197_s22 + $0x10] sm:$0xff]   ;;  %vm1337_vm5 = vcmask 1043459   ;;  %vm1339_vm6 = vcmask 1044484   ;;  %vm1341_vm7 = vcmask 1045509  }
  0x5a   : > { %4501 = vmatprep.mubr.msk.bf16.mxu0 %vm511_vm2, %v4616_v5  ;;  %v4619_v8 = vld [vmem:[%s5197_s22 + $0x18] sm:$0xff]   ;;  %v4620_v9 = vld [vmem:[%s5197_s22 + $0x20] sm:$0xff]   ;;  %v4621_v12 = vld [vmem:[%s5197_s22 + $0x28] sm:$0xff]   ;;  %vm1343_vm8 = vcmask 1046534   ;;  %vm1345_vm9 = vcmask 1047559   ;;  %s4041_s19 = sshll.u32 %s381_s15, 3 }
  0x5b   : > { %v4622_v14 = vld [vmem:[%s5197_s22 + $0x30] sm:$0xff]   ;;  %887 = vmatpush1.bf16.msra.mxu1 %v4637_v15  ;;  %v4623_v19 = vld [vmem:[%s5197_s22 + $0x38] sm:$0xff]   ;;  %v4624_v20 = vld [vmem:[%s5197_s22 + $0x40] sm:$0xff]   ;;  %s4255_s24 = sshll.u32 %s5094_s17, 7  ;;  %s383_s11 = scalar_lea.vmem [#allocation7], %s4041_s19 }
  0x5c   : > { %4502 = vmatmul.mubr.msk.bf16.vlgmr.msra.gmra.mrb[0].mxu0 %vm511_vm2, %v4617_v6  ;;  %888 = vmatprep.subr.bf16.mxu1 %v4638_v16  ;;  %v4646_v23 = vld [vmem:[%s6579_s3 + $0x40] ss:$8 sps:$4 sm:$0xff]   ;;  %v4647_v24 = vld [vmem:[%s6579_s3 + $0x54] ss:$8 sps:$4 sm:$0xff]   ;;  %v4649_v27 = vld [vmem:[%s6579_s3 + $0x50] ss:$8 sps:$4 sm:$0xff]   ;;  %s6533_s12 = scalar_lea.hbm %s6586_s10, %s4255_s24 }
  0x5d   : > { %4505 = vmatprep.mubr.msk.bf16.mxu0 %vm511_vm2, %v4618_v7  ;;  %v4625_v25 = vld [vmem:[%s5197_s22 + $0x48] sm:$0xff]   ;;  %v4626_v26 = vld [vmem:[%s5197_s22 + $0x50] sm:$0xff]   ;;  %v4627_v28 = vld [vmem:[%s5197_s22 + $0x58] sm:$0xff]   ;;  %s3952_s28 = sshll.u32 %s383_s11, 4  ;;  %s3939_s18 = scalar_lea.sflag [#allocation4], %s381_s15  ;;  %s6535_s28 = int_to_ptr.vmem [resolvable:$true] %s3952_s28 }
  0x5e   : > { %v4628_v29 = vld [vmem:[%s5197_s22 + $0x60] sm:$0xff]   ;;  %v4629_v30 = vld [vmem:[%s5197_s22 + $0x68] sm:$0xff]   ;;  %v4630_v31 = vld [vmem:[%s5197_s22 + $0x70] sm:$0xff]   ;;  %s4936_s20 = scalar_lea.vmem %s6535_s28, 128  ;;  %p6723_p1 = scmp.ne.s32.totalorder %s6609_s23, 0 }
  0x5f   : > { %889 = vmatpush1.bf16.msra.mxu1 %v4640_v17  ;;  %v4631_v32 = vld [vmem:[%s5197_s22 + $0x78] sm:$0xff]   ;;  %v4650_v33 = vld [vmem:[%s6579_s3 + $0x64] ss:$8 sps:$4 sm:$0xff]   ;;  %v4652_v34 = vld [vmem:[%s6579_s3 + $0x60] ss:$8 sps:$4 sm:$0xff]   ;;  %p4937_p12 = scmp.ne.s32.totalorder %s6535_s28, %s4936_s20  ;;  %s5017_s17 = smov [#allocation7]  }
  0x60   : > { %890 = vmatprep.subr.bf16.mxu1 %v4641_v18  ;;  %v4653_v35 = vld [vmem:[%s6579_s3 + $0x74] ss:$8 sps:$4 sm:$0xff]   ;;  %v4655_v36 = vld [vmem:[%s6579_s3 + $0x70] ss:$8 sps:$4 sm:$0xff]   ;;  %v5286_v38 = vld [vmem:[%s6578_s2] ss:$0 sm:$0xff] }
  0x61   : > { %v4658_v44 = vld [vmem:[#allocation2 + $0x4] ss:$16 sps:$4 sm:$0xff]   ;;  %v4656_v53 = vld [vmem:[#allocation2] ss:$16 sps:$4 sm:$0xff]   ;;  %p4938_p2 = pnand %p4937_p12, %p6723_p1  ;;  %s4940_s21 = sshll.u32 %s5017_s17, 4  ;;  %s4941_s21 = int_to_ptr.vmem [resolvable:$false] %s4940_s21 }
  0x62   : > { %v4661_v56 = vld [vmem:[#allocation2 + $0x24] ss:$16 sps:$4 sm:$0xff]   ;;  %v4659_v0 = vld [vmem:[#allocation2 + $0x20] ss:$16 sps:$4 sm:$0xff]   ;;  %s4942_s26 = scalar_lea.vmem %s4941_s21, 256  ;;  %p4943_p4 = scmp.lt.s32.totalorder %s6535_s28, %s4941_s21 }
  0x63   : > { %891 = vmatpush1.bf16.msra.mxu1 %v4643_v21  ;;  %v4664_v3 = vld [vmem:[#allocation2 + $0x44] ss:$16 sps:$4 sm:$0xff]   ;;  %v4662_v7 = vld [vmem:[#allocation2 + $0x40] ss:$16 sps:$4 sm:$0xff]   ;;  %p4939_p3 = pneg %p4938_p2  ;;  %p4944_p7 = scmp.lt.s32.totalorder %s4942_s26, %s4936_s20 }
  0x64   : > { %4506 = vmatmul.mubr.msk.bf16.gmra.mrb[4].mxu0 %vm511_vm2, %v4619_v8  ;;  %892 = vmatprep.subr.bf16.mxu1 %v4644_v22  ;;  %v4667_v10 = vld [vmem:[#allocation2 + $0x64] ss:$16 sps:$4 sm:$0xff]   ;;  %v4665_v18 = vld [vmem:[#allocation2 + $0x60] ss:$16 sps:$4 sm:$0xff]  }
  0x65   : > { %4509 = vmatprep.mubr.msk.bf16.mxu0 %vm511_vm2, %v4620_v9  ;;  %v4670_v21 = vld [vmem:[#allocation2 + $0x84] ss:$16 sps:$4 sm:$0xff]   ;;  %p4945_p8 = por %p4944_p7, %p4943_p4 }
  0x67   : > { %893 = vmatpush1.bf16.msra.mxu1 %v4646_v23  ;;  %p4946_p11 = pnand %p4945_p8, %p4939_p3 }
  0x68   : > { %894 = vmatprep.subr.bf16.mxu1 %v4647_v24 }
  0x6b   : > { %895 = vmatpush1.bf16.msra.mxu1 %v4649_v27 }
  0x6c   : > { %4510 = vmatmul.mubr.msk.bf16.gmra.mrb[8].mxu0 %vm511_vm2, %v4621_v12  ;;  %896 = vmatprep.subr.bf16.mxu1 %v4650_v33 }
  0x6d   : > { %4513 = vmatprep.mubr.msk.bf16.mxu0 %vm511_vm2, %v4622_v14 }
  0x6f   : > { %897 = vmatpush1.bf16.msra.mxu1 %v4652_v34 }
  0x70   : > { %898 = vmatprep.subr.bf16.mxu1 %v4653_v35 }
  0x73   : > { %899 = vmatpush1.bf16.msra.mxu1 %v4655_v36  ;;  %v4671_v36 = vld [vmem:[#allocation2 + $0xa0] ss:$16 sps:$4 sm:$0xff]  }
  0x74   : > { %4514 = vmatmul.mubr.msk.bf16.gmra.mrb[12].mxu0 %vm511_vm2, %v4623_v19  ;;  %2176 = vmatprep.subr.bf16.mxu1 %v4658_v44 }
  0x75   : > { %4517 = vmatprep.mubr.msk.bf16.mxu0 %vm511_vm2, %v4624_v20 }
  0x7c   : > { %4518 = vmatmul.mubr.msk.bf16.gmra.mrb[16].mxu0 %vm511_vm2, %v4625_v25  ;;  %v4668_v25 = vld [vmem:[#allocation2 + $0x80] ss:$16 sps:$4 sm:$0xff]  }
  0x7d   : > { %4521 = vmatprep.mubr.msk.bf16.mxu0 %vm511_vm2, %v4626_v26 }
  0x84   : > { %4522 = vmatmul.mubr.msk.bf16.gmra.mrb[20].mxu0 %vm511_vm2, %v4627_v28  ;;  %v4673_v28 = vld [vmem:[#allocation2 + $0xa4] ss:$16 sps:$4 sm:$0xff]  }
  0x85   : > { %4525 = vmatprep.mubr.msk.bf16.mxu0 %vm511_vm2, %v4628_v29 }
  0x8c   : > { %4526 = vmatmul.mubr.msk.bf16.gmra.mrb[24].mxu0 %vm511_vm2, %v4629_v30 }
  0x8d   : > { %4529 = vmatprep.mubr.msk.bf16.mxu0 %vm511_vm2, %v4630_v31 }
  0x94   : > { %4530 = vmatmul.mubr.msk.bf16.gmra.mrb[28].mxu0 %vm511_vm2, %v4631_v32 }
 0x12f   : > { %v4503_v39 = vpop.f32.mrb[0].mxu0 }
 0x130   : > { %v610_v40 = vadd.f32 %v4503_v39, %v5286_v38  ;;  %v601_v41 = vpop.f32.mrb[1].mxu0 }
 0x131   : > { %v602_v42 = vadd.f32 %v5286_v38, %v601_v41  ;;  %v4504_v43 = vpop.f32.mrb[2].mxu0  ;;  %v4676_v41 = vld [vmem:[#allocation2 + $0xc4] ss:$16 sps:$4 sm:$0xff]  }
 0x132   : > { %v613_v45 = vadd.f32 %v4504_v43, %v5286_v38  ;;  %v604_v46 = vpop.f32.mrb[3].mxu0  ;;  %v730_v48 = vmax.f32 %v610_v40, 0.0 }
 0x133   : > { %v605_v47 = vadd.f32 %v5286_v38, %v604_v46  ;;  %v728_v50 = vmax.f32 %v602_v42, 0.0 }
 0x134   : > { %v731_v49 = vmax.f32 %v613_v45, 0.0  ;;  %v4674_v45 = vld [vmem:[#allocation2 + $0xc0] ss:$16 sps:$4 sm:$0xff]  }
 0x135   : > { %v729_v51 = vmax.f32 %v605_v47, 0.0 }
 0x136   : > { %v761_v52 = vpack.c.bf16 %v731_v49, %v730_v48  ;;  %v4679_v48 = vld [vmem:[#allocation2 + $0xe4] ss:$16 sps:$4 sm:$0xff]  }
 0x137   : > { %v760_v54 = vpack.c.bf16 %v729_v51, %v728_v50  ;;  %v4507_v55 = vpop.f32.mrb[4].mxu0 }
 0x138   : > { %v626_v57 = vadd.f32 %v4507_v55, %v5286_v38  ;;  %v617_v58 = vpop.f32.mrb[5].mxu0 }
 0x139   : > { %917 = vmatmul.mubr.bf16.vlgmr.msra.gmra.mrb[0].mxu1 %v760_v54  ;;  %v618_v59 = vadd.f32 %v5286_v38, %v617_v58  ;;  %v4508_v60 = vpop.f32.mrb[6].mxu0 }
 0x13a   : > { %v734_v61 = vmax.f32 %v626_v57, 0.0  ;;  %v629_v62 = vadd.f32 %v4508_v60, %v5286_v38  ;;  %v620_v63 = vpop.f32.mrb[7].mxu0  ;;  %926 = vmatprep.mubr.bf16.mxu1 %v5015_v37  ;;  %2177 = vmatpush1.bf16.msra.mxu1 %v4656_v53 }
 0x13b   : > { %v732_v1 = vmax.f32 %v618_v59, 0.0  ;;  %v621_v2 = vadd.f32 %v5286_v38, %v620_v63  ;;  %2178 = vmatprep.subr.bf16.mxu1 %v4661_v56  ;;  %v4677_v56 = vld [vmem:[#allocation2 + $0xe0] ss:$16 sps:$4 sm:$0xff]   ;;  %v4682_v59 = vld [vmem:[#allocation2 + $0x104] ss:$16 sps:$4 sm:$0xff]  }
 0x13c   : > { %v735_v4 = vmax.f32 %v629_v62, 0.0  ;;  %v4680_v63 = vld [vmem:[#allocation2 + $0x100] ss:$16 sps:$4 sm:$0xff]  }
 0x13d   : > { %v733_v5 = vmax.f32 %v621_v2, 0.0  ;;  %v4685_v2 = vld [vmem:[#allocation2 + $0x124] ss:$16 sps:$4 sm:$0xff]  }
 0x13e   : > { %v763_v6 = vpack.c.bf16 %v735_v4, %v734_v61  ;;  %2179 = vmatpush1.bf16.msra.mxu1 %v4659_v0 }
 0x13f   : > { %v762_v8 = vpack.c.bf16 %v733_v5, %v732_v1  ;;  %v4511_v9 = vpop.f32.mrb[8].mxu0  ;;  %2180 = vmatprep.subr.bf16.mxu1 %v4664_v3 }
 0x140   : > { %v642_v11 = vadd.f32 %v4511_v9, %v5286_v38  ;;  %v633_v12 = vpop.f32.mrb[9].mxu0 }
 0x141   : > { %927 = vmatmul.mubr.bf16.gmra.mrb[4].mxu1 %v761_v52  ;;  %v634_v13 = vadd.f32 %v5286_v38, %v633_v12  ;;  %v4512_v14 = vpop.f32.mrb[10].mxu0 }
 0x142   : > { %936 = vmatprep.mubr.bf16.mxu1 %v5015_v37  ;;  %v738_v15 = vmax.f32 %v642_v11, 0.0  ;;  %v645_v16 = vadd.f32 %v4512_v14, %v5286_v38  ;;  %v636_v17 = vpop.f32.mrb[11].mxu0  ;;  %2181 = vmatpush1.bf16.msra.mxu1 %v4662_v7 }
 0x143   : > { %v736_v19 = vmax.f32 %v634_v13, 0.0  ;;  %v637_v20 = vadd.f32 %v5286_v38, %v636_v17  ;;  %2182 = vmatprep.subr.bf16.mxu1 %v4667_v10  ;;  %v4683_v10 = vld [vmem:[#allocation2 + $0x120] ss:$16 sps:$4 sm:$0xff]   ;;  %v4688_v13 = vld [vmem:[#allocation2 + $0x144] ss:$16 sps:$4 sm:$0xff]  }
 0x144   : > { %v739_v22 = vmax.f32 %v645_v16, 0.0  ;;  %v4686_v17 = vld [vmem:[#allocation2 + $0x140] ss:$16 sps:$4 sm:$0xff]  }
 0x145   : > { %v737_v23 = vmax.f32 %v637_v20, 0.0  ;;  %v4691_v20 = vld [vmem:[#allocation2 + $0x164] ss:$16 sps:$4 sm:$0xff]  }
 0x146   : > { %v5302_v24 = vpack.c.bf16 %v739_v22, %v738_v15  ;;  %2183 = vmatpush1.bf16.msra.mxu1 %v4665_v18 }
 0x147   : > { %v764_v26 = vpack.c.bf16 %v737_v23, %v736_v19  ;;  %v4515_v27 = vpop.f32.mrb[12].mxu0  ;;  %2184 = vmatprep.subr.bf16.mxu1 %v4670_v21 }
 0x148   : > { %v658_v29 = vadd.f32 %v4515_v27, %v5286_v38  ;;  %v649_v30 = vpop.f32.mrb[13].mxu0 }
 0x149   : > { %937 = vmatmul.mubr.bf16.gmra.mrb[8].mxu1 %v762_v8  ;;  %v650_v31 = vadd.f32 %v5286_v38, %v649_v30  ;;  %v4516_v32 = vpop.f32.mrb[14].mxu0 }
 0x14a   : > { %946 = vmatprep.mubr.bf16.mxu1 %v5015_v37  ;;  %v742_v33 = vmax.f32 %v658_v29, 0.0  ;;  %v661_v34 = vadd.f32 %v4516_v32, %v5286_v38  ;;  %v652_v35 = vpop.f32.mrb[15].mxu0  ;;  %2185 = vmatpush1.bf16.msra.mxu1 %v4668_v25  ;;  %v4689_v29 = vld [vmem:[#allocation2 + $0x160] ss:$16 sps:$4 sm:$0xff]   ;;  %v4694_v32 = vld [vmem:[#allocation2 + $0x184] ss:$16 sps:$4 sm:$0xff]  }
 0x14b   : > { %v740_v39 = vmax.f32 %v650_v31, 0.0  ;;  %v653_v40 = vadd.f32 %v5286_v38, %v652_v35  ;;  %2186 = vmatprep.subr.bf16.mxu1 %v4673_v28 }
 0x14c   : > { %v743_v42 = vmax.f32 %v661_v34, 0.0 }
 0x14d   : > { %v741_v43 = vmax.f32 %v653_v40, 0.0  ;;  %v4697_v40 = vld [vmem:[#allocation2 + $0x1a4] ss:$16 sps:$4 sm:$0xff]  }
 0x14e   : > { %v5309_v44 = vpack.c.bf16 %v743_v42, %v742_v33  ;;  %2187 = vmatpush1.bf16.msra.mxu1 %v4671_v36 }
 0x14f   : > { %v5311_v46 = vpack.c.bf16 %v741_v43, %v740_v39  ;;  %v4519_v47 = vpop.f32.mrb[16].mxu0  ;;  %2188 = vmatprep.subr.bf16.mxu1 %v4676_v41 }
 0x150   : > { %v674_v49 = vadd.f32 %v4519_v47, %v5286_v38  ;;  %v665_v50 = vpop.f32.mrb[17].mxu0 }
 0x151   : > { %947 = vmatmul.mubr.bf16.gmra.mrb[12].mxu1 %v763_v6  ;;  %v666_v51 = vadd.f32 %v5286_v38, %v665_v50  ;;  %v4520_v52 = vpop.f32.mrb[18].mxu0  ;;  %v4695_v50 = vld [vmem:[#allocation2 + $0x1a0] ss:$16 sps:$4 sm:$0xff]  }
 0x152   : > { %956 = vmatprep.mubr.bf16.mxu1 %v5015_v37  ;;  %v746_v53 = vmax.f32 %v674_v49, 0.0  ;;  %v677_v54 = vadd.f32 %v4520_v52, %v5286_v38  ;;  %v668_v55 = vpop.f32.mrb[19].mxu0  ;;  %2189 = vmatpush1.bf16.msra.mxu1 %v4674_v45 }
 0x153   : > { %v744_v57 = vmax.f32 %v666_v51, 0.0  ;;  %v669_v58 = vadd.f32 %v5286_v38, %v668_v55  ;;  %2190 = vmatprep.subr.bf16.mxu1 %v4679_v48 }
 0x154   : > { %v747_v60 = vmax.f32 %v677_v54, 0.0 }
 0x155   : > { %v745_v61 = vmax.f32 %v669_v58, 0.0  ;;  %v4701_v58 = vld [vmem:[#allocation2 + $0x1e0] ss:$16 sps:$4 sm:$0xff]  }
 0x156   : > { %v5318_v62 = vpack.c.bf16 %v747_v60, %v746_v53  ;;  %2191 = vmatpush1.bf16.msra.mxu1 %v4677_v56  ;;  %v4698_v56 = vld [vmem:[#allocation2 + $0x1c0] ss:$16 sps:$4 sm:$0xff]   ;;  %v4709_v60 = vld [vmem:[%s6581_s5 + $0x24] ss:$16 sps:$4 sm:$0xff]  }
 0x157   : > { %v5320_v0 = vpack.c.bf16 %v745_v61, %v744_v57  ;;  %v4523_v1 = vpop.f32.mrb[20].mxu0  ;;  %2192 = vmatprep.subr.bf16.mxu1 %v4682_v59  ;;  %v4703_v57 = vld [vmem:[#allocation2 + $0x1e4] ss:$16 sps:$4 sm:$0xff]   ;;  %v4704_v59 = vld [vmem:[%s6581_s5] ss:$16 sps:$4 sm:$0xff]  }
 0x158   : > { %v690_v3 = vadd.f32 %v4523_v1, %v5286_v38  ;;  %v681_v4 = vpop.f32.mrb[21].mxu0  ;;  %v4707_v61 = vld [vmem:[%s6581_s5 + $0x20] ss:$16 sps:$4 sm:$0xff]   ;;  %v4718_v1 = vld [vmem:[%s6581_s5 + $0x84] ss:$16 sps:$4 sm:$0xff]  }
 0x159   : > { %957 = vmatmul.mubr.bf16.gmra.mrb[16].mxu1 %v764_v26  ;;  %v682_v5 = vadd.f32 %v5286_v38, %v681_v4  ;;  %v4524_v6 = vpop.f32.mrb[22].mxu0  ;;  %v4719_v4 = vld [vmem:[%s6581_s5 + $0xa0] ss:$16 sps:$4 sm:$0xff]  }
 0x15a   : > { %966 = vmatprep.mubr.bf16.mxu1 %v5015_v37  ;;  %v750_v7 = vmax.f32 %v690_v3, 0.0  ;;  %v693_v8 = vadd.f32 %v4524_v6, %v5286_v38  ;;  %v684_v9 = vpop.f32.mrb[23].mxu0  ;;  %2193 = vmatpush1.bf16.msra.mxu1 %v4680_v63  ;;  %v4715_v63 = vld [vmem:[%s6581_s5 + $0x64] ss:$16 sps:$4 sm:$0xff]   ;;  %v4722_v6 = vld [vmem:[%s6581_s5 + $0xc0] ss:$16 sps:$4 sm:$0xff]  }
 0x15b   : > { %v748_v11 = vmax.f32 %v682_v5, 0.0  ;;  %v685_v12 = vadd.f32 %v5286_v38, %v684_v9  ;;  %2194 = vmatprep.subr.bf16.mxu1 %v4685_v2  ;;  %v4716_v2 = vld [vmem:[%s6581_s5 + $0x80] ss:$16 sps:$4 sm:$0xff]   ;;  %v4721_v3 = vld [vmem:[%s6581_s5 + $0xa4] ss:$16 sps:$4 sm:$0xff]  }
 0x15c   : > { %v751_v14 = vmax.f32 %v693_v8, 0.0  ;;  %v4724_v5 = vld [vmem:[%s6581_s5 + $0xc4] ss:$16 sps:$4 sm:$0xff]   ;;  %v4725_v8 = vld [vmem:[%s6581_s5 + $0xe0] ss:$16 sps:$4 sm:$0xff]  }
 0x15d   : > { %v749_v15 = vmax.f32 %v685_v12, 0.0  ;;  %v4730_v9 = vld [vmem:[%s6581_s5 + $0x104] ss:$16 sps:$4 sm:$0xff]  }
 0x15e   : > { %v5327_v16 = vpack.c.bf16 %v751_v14, %v750_v7  ;;  %2195 = vmatpush1.bf16.msra.mxu1 %v4683_v10  ;;  %v4727_v7 = vld [vmem:[%s6581_s5 + $0xe4] ss:$16 sps:$4 sm:$0xff]   ;;  %v4728_v10 = vld [vmem:[%s6581_s5 + $0x100] ss:$16 sps:$4 sm:$0xff]  }
 0x15f   : > { %v770_v18 = vpack.c.bf16 %v749_v15, %v748_v11  ;;  %v4527_v19 = vpop.f32.mrb[24].mxu0  ;;  %2196 = vmatprep.subr.bf16.mxu1 %v4688_v13  ;;  %v794_v11 = vlaneseq  ;;  %v4733_v12 = vld [vmem:[%s6581_s5 + $0x124] ss:$16 sps:$4 sm:$0xff]   ;;  %v4731_v13 = vld [vmem:[%s6581_s5 + $0x120] ss:$16 sps:$4 sm:$0xff]  }
 0x160   : > { %v706_v21 = vadd.f32 %v4527_v19, %v5286_v38  ;;  %v697_v22 = vpop.f32.mrb[25].mxu0  ;;  %v4736_v15 = vld [vmem:[%s6581_s5 + $0x144] ss:$16 sps:$4 sm:$0xff]  }
 0x161   : > { %967 = vmatmul.mubr.bf16.gmra.mrb[20].mxu1 %v5302_v24  ;;  %v698_v23 = vadd.f32 %v5286_v38, %v697_v22  ;;  %v4528_v25 = vpop.f32.mrb[26].mxu0  ;;  %v4692_v24 = vld [vmem:[#allocation2 + $0x180] ss:$16 sps:$4 sm:$0xff]   ;;  %v5413_v14 = vshrl.u32 %v794_v11, 7 }
 0x162   : > { %976 = vmatprep.mubr.bf16.mxu1 %v5015_v37  ;;  %v754_v26 = vmax.f32 %v706_v21, 0.0  ;;  %v709_v27 = vadd.f32 %v4528_v25, %v5286_v38  ;;  %v700_v28 = vpop.f32.mrb[27].mxu0  ;;  %2197 = vmatpush1.bf16.msra.mxu1 %v4686_v17  ;;  %v4737_v21 = vld [vmem:[%s6581_s5 + $0x160] ss:$16 sps:$4 sm:$0xff]  }
 0x163   : > { %v752_v30 = vmax.f32 %v698_v23, 0.0  ;;  %v701_v31 = vadd.f32 %v5286_v38, %v700_v28  ;;  %2198 = vmatprep.subr.bf16.mxu1 %v4691_v20  ;;  %v5422_v17 = vsub.s32 0, %v5413_v14  ;;  %v5428_v19 = vsub.s32 1, %v5413_v14  ;;  %v4739_v20 = vld [vmem:[%s6581_s5 + $0x164] ss:$16 sps:$4 sm:$0xff]  }
 0x164   : > { %v755_v33 = vmax.f32 %v709_v27, 0.0  ;;  %v4742_v27 = vld [vmem:[%s6581_s5 + $0x184] ss:$16 sps:$4 sm:$0xff]  }
 0x165   : > { %v753_v34 = vmax.f32 %v701_v31, 0.0 }
 0x166   : > { %v773_v35 = vpack.c.bf16 %v755_v33, %v754_v26  ;;  %2199 = vmatpush1.bf16.msra.mxu1 %v4689_v29  ;;  %v4740_v29 = vld [vmem:[%s6581_s5 + $0x180] ss:$16 sps:$4 sm:$0xff]  }
 0x167   : > { %v772_v36 = vpack.c.bf16 %v753_v34, %v752_v30  ;;  %v4531_v39 = vpop.f32.mrb[28].mxu0  ;;  %2200 = vmatprep.subr.bf16.mxu1 %v4694_v32 }
 0x168   : > { %v722_v41 = vadd.f32 %v4531_v39, %v5286_v38  ;;  %v713_v42 = vpop.f32.mrb[29].mxu0 }
 0x169   : > { %977 = vmatmul.mubr.bf16.gmra.mrb[24].mxu1 %v5311_v46  ;;  %v714_v43 = vadd.f32 %v5286_v38, %v713_v42  ;;  %v4532_v45 = vpop.f32.mrb[30].mxu0 }
 0x16a   : > { %986 = vmatprep.mubr.bf16.mxu1 %v5015_v37  ;;  %v758_v47 = vmax.f32 %v722_v41, 0.0  ;;  %v725_v48 = vadd.f32 %v4532_v45, %v5286_v38  ;;  %v716_v49 = vpop.f32.mrb[31].mxu0  ;;  %2201 = vmatpush1.bf16.msra.mxu1 %v4692_v24  ;;  %v4743_v41 = vld [vmem:[%s6581_s5 + $0x1a0] ss:$16 sps:$4 sm:$0xff]  }
 0x16b   : > { %v756_v51 = vmax.f32 %v714_v43, 0.0  ;;  %v717_v52 = vadd.f32 %v5286_v38, %v716_v49  ;;  %2202 = vmatprep.subr.bf16.mxu1 %v4697_v40  ;;  %v4700_v38 = vld [vmem:[#allocation2 + $0x1c4] ss:$16 sps:$4 sm:$0xff]  }
 0x16c   : > { %v759_v53 = vmax.f32 %v725_v48, 0.0 }
 0x16d   : > { %v757_v54 = vmax.f32 %v717_v52, 0.0 }
 0x16e   : > { %v775_v55 = vpack.c.bf16 %v759_v53, %v758_v47  ;;  %2203 = vmatpush1.bf16.msra.mxu1 %v4695_v50  ;;  %v4748_v47 = vld [vmem:[%s6581_s5 + $0x1c4] ss:$16 sps:$4 sm:$0xff]   ;;  %v4746_v50 = vld [vmem:[%s6581_s5 + $0x1c0] ss:$16 sps:$4 sm:$0xff]  }
 0x16f   : > { %v774_v46 = vpack.c.bf16 %v757_v54, %v756_v51  ;;  %2204 = vmatprep.subr.bf16.mxu1 %v4700_v38 }
 0x171   : > { %987 = vmatmul.mubr.bf16.gmra.mrb[28].mxu1 %v5309_v44  ;;  %v4706_v44 = vld [vmem:[%s6581_s5 + $0x4] ss:$16 sps:$4 sm:$0xff]  }
 0x172   : > { %996 = vmatprep.mubr.bf16.mxu1 %v5015_v37  ;;  %2205 = vmatpush1.bf16.msra.mxu1 %v4698_v56  ;;  %v4749_v56 = vld [vmem:[%s6581_s5 + $0x1e0] ss:$16 sps:$4 sm:$0xff]  }
 0x173   : > { %2206 = vmatprep.subr.bf16.mxu1 %v4703_v57  ;;  %1678 = vmatprep.subr.bf16.mxu0 %v4706_v44  ;;  %v4751_v57 = vld [vmem:[%s6581_s5 + $0x1e4] ss:$16 sps:$4 sm:$0xff]  }
 0x174   : > { %1679 = vmatpush1.bf16.msra.mxu0 %v4704_v59 }
 0x175   : > { %1680 = vmatprep.subr.bf16.mxu0 %v4709_v60 }
 0x176   : > { %2207 = vmatpush1.bf16.msra.mxu1 %v4701_v58 }
 0x178   : > { %1681 = vmatpush1.bf16.msra.mxu0 %v4707_v61 }
 0x179   : > { %997 = vmatmul.mubr.bf16.gmra.mrb[32].mxu1 %v5320_v0  ;;  %v4713_v0 = vld [vmem:[%s6581_s5 + $0x60] ss:$16 sps:$4 sm:$0xff]  }
 0x17a   : > { %1006 = vmatprep.mubr.bf16.mxu1 %v5015_v37 }
 0x181   : > { %1007 = vmatmul.mubr.bf16.gmra.mrb[36].mxu1 %v5318_v62  ;;  %v4710_v62 = vld [vmem:[%s6581_s5 + $0x40] ss:$16 sps:$4 sm:$0xff]  }
 0x182   : > { %1016 = vmatprep.mubr.bf16.mxu1 %v5015_v37 }
 0x189   : > { %1017 = vmatmul.mubr.bf16.gmra.mrb[40].mxu1 %v770_v18  ;;  %v792_v18 = vld [vmem:[%s6580_s4] sm:$0x3] }
 0x18a   : > { %1026 = vmatprep.mubr.bf16.mxu1 %v5015_v37  ;;  %v5437_v22 = vrot.slane %v792_v18, %v5422_v17  ;;  %v5440_v25 = vrot.slane %v792_v18, %v5428_v19 }
 0x191   : > { %1027 = vmatmul.mubr.bf16.gmra.mrb[44].mxu1 %v5327_v16  ;;  %v4734_v16 = vld [vmem:[%s6581_s5 + $0x140] ss:$16 sps:$4 sm:$0xff]  }
 0x192   : > { %1036 = vmatprep.mubr.bf16.mxu1 %v5015_v37 }
 0x199   : > { %1037 = vmatmul.mubr.bf16.gmra.mrb[48].mxu1 %v772_v36  ;;  %v4745_v36 = vld [vmem:[%s6581_s5 + $0x1a4] ss:$16 sps:$4 sm:$0xff]  }
 0x19a   : > { %1046 = vmatprep.mubr.bf16.mxu1 %v5015_v37 }
 0x1a1   : > { %1047 = vmatmul.mubr.bf16.gmra.mrb[52].mxu1 %v773_v35 }
 0x1a2   : > { %1056 = vmatprep.mubr.bf16.mxu1 %v5015_v37 }
 0x1a9   : > { %1057 = vmatmul.mubr.bf16.gmra.mrb[56].mxu1 %v774_v46 }
 0x1aa   : > { %1066 = vmatprep.mubr.bf16.mxu1 %v5015_v37  ;;  %v4712_v37 = vld [vmem:[%s6581_s5 + $0x44] ss:$16 sps:$4 sm:$0xff]  }
 0x1ab   : > { %1682 = vmatprep.subr.bf16.mxu0 %v4712_v37  ;;  %v4754_v37 = vld [vmem:[%s6581_s5 + $0xc] ss:$16 sps:$4 sm:$0xff]  }
 0x1ac   : > { %1683 = vmatpush1.bf16.msra.mxu0 %v4710_v62 }
 0x1ad   : > { %1684 = vmatprep.subr.bf16.mxu0 %v4715_v63 }
 0x1b0   : > { %1685 = vmatpush1.bf16.msra.mxu0 %v4713_v0 }
 0x1b1   : > { %1067 = vmatmul.mubr.bf16.gmra.mrb[60].mxu1 %v775_v55  ;;  %1686 = vmatprep.subr.bf16.mxu0 %v4718_v1 }
 0x1b4   : > { %1687 = vmatpush1.bf16.msra.mxu0 %v4716_v2 }
 0x1b5   : > { %1688 = vmatprep.subr.bf16.mxu0 %v4721_v3 }
 0x1b8   : > { %1689 = vmatpush1.bf16.msra.mxu0 %v4719_v4 }
 0x1b9   : > { %1690 = vmatprep.subr.bf16.mxu0 %v4724_v5 }
 0x1bc   : > { %1691 = vmatpush1.bf16.msra.mxu0 %v4722_v6 }
 0x1bd   : > { %1692 = vmatprep.subr.bf16.mxu0 %v4727_v7 }
 0x1c0   : > { %1693 = vmatpush1.bf16.msra.mxu0 %v4725_v8 }
 0x1c1   : > { %1694 = vmatprep.subr.bf16.mxu0 %v4730_v9 }
 0x1c4   : > { %1695 = vmatpush1.bf16.msra.mxu0 %v4728_v10 }
 0x1c5   : > { %1696 = vmatprep.subr.bf16.mxu0 %v4733_v12 }
 0x1c8   : > { %1697 = vmatpush1.bf16.msra.mxu0 %v4731_v13 }
 0x1c9   : > { %1698 = vmatprep.subr.bf16.mxu0 %v4736_v15 }
 0x1cc   : > { %1699 = vmatpush1.bf16.msra.mxu0 %v4734_v16 }
 0x1cd   : > { %1700 = vmatprep.subr.bf16.mxu0 %v4739_v20 }
 0x1d0   : > { %1701 = vmatpush1.bf16.msra.mxu0 %v4737_v21 }
 0x1d1   : > { %1702 = vmatprep.subr.bf16.mxu0 %v4742_v27 }
 0x1d4   : > { %1703 = vmatpush1.bf16.msra.mxu0 %v4740_v29 }
 0x1d5   : > { %1704 = vmatprep.subr.bf16.mxu0 %v4745_v36 }
 0x1d8   : > { %1705 = vmatpush1.bf16.msra.mxu0 %v4743_v41 }
 0x1d9   : > { %1706 = vmatprep.subr.bf16.mxu0 %v4748_v47 }
 0x1dc   : > { %1707 = vmatpush1.bf16.msra.mxu0 %v4746_v50 }
 0x1dd   : > { %1708 = vmatprep.subr.bf16.mxu0 %v4751_v57 }
 0x1e0   : > { %1709 = vmatpush1.bf16.msra.mxu0 %v4749_v56 }
 0x1e1   : > { %1719 = vmatprep.subr.bf16.mxu0 %v4754_v37 }
 0x20c   : > { %v918_v23 = vpop.f32.mrb[0].mxu1 }
 0x20d   : > { %v920_v26 = vpop.f32.mrb[1].mxu1  ;;  %v919_v30 = vadd.f32 %v918_v23, %v5437_v22 }
 0x20e   : > { %v922_v28 = vpop.f32.mrb[2].mxu1  ;;  %v921_v33 = vadd.f32 %v920_v26, %v5440_v25 }
 0x20f   : > { %v923_v31 = vadd.f32 %v922_v28, %v5437_v22  ;;  %v924_v32 = vpop.f32.mrb[3].mxu1 }
 0x210   : > { %v925_v34 = vadd.f32 %v924_v32, %v5440_v25 }
 0x211   : > { %v1077_v35 = vmax.f32 %v919_v30, %v923_v31  ;;  %v5452_v24 = vpack.c.bf16 %v923_v31, %v919_v30 }
 0x212   : > { %v1086_v39 = vmax.f32 %v921_v33, %v925_v34  ;;  %v5457_v40 = vpack.c.bf16 %v925_v34, %v921_v33 }
 0x214   : > { %v928_v42 = vpop.f32.mrb[4].mxu1  ;;  %2208 = vmatprep.mubr.bf16.mxu1 %v5457_v40 }
 0x215   : > { %v929_v43 = vadd.f32 %v928_v42, %v5437_v22  ;;  %v930_v45 = vpop.f32.mrb[5].mxu1  ;;  %2209 = vmatmul.mubr.bf16.vlgmr.msra.gmra.mrb[64].mxu1 %v5452_v24 }
 0x216   : > { %v931_v48 = vadd.f32 %v930_v45, %v5440_v25  ;;  %v932_v49 = vpop.f32.mrb[6].mxu1 }
 0x217   : > { %v1078_v51 = vmax.f32 %v1077_v35, %v929_v43  ;;  %v933_v52 = vadd.f32 %v932_v49, %v5437_v22  ;;  %v934_v53 = vpop.f32.mrb[7].mxu1 }
 0x218   : > { %v1087_v54 = vmax.f32 %v1086_v39, %v931_v48  ;;  %v935_v55 = vadd.f32 %v934_v53, %v5440_v25 }
 0x219   : > { %v1079_v46 = vmax.f32 %v1078_v51, %v933_v52  ;;  %v5474_v38 = vpack.c.bf16 %v933_v52, %v929_v43 }
 0x21a   : > { %v1088_v58 = vmax.f32 %v1087_v54, %v935_v55  ;;  %v5482_v44 = vpack.c.bf16 %v935_v55, %v931_v48 }
 0x21b   : > { %v1080_v60 = vrot.slane %v1079_v46, 4 }
 0x21c   : > { %v938_v59 = vpop.f32.mrb[8].mxu1  ;;  %2218 = vmatprep.mubr.bf16.mxu1 %v5482_v44  ;;  %v1089_v62 = vrot.slane %v1088_v58, 4 }
 0x21d   : > { %v940_v61 = vpop.f32.mrb[9].mxu1  ;;  %2219 = vmatmul.mubr.bf16.gmra.mrb[68].mxu1 %v5474_v38  ;;  %v939_v0 = vadd.f32 %v938_v59, %v5437_v22  ;;  %v1081_v5 = vmax.f32 %v1079_v46, %v1080_v60 }
 0x21e   : > { %v942_v63 = vpop.f32.mrb[10].mxu1  ;;  %v941_v3 = vadd.f32 %v940_v61, %v5440_v25  ;;  %v1090_v8 = vmax.f32 %v1088_v58, %v1089_v62 }
 0x21f   : > { %v943_v1 = vadd.f32 %v942_v63, %v5437_v22  ;;  %v944_v2 = vpop.f32.mrb[11].mxu1  ;;  %v1082_v12 = vrot.slane %v1081_v5, 2 }
 0x220   : > { %v945_v4 = vadd.f32 %v944_v2, %v5440_v25  ;;  %v1091_v16 = vrot.slane %v1090_v8, 2 }
 0x221   : > { %v1095_v6 = vmax.f32 %v939_v0, %v943_v1  ;;  %v5493_v7 = vpack.c.bf16 %v943_v1, %v939_v0  ;;  %v1083_v29 = vmax.f32 %v1081_v5, %v1082_v12 }
 0x222   : > { %v1104_v9 = vmax.f32 %v941_v3, %v945_v4  ;;  %v5495_v10 = vpack.c.bf16 %v945_v4, %v941_v3  ;;  %v1092_v32 = vmax.f32 %v1090_v8, %v1091_v16 }
 0x223   : > { %v1084_v41 = vrot.slane %v1083_v29, 1 }
 0x224   : > { %v948_v11 = vpop.f32.mrb[12].mxu1  ;;  %2228 = vmatprep.mubr.bf16.mxu1 %v5495_v10  ;;  %v1093_v45 = vrot.slane %v1092_v32, 1 }
 0x225   : > { %v949_v13 = vadd.f32 %v948_v11, %v5437_v22  ;;  %v950_v15 = vpop.f32.mrb[13].mxu1  ;;  %2229 = vmatmul.mubr.bf16.gmra.mrb[72].mxu1 %v5493_v7  ;;  %v1085_v46 = vmax.f32 %v1083_v29, %v1084_v41 }
 0x226   : > { %v951_v18 = vadd.f32 %v950_v15, %v5440_v25  ;;  %v952_v20 = vpop.f32.mrb[14].mxu1  ;;  %v1094_v59 = vmax.f32 %v1092_v32, %v1093_v45 }
 0x227   : > { %v1096_v21 = vmax.f32 %v1095_v6, %v949_v13  ;;  %v953_v23 = vadd.f32 %v952_v20, %v5437_v22  ;;  %v954_v26 = vpop.f32.mrb[15].mxu1  ;;  %v1221_v1 = vpack.c.bf16 %v1085_v46, %v1085_v46 }
 0x228   : > { %v1105_v27 = vmax.f32 %v1104_v9, %v951_v18  ;;  %v955_v28 = vadd.f32 %v954_v26, %v5440_v25  ;;  %v1222_v5 = vpack.c.bf16 %v1094_v59, %v1094_v59 }
 0x229   : > { %v1097_v30 = vmax.f32 %v1096_v21, %v953_v23  ;;  %v5503_v31 = vpack.c.bf16 %v953_v23, %v949_v13  ;;  %v1317_v21 = vunpack.c.l.b16 %v1221_v1 }
 0x22a   : > { %v1106_v33 = vmax.f32 %v1105_v27, %v955_v28  ;;  %v5505_v34 = vpack.c.bf16 %v955_v28, %v951_v18  ;;  %v1318_v28 = vunpack.c.l.b16 %v1222_v5 }
 0x22b   : > { %v1098_v35 = vrot.slane %v1097_v30, 4 }
 0x22c   : > { %v1107_v36 = vrot.slane %v1106_v33, 4  ;;  %v958_v39 = vpop.f32.mrb[16].mxu1  ;;  %2238 = vmatprep.mubr.bf16.mxu1 %v5505_v34 }
 0x22d   : > { %v1099_v42 = vmax.f32 %v1097_v30, %v1098_v35  ;;  %v960_v43 = vpop.f32.mrb[17].mxu1  ;;  %2239 = vmatmul.mubr.bf16.gmra.mrb[76].mxu1 %v5503_v31  ;;  %v959_v50 = vadd.f32 %v958_v39, %v5437_v22 }
 0x22e   : > { %v1108_v47 = vmax.f32 %v1106_v33, %v1107_v36  ;;  %v962_v48 = vpop.f32.mrb[18].mxu1  ;;  %v961_v54 = vadd.f32 %v960_v43, %v5440_v25 }
 0x22f   : > { %v1100_v49 = vrot.slane %v1099_v42, 2  ;;  %v963_v51 = vadd.f32 %v962_v48, %v5437_v22  ;;  %v964_v52 = vpop.f32.mrb[19].mxu1 }
 0x230   : > { %v1109_v53 = vrot.slane %v1108_v47, 2  ;;  %v965_v55 = vadd.f32 %v964_v52, %v5440_v25 }
 0x231   : > { %v1101_v56 = vmax.f32 %v1099_v42, %v1100_v49  ;;  %v1113_v57 = vmax.f32 %v959_v50, %v963_v51  ;;  %v5513_v58 = vpack.c.bf16 %v963_v51, %v959_v50 }
 0x232   : > { %v1110_v60 = vmax.f32 %v1108_v47, %v1109_v53  ;;  %v1122_v61 = vmax.f32 %v961_v54, %v965_v55  ;;  %v5515_v37 = vpack.c.bf16 %v965_v55, %v961_v54 }
 0x233   : > { %v1102_v62 = vrot.slane %v1101_v56, 1 }
 0x234   : > { %v1111_v63 = vrot.slane %v1110_v60, 1  ;;  %v968_v0 = vpop.f32.mrb[20].mxu1  ;;  %2248 = vmatprep.mubr.bf16.mxu1 %v5515_v37 }
 0x235   : > { %v1103_v2 = vmax.f32 %v1101_v56, %v1102_v62  ;;  %v969_v3 = vadd.f32 %v968_v0, %v5437_v22  ;;  %v970_v4 = vpop.f32.mrb[21].mxu1  ;;  %2249 = vmatmul.mubr.bf16.gmra.mrb[80].mxu1 %v5513_v58 }
 0x236   : > { %v1112_v6 = vmax.f32 %v1110_v60, %v1111_v63  ;;  %v971_v8 = vadd.f32 %v970_v4, %v5440_v25  ;;  %v972_v9 = vpop.f32.mrb[22].mxu1 }
 0x237   : > { %v1223_v11 = vpack.c.bf16 %v1103_v2, %v1103_v2  ;;  %v1114_v12 = vmax.f32 %v1113_v57, %v969_v3  ;;  %v973_v13 = vadd.f32 %v972_v9, %v5437_v22  ;;  %v974_v15 = vpop.f32.mrb[23].mxu1 }
 0x238   : > { %v1224_v16 = vpack.c.bf16 %v1112_v6, %v1112_v6  ;;  %v1123_v18 = vmax.f32 %v1122_v61, %v971_v8  ;;  %v975_v20 = vadd.f32 %v974_v15, %v5440_v25 }
 0x239   : > { %v1319_v23 = vunpack.c.l.b16 %v1223_v11  ;;  %v1115_v26 = vmax.f32 %v1114_v12, %v973_v13  ;;  %v5523_v27 = vpack.c.bf16 %v973_v13, %v969_v3 }
 0x23a   : > { %v1320_v29 = vunpack.c.l.b16 %v1224_v16  ;;  %v1124_v30 = vmax.f32 %v1123_v18, %v975_v20  ;;  %v5525_v32 = vpack.c.bf16 %v975_v20, %v971_v8 }
 0x23b   : > { %v1334_v33 = vsel %vm1333_vm3, %v1319_v23, %v1317_v21  ;;  %v1116_v35 = vrot.slane %v1115_v26, 4 }
 0x23c   : > { %v1347_v36 = vsel %vm1333_vm3, %v1320_v29, %v1318_v28  ;;  %v1125_v39 = vrot.slane %v1124_v30, 4  ;;  %v978_v41 = vpop.f32.mrb[24].mxu1  ;;  %2258 = vmatprep.mubr.bf16.mxu1 %v5525_v32 }
 0x23d   : > { %v1117_v42 = vmax.f32 %v1115_v26, %v1116_v35  ;;  %v980_v43 = vpop.f32.mrb[25].mxu1  ;;  %2259 = vmatmul.mubr.bf16.gmra.mrb[84].mxu1 %v5523_v27  ;;  %v979_v49 = vadd.f32 %v978_v41, %v5437_v22 }
 0x23e   : > { %v1126_v45 = vmax.f32 %v1124_v30, %v1125_v39  ;;  %v982_v47 = vpop.f32.mrb[26].mxu1  ;;  %v981_v53 = vadd.f32 %v980_v43, %v5440_v25 }
 0x23f   : > { %v1118_v48 = vrot.slane %v1117_v42, 2  ;;  %v983_v50 = vadd.f32 %v982_v47, %v5437_v22  ;;  %v984_v51 = vpop.f32.mrb[27].mxu1 }
 0x240   : > { %v1127_v52 = vrot.slane %v1126_v45, 2  ;;  %v985_v54 = vadd.f32 %v984_v51, %v5440_v25 }
 0x241   : > { %v1119_v55 = vmax.f32 %v1117_v42, %v1118_v48  ;;  %v1131_v46 = vmax.f32 %v979_v49, %v983_v50  ;;  %v5535_v56 = vpack.c.bf16 %v983_v50, %v979_v49 }
 0x242   : > { %v1128_v57 = vmax.f32 %v1126_v45, %v1127_v52  ;;  %v1140_v59 = vmax.f32 %v981_v53, %v985_v54  ;;  %v5537_v60 = vpack.c.bf16 %v985_v54, %v981_v53 }
 0x243   : > { %v1120_v61 = vrot.slane %v1119_v55, 1 }
 0x244   : > { %v1129_v62 = vrot.slane %v1128_v57, 1  ;;  %v988_v63 = vpop.f32.mrb[28].mxu1  ;;  %2268 = vmatprep.mubr.bf16.mxu1 %v5537_v60 }
 0x245   : > { %v1121_v0 = vmax.f32 %v1119_v55, %v1120_v61  ;;  %v989_v1 = vadd.f32 %v988_v63, %v5437_v22  ;;  %v990_v2 = vpop.f32.mrb[29].mxu1  ;;  %2269 = vmatmul.mubr.bf16.gmra.mrb[88].mxu1 %v5535_v56 }
 0x246   : > { %v1130_v3 = vmax.f32 %v1128_v57, %v1129_v62  ;;  %v991_v4 = vadd.f32 %v990_v2, %v5440_v25  ;;  %v992_v5 = vpop.f32.mrb[30].mxu1 }
 0x247   : > { %v1225_v6 = vpack.c.bf16 %v1121_v0, %v1121_v0  ;;  %v1132_v8 = vmax.f32 %v1131_v46, %v989_v1  ;;  %v993_v9 = vadd.f32 %v992_v5, %v5437_v22  ;;  %v994_v11 = vpop.f32.mrb[31].mxu1 }
 0x248   : > { %v1226_v12 = vpack.c.bf16 %v1130_v3, %v1130_v3  ;;  %v1141_v13 = vmax.f32 %v1140_v59, %v991_v4  ;;  %v995_v15 = vadd.f32 %v994_v11, %v5440_v25 }
 0x249   : > { %v1321_v16 = vunpack.c.l.b16 %v1225_v6  ;;  %v1133_v18 = vmax.f32 %v1132_v8, %v993_v9  ;;  %v5545_v20 = vpack.c.bf16 %v993_v9, %v989_v1 }
 0x24a   : > { %v1322_v21 = vunpack.c.l.b16 %v1226_v12  ;;  %v1142_v23 = vmax.f32 %v1141_v13, %v995_v15  ;;  %v5547_v26 = vpack.c.bf16 %v995_v15, %v991_v4 }
 0x24b   : > { %v1336_v28 = vsel %vm1335_vm4, %v1321_v16, %v1334_v33  ;;  %v1134_v29 = vrot.slane %v1133_v18, 4 }
 0x24c   : > { %v1348_v30 = vsel %vm1335_vm4, %v1322_v21, %v1347_v36  ;;  %v1143_v35 = vrot.slane %v1142_v23, 4  ;;  %v998_v39 = vpop.f32.mrb[32].mxu1  ;;  %2278 = vmatprep.mubr.bf16.mxu1 %v5547_v26 }
 0x24d   : > { %v1135_v41 = vmax.f32 %v1133_v18, %v1134_v29  ;;  %v1000_v42 = vpop.f32.mrb[33].mxu1  ;;  %2279 = vmatmul.mubr.bf16.gmra.mrb[92].mxu1 %v5545_v20  ;;  %v999_v48 = vadd.f32 %v998_v39, %v5437_v22 }
 0x24e   : > { %v1144_v43 = vmax.f32 %v1142_v23, %v1143_v35  ;;  %v1002_v45 = vpop.f32.mrb[34].mxu1  ;;  %v1001_v51 = vadd.f32 %v1000_v42, %v5440_v25 }
 0x24f   : > { %v1136_v47 = vrot.slane %v1135_v41, 2  ;;  %v1003_v49 = vadd.f32 %v1002_v45, %v5437_v22  ;;  %v1004_v50 = vpop.f32.mrb[35].mxu1 }
 0x250   : > { %v1145_v33 = vrot.slane %v1144_v43, 2  ;;  %v1005_v36 = vadd.f32 %v1004_v50, %v5440_v25 }
 0x251   : > { %v1137_v52 = vmax.f32 %v1135_v41, %v1136_v47  ;;  %v1149_v53 = vmax.f32 %v999_v48, %v1003_v49  ;;  %v5557_v54 = vpack.c.bf16 %v1003_v49, %v999_v48 }
 0x252   : > { %v1146_v55 = vmax.f32 %v1144_v43, %v1145_v33  ;;  %v1158_v46 = vmax.f32 %v1001_v51, %v1005_v36  ;;  %v5559_v57 = vpack.c.bf16 %v1005_v36, %v1001_v51 }
 0x253   : > { %v1138_v59 = vrot.slane %v1137_v52, 1 }
 0x254   : > { %v1147_v61 = vrot.slane %v1146_v55, 1  ;;  %v1008_v62 = vpop.f32.mrb[36].mxu1  ;;  %2288 = vmatprep.mubr.bf16.mxu1 %v5559_v57 }
 0x255   : > { %v1139_v63 = vmax.f32 %v1137_v52, %v1138_v59  ;;  %v1009_v0 = vadd.f32 %v1008_v62, %v5437_v22  ;;  %v1010_v1 = vpop.f32.mrb[37].mxu1  ;;  %2289 = vmatmul.mubr.bf16.gmra.mrb[96].mxu1 %v5557_v54 }
 0x256   : > { %v1148_v2 = vmax.f32 %v1146_v55, %v1147_v61  ;;  %v1011_v3 = vadd.f32 %v1010_v1, %v5440_v25  ;;  %v1012_v4 = vpop.f32.mrb[38].mxu1 }
 0x257   : > { %v1227_v5 = vpack.c.bf16 %v1139_v63, %v1139_v63  ;;  %v1150_v6 = vmax.f32 %v1149_v53, %v1009_v0  ;;  %v1013_v8 = vadd.f32 %v1012_v4, %v5437_v22  ;;  %v1014_v9 = vpop.f32.mrb[39].mxu1 }
 0x258   : > { %v1228_v11 = vpack.c.bf16 %v1148_v2, %v1148_v2  ;;  %v1159_v12 = vmax.f32 %v1158_v46, %v1011_v3  ;;  %v1015_v13 = vadd.f32 %v1014_v9, %v5440_v25 }
 0x259   : > { %v1323_v15 = vunpack.c.l.b16 %v1227_v5  ;;  %v1151_v16 = vmax.f32 %v1150_v6, %v1013_v8  ;;  %v5567_v18 = vpack.c.bf16 %v1013_v8, %v1009_v0 }
 0x25a   : > { %v1324_v21 = vunpack.c.l.b16 %v1228_v11  ;;  %v1160_v23 = vmax.f32 %v1159_v12, %v1015_v13  ;;  %v5569_v29 = vpack.c.bf16 %v1015_v13, %v1011_v3 }
 0x25b   : > { %v1338_v35 = vsel %vm1337_vm5, %v1323_v15, %v1336_v28  ;;  %v1152_v39 = vrot.slane %v1151_v16, 4 }
 0x25c   : > { %v1161_v41 = vrot.slane %v1160_v23, 4  ;;  %v1018_v42 = vpop.f32.mrb[40].mxu1  ;;  %2298 = vmatprep.mubr.bf16.mxu1 %v5569_v29  ;;  %v1349_v43 = vsel %vm1337_vm5, %v1324_v21, %v1348_v30 }
 0x25d   : > { %v1153_v45 = vmax.f32 %v1151_v16, %v1152_v39  ;;  %v1020_v47 = vpop.f32.mrb[41].mxu1  ;;  %2299 = vmatmul.mubr.bf16.gmra.mrb[100].mxu1 %v5567_v18  ;;  %v1019_v33 = vadd.f32 %v1018_v42, %v5437_v22 }
 0x25e   : > { %v1162_v48 = vmax.f32 %v1160_v23, %v1161_v41  ;;  %v1022_v49 = vpop.f32.mrb[42].mxu1  ;;  %v1021_v52 = vadd.f32 %v1020_v47, %v5440_v25 }
 0x25f   : > { %v1154_v50 = vrot.slane %v1153_v45, 2  ;;  %v1023_v51 = vadd.f32 %v1022_v49, %v5437_v22  ;;  %v1024_v36 = vpop.f32.mrb[43].mxu1 }
 0x260   : > { %v1163_v28 = vrot.slane %v1162_v48, 2  ;;  %v1025_v53 = vadd.f32 %v1024_v36, %v5440_v25 }
 0x261   : > { %v1155_v55 = vmax.f32 %v1153_v45, %v1154_v50  ;;  %v1167_v46 = vmax.f32 %v1019_v33, %v1023_v51  ;;  %v5579_v30 = vpack.c.bf16 %v1023_v51, %v1019_v33 }
 0x262   : > { %v1164_v59 = vmax.f32 %v1162_v48, %v1163_v28  ;;  %v1176_v61 = vmax.f32 %v1021_v52, %v1025_v53  ;;  %v5581_v62 = vpack.c.bf16 %v1025_v53, %v1021_v52 }
 0x263   : > { %v1156_v63 = vrot.slane %v1155_v55, 1 }
 0x264   : > { %v1165_v0 = vrot.slane %v1164_v59, 1  ;;  %v1028_v1 = vpop.f32.mrb[44].mxu1  ;;  %2308 = vmatprep.mubr.bf16.mxu1 %v5581_v62 }
 0x265   : > { %v1157_v2 = vmax.f32 %v1155_v55, %v1156_v63  ;;  %v1029_v3 = vadd.f32 %v1028_v1, %v5437_v22  ;;  %v1030_v4 = vpop.f32.mrb[45].mxu1  ;;  %2309 = vmatmul.mubr.bf16.gmra.mrb[104].mxu1 %v5579_v30 }
 0x266   : > { %v1166_v5 = vmax.f32 %v1164_v59, %v1165_v0  ;;  %v1031_v6 = vadd.f32 %v1030_v4, %v5440_v25  ;;  %v1032_v8 = vpop.f32.mrb[46].mxu1 }
 0x267   : > { %v1229_v9 = vpack.c.bf16 %v1157_v2, %v1157_v2  ;;  %v1168_v11 = vmax.f32 %v1167_v46, %v1029_v3  ;;  %v1033_v12 = vadd.f32 %v1032_v8, %v5437_v22  ;;  %v1034_v13 = vpop.f32.mrb[47].mxu1 }
 0x268   : > { %v1230_v15 = vpack.c.bf16 %v1166_v5, %v1166_v5  ;;  %v1177_v16 = vmax.f32 %v1176_v61, %v1031_v6  ;;  %v1035_v21 = vadd.f32 %v1034_v13, %v5440_v25 }
 0x269   : > { %v1325_v23 = vunpack.c.l.b16 %v1229_v9  ;;  %v1169_v39 = vmax.f32 %v1168_v11, %v1033_v12  ;;  %v5589_v41 = vpack.c.bf16 %v1033_v12, %v1029_v3 }
 0x26a   : > { %v1326_v42 = vunpack.c.l.b16 %v1230_v15  ;;  %v1178_v45 = vmax.f32 %v1177_v16, %v1035_v21  ;;  %v5591_v47 = vpack.c.bf16 %v1035_v21, %v1031_v6 }
 0x26b   : > { %v1170_v48 = vrot.slane %v1169_v39, 4  ;;  %v1340_v49 = vsel %vm1339_vm6, %v1325_v23, %v1338_v35 }
 0x26c   : > { %v1179_v50 = vrot.slane %v1178_v45, 4  ;;  %v1038_v33 = vpop.f32.mrb[48].mxu1  ;;  %2318 = vmatprep.mubr.bf16.mxu1 %v5591_v47  ;;  %v1350_v51 = vsel %vm1339_vm6, %v1326_v42, %v1349_v43 }
 0x26d   : > { %v1171_v36 = vmax.f32 %v1169_v39, %v1170_v48  ;;  %v1040_v28 = vpop.f32.mrb[49].mxu1  ;;  %2319 = vmatmul.mubr.bf16.gmra.mrb[108].mxu1 %v5589_v41  ;;  %v1039_v46 = vadd.f32 %v1038_v33, %v5437_v22 }
 0x26e   : > { %v1180_v52 = vmax.f32 %v1178_v45, %v1179_v50  ;;  %v1042_v53 = vpop.f32.mrb[50].mxu1  ;;  %v1041_v35 = vadd.f32 %v1040_v28, %v5440_v25 }
 0x26f   : > { %v1172_v55 = vrot.slane %v1171_v36, 2  ;;  %v1043_v59 = vadd.f32 %v1042_v53, %v5437_v22  ;;  %v1044_v61 = vpop.f32.mrb[51].mxu1 }
 0x270   : > { %v1181_v63 = vrot.slane %v1180_v52, 2  ;;  %v1045_v0 = vadd.f32 %v1044_v61, %v5440_v25 }
 0x271   : > { %v1173_v1 = vmax.f32 %v1171_v36, %v1172_v55  ;;  %v1185_v2 = vmax.f32 %v1039_v46, %v1043_v59  ;;  %v5601_v43 = vpack.c.bf16 %v1043_v59, %v1039_v46 }
 0x272   : > { %v1182_v3 = vmax.f32 %v1180_v52, %v1181_v63  ;;  %v1194_v4 = vmax.f32 %v1041_v35, %v1045_v0  ;;  %v5603_v5 = vpack.c.bf16 %v1045_v0, %v1041_v35 }
 0x273   : > { %v1174_v6 = vrot.slane %v1173_v1, 1 }
 0x274   : > { %v1183_v8 = vrot.slane %v1182_v3, 1  ;;  %v1048_v9 = vpop.f32.mrb[52].mxu1  ;;  %2328 = vmatprep.mubr.bf16.mxu1 %v5603_v5 }
 0x275   : > { %v1175_v11 = vmax.f32 %v1173_v1, %v1174_v6  ;;  %v1049_v12 = vadd.f32 %v1048_v9, %v5437_v22  ;;  %v1050_v13 = vpop.f32.mrb[53].mxu1  ;;  %2329 = vmatmul.mubr.bf16.gmra.mrb[112].mxu1 %v5601_v43 }
 0x276   : > { %v1184_v15 = vmax.f32 %v1182_v3, %v1183_v8  ;;  %v1051_v16 = vadd.f32 %v1050_v13, %v5440_v25  ;;  %v1052_v21 = vpop.f32.mrb[54].mxu1 }
 0x277   : > { %v1231_v23 = vpack.c.bf16 %v1175_v11, %v1175_v11  ;;  %v1186_v39 = vmax.f32 %v1185_v2, %v1049_v12  ;;  %v1053_v42 = vadd.f32 %v1052_v21, %v5437_v22  ;;  %v1054_v45 = vpop.f32.mrb[55].mxu1 }
 0x278   : > { %v1232_v48 = vpack.c.bf16 %v1184_v15, %v1184_v15  ;;  %v1195_v50 = vmax.f32 %v1194_v4, %v1051_v16  ;;  %v1055_v33 = vadd.f32 %v1054_v45, %v5440_v25 }
 0x279   : > { %v1327_v36 = vunpack.c.l.b16 %v1231_v23  ;;  %v1187_v28 = vmax.f32 %v1186_v39, %v1053_v42  ;;  %v5611_v52 = vpack.c.bf16 %v1053_v42, %v1049_v12 }
 0x27a   : > { %v1328_v53 = vunpack.c.l.b16 %v1232_v48  ;;  %v1196_v55 = vmax.f32 %v1195_v50, %v1055_v33  ;;  %v5613_v46 = vpack.c.bf16 %v1055_v33, %v1051_v16 }
 0x27b   : > { %v1188_v59 = vrot.slane %v1187_v28, 4  ;;  %v1342_v61 = vsel %vm1341_vm7, %v1327_v36, %v1340_v49 }
 0x27c   : > { %v1197_v63 = vrot.slane %v1196_v55, 4  ;;  %v1058_v35 = vpop.f32.mrb[56].mxu1  ;;  %2338 = vmatprep.mubr.bf16.mxu1 %v5613_v46  ;;  %v1351_v0 = vsel %vm1341_vm7, %v1328_v53, %v1350_v51 }
 0x27d   : > { %v1189_v1 = vmax.f32 %v1187_v28, %v1188_v59  ;;  %v1060_v2 = vpop.f32.mrb[57].mxu1  ;;  %2339 = vmatmul.mubr.bf16.gmra.mrb[116].mxu1 %v5611_v52  ;;  %v1059_v8 = vadd.f32 %v1058_v35, %v5437_v22 }
 0x27e   : > { %v1198_v3 = vmax.f32 %v1196_v55, %v1197_v63  ;;  %v1062_v4 = vpop.f32.mrb[58].mxu1  ;;  %v1061_v49 = vadd.f32 %v1060_v2, %v5440_v25 }
 0x27f   : > { %v1190_v6 = vrot.slane %v1189_v1, 2  ;;  %v1063_v9 = vadd.f32 %v1062_v4, %v5437_v22  ;;  %v1064_v11 = vpop.f32.mrb[59].mxu1 }
 0x280   : > { %v1199_v12 = vrot.slane %v1198_v3, 2  ;;  %v1065_v13 = vadd.f32 %v1064_v11, %v5440_v25 }
 0x281   : > { %v1191_v15 = vmax.f32 %v1189_v1, %v1190_v6  ;;  %v1203_v16 = vmax.f32 %v1059_v8, %v1063_v9  ;;  %v5623_v51 = vpack.c.bf16 %v1063_v9, %v1059_v8 }
 0x282   : > { %v1200_v21 = vmax.f32 %v1198_v3, %v1199_v12  ;;  %v1212_v23 = vmax.f32 %v1061_v49, %v1065_v13  ;;  %v5625_v39 = vpack.c.bf16 %v1065_v13, %v1061_v49 }
 0x283   : > { %v1192_v42 = vrot.slane %v1191_v15, 1 }
 0x284   : > { %v1201_v45 = vrot.slane %v1200_v21, 1  ;;  %v1068_v48 = vpop.f32.mrb[60].mxu1  ;;  %2348 = vmatprep.mubr.bf16.mxu1 %v5625_v39 }
 0x285   : > { %v1193_v50 = vmax.f32 %v1191_v15, %v1192_v42  ;;  %v1069_v33 = vadd.f32 %v1068_v48, %v5437_v22  ;;  %v1070_v36 = vpop.f32.mrb[61].mxu1  ;;  %2349 = vmatmul.mubr.bf16.gmra.mrb[120].mxu1 %v5623_v51 }
 0x286   : > { %v1202_v28 = vmax.f32 %v1200_v21, %v1201_v45  ;;  %v1071_v53 = vadd.f32 %v1070_v36, %v5440_v25  ;;  %v1072_v55 = vpop.f32.mrb[62].mxu1 }
 0x287   : > { %v1233_v59 = vpack.c.bf16 %v1193_v50, %v1193_v50  ;;  %v1204_v63 = vmax.f32 %v1203_v16, %v1069_v33  ;;  %v1073_v35 = vadd.f32 %v1072_v55, %v5437_v22  ;;  %v1074_v1 = vpop.f32.mrb[63].mxu1 }
 0x288   : > { %v1234_v2 = vpack.c.bf16 %v1202_v28, %v1202_v28  ;;  %v1213_v3 = vmax.f32 %v1212_v23, %v1071_v53  ;;  %v1075_v4 = vadd.f32 %v1074_v1, %v5440_v25  ;;  %v4752_v1 = vld [vmem:[%s6581_s5 + $0x8] ss:$16 sps:$4 sm:$0xff]  }
 0x289   : > { %v1329_v6 = vunpack.c.l.b16 %v1233_v59  ;;  %v1205_v8 = vmax.f32 %v1204_v63, %v1073_v35  ;;  %v5633_v9 = vpack.c.bf16 %v1073_v35, %v1069_v33 }
 0x28a   : > { %v1330_v11 = vunpack.c.l.b16 %v1234_v2  ;;  %v1214_v12 = vmax.f32 %v1213_v3, %v1075_v4  ;;  %v5635_v49 = vpack.c.bf16 %v1075_v4, %v1071_v53  ;;  %v4757_v3 = vld [vmem:[%s6581_s5 + $0x2c] ss:$16 sps:$4 sm:$0xff]   ;;  %v4755_v4 = vld [vmem:[%s6581_s5 + $0x28] ss:$16 sps:$4 sm:$0xff]  }
 0x28b   : > { %v1206_v13 = vrot.slane %v1205_v8, 4  ;;  %v1344_v15 = vsel %vm1343_vm8, %v1329_v6, %v1342_v61  ;;  %v4760_v6 = vld [vmem:[%s6581_s5 + $0x4c] ss:$16 sps:$4 sm:$0xff]  }
 0x28c   : > { %v1215_v16 = vrot.slane %v1214_v12, 4  ;;  %2358 = vmatprep.mubr.bf16.mxu1 %v5635_v49  ;;  %v1352_v22 = vsel %vm1343_vm8, %v1330_v11, %v1351_v0  ;;  %v4763_v11 = vld [vmem:[%s6581_s5 + $0x6c] ss:$16 sps:$4 sm:$0xff]  }
 0x28d   : > { %v1207_v21 = vmax.f32 %v1205_v8, %v1206_v13  ;;  %2359 = vmatmul.mubr.bf16.gmra.mrb[124].mxu1 %v5633_v9  ;;  %v4758_v8 = vld [vmem:[%s6581_s5 + $0x48] ss:$16 sps:$4 sm:$0xff]   ;;  %v4766_v13 = vld [vmem:[%s6581_s5 + $0x8c] ss:$16 sps:$4 sm:$0xff]  }
 0x28e   : > { %v1216_v25 = vmax.f32 %v1214_v12, %v1215_v16  ;;  %v4761_v12 = vld [vmem:[%s6581_s5 + $0x68] ss:$16 sps:$4 sm:$0xff]   ;;  %v4769_v16 = vld [vmem:[%s6581_s5 + $0xac] ss:$16 sps:$4 sm:$0xff]  }
 0x28f   : > { %v1208_v23 = vrot.slane %v1207_v21, 2 }
 0x290   : > { %v1217_v42 = vrot.slane %v1216_v25, 2 }
 0x291   : > { %v1209_v45 = vmax.f32 %v1207_v21, %v1208_v23  ;;  %v4772_v21 = vld [vmem:[%s6581_s5 + $0xcc] ss:$16 sps:$4 sm:$0xff]  }
 0x292   : > { %v1218_v48 = vmax.f32 %v1216_v25, %v1217_v42  ;;  %v4770_v25 = vld [vmem:[%s6581_s5 + $0xc8] ss:$16 sps:$4 sm:$0xff]   ;;  %v4775_v23 = vld [vmem:[%s6581_s5 + $0xec] ss:$16 sps:$4 sm:$0xff]  }
 0x293   : > { %v1210_v50 = vrot.slane %v1209_v45, 1  ;;  %v4773_v42 = vld [vmem:[%s6581_s5 + $0xe8] ss:$16 sps:$4 sm:$0xff]  }
 0x294   : > { %v1219_v33 = vrot.slane %v1218_v48, 1 }
 0x295   : > { %v1211_v36 = vmax.f32 %v1209_v45, %v1210_v50  ;;  %v4778_v45 = vld [vmem:[%s6581_s5 + $0x10c] ss:$16 sps:$4 sm:$0xff]  }
 0x296   : > { %v1220_v28 = vmax.f32 %v1218_v48, %v1219_v33  ;;  %v4776_v48 = vld [vmem:[%s6581_s5 + $0x108] ss:$16 sps:$4 sm:$0xff]   ;;  %v4781_v50 = vld [vmem:[%s6581_s5 + $0x12c] ss:$16 sps:$4 sm:$0xff]  }
 0x297   : > { %v1235_v53 = vpack.c.bf16 %v1211_v36, %v1211_v36  ;;  %v4779_v33 = vld [vmem:[%s6581_s5 + $0x128] ss:$16 sps:$4 sm:$0xff]   ;;  %v4784_v36 = vld [vmem:[%s6581_s5 + $0x14c] ss:$16 sps:$4 sm:$0xff]  }
 0x298   : > { %v1236_v55 = vpack.c.bf16 %v1220_v28, %v1220_v28  ;;  %v4782_v28 = vld [vmem:[%s6581_s5 + $0x148] ss:$16 sps:$4 sm:$0xff]  }
 0x299   : > { %v1331_v61 = vunpack.c.l.b16 %v1235_v53  ;;  %v4787_v53 = vld [vmem:[%s6581_s5 + $0x16c] ss:$16 sps:$4 sm:$0xff]  }
 0x29a   : > { %v1332_v59 = vunpack.c.l.b16 %v1236_v55  ;;  %v4785_v55 = vld [vmem:[%s6581_s5 + $0x168] ss:$16 sps:$4 sm:$0xff]  }
 0x29b   : > { %v1346_v63 = vsel %vm1345_vm9, %v1331_v61, %v1344_v15  ;;  %v4764_v15 = vld [vmem:[%s6581_s5 + $0x88] ss:$16 sps:$4 sm:$0xff]   ;;  %v4790_v61 = vld [vmem:[%s6581_s5 + $0x18c] ss:$16 sps:$4 sm:$0xff]  }
 0x29c   : > { %v1353_v0 = vsel %vm1345_vm9, %v1332_v59, %v1352_v22  ;;  %v5646_v2 = vpack.c.b16 %v1346_v63, %v1346_v63  ;;  %v4767_v22 = vld [vmem:[%s6581_s5 + $0xa8] ss:$16 sps:$4 sm:$0xff]   ;;  %v4793_v63 = vld [vmem:[%s6581_s5 + $0x1ac] ss:$16 sps:$4 sm:$0xff]  }
 0x29d   : > { %v1355_v35 = vpack.c.b16 %v1353_v0, %v1353_v0  ;;  %v4788_v59 = vld [vmem:[%s6581_s5 + $0x188] ss:$16 sps:$4 sm:$0xff]  }
 0x29e   : > { %v4791_v0 = vld [vmem:[%s6581_s5 + $0x1a8] ss:$16 sps:$4 sm:$0xff]  }
 0x29f   : > { %1710 = vmatprep.mubr.bf16.mxu0 %v1355_v35 }
 0x2a0   : > { %1711 = vmatmul.mubr.bf16.vlgmr.msra.gmra.mrb[32].mxu0 %v5646_v2 }
 0x2a1   : > { %1720 = vmatpush1.bf16.msra.mxu0 %v4752_v1  ;;  %1751 = vmatprep.mubr.bf16.mxu0 %v1355_v35  ;;  %v4796_v35 = vld [vmem:[%s6581_s5 + $0x1cc] ss:$16 sps:$4 sm:$0xff]   ;;  %v4794_v1 = vld [vmem:[%s6581_s5 + $0x1c8] ss:$16 sps:$4 sm:$0xff]  }
 0x2a2   : > { %1721 = vmatprep.subr.bf16.mxu0 %v4757_v3  ;;  %v4799_v3 = vld [vmem:[%s6581_s5 + $0x1ec] ss:$16 sps:$4 sm:$0xff]  }
 0x2a5   : > { %1722 = vmatpush1.bf16.msra.mxu0 %v4755_v4  ;;  %v4797_v4 = vld [vmem:[%s6581_s5 + $0x1e8] ss:$16 sps:$4 sm:$0xff]  }
 0x2a6   : > { %1723 = vmatprep.subr.bf16.mxu0 %v4760_v6  ;;  %v4802_v6 = vld [vmem:[#allocation2 + $0xc] ss:$16 sps:$4 sm:$0xff]  }
 0x2a9   : > { %1724 = vmatpush1.bf16.msra.mxu0 %v4758_v8  ;;  %v4800_v8 = vld [vmem:[#allocation2 + $0x8] ss:$16 sps:$4 sm:$0xff]  }
 0x2aa   : > { %1725 = vmatprep.subr.bf16.mxu0 %v4763_v11  ;;  %v4805_v11 = vld [vmem:[#allocation2 + $0x2c] ss:$16 sps:$4 sm:$0xff]  }
 0x2ad   : > { %1726 = vmatpush1.bf16.msra.mxu0 %v4761_v12  ;;  %v4803_v12 = vld [vmem:[#allocation2 + $0x28] ss:$16 sps:$4 sm:$0xff]  }
 0x2ae   : > { %1727 = vmatprep.subr.bf16.mxu0 %v4766_v13  ;;  %v4808_v13 = vld [vmem:[#allocation2 + $0x4c] ss:$16 sps:$4 sm:$0xff]  }
 0x2b1   : > { %1728 = vmatpush1.bf16.msra.mxu0 %v4764_v15  ;;  %v4806_v15 = vld [vmem:[#allocation2 + $0x48] ss:$16 sps:$4 sm:$0xff]  }
 0x2b2   : > { %1729 = vmatprep.subr.bf16.mxu0 %v4769_v16  ;;  %v4811_v16 = vld [vmem:[#allocation2 + $0x6c] ss:$16 sps:$4 sm:$0xff]  }
 0x2b5   : > { %1730 = vmatpush1.bf16.msra.mxu0 %v4767_v22 }
 0x2b6   : > { %1731 = vmatprep.subr.bf16.mxu0 %v4772_v21 }
 0x2b9   : > { %1732 = vmatpush1.bf16.msra.mxu0 %v4770_v25  ;;  %v4809_v25 = vld [vmem:[#allocation2 + $0x68] ss:$16 sps:$4 sm:$0xff]  }
 0x2ba   : > { %1733 = vmatprep.subr.bf16.mxu0 %v4775_v23  ;;  %v4848_v23 = vld [vmem:[#allocation5 + $0x40] sm:$0xff]  }
 0x2bb   : > { %4275 = vmatprep.subr.bf16.mxu1 %v4848_v23 }
 0x2bd   : > { %1734 = vmatpush1.bf16.msra.mxu0 %v4773_v42 }
 0x2be   : > { %1735 = vmatprep.subr.bf16.mxu0 %v4778_v45 }
 0x2c1   : > { %1736 = vmatpush1.bf16.msra.mxu0 %v4776_v48  ;;  %v4817_v48 = vld [vmem:[#allocation2 + $0xac] ss:$16 sps:$4 sm:$0xff]  }
 0x2c2   : > { %1737 = vmatprep.subr.bf16.mxu0 %v4781_v50 }
 0x2c5   : > { %1738 = vmatpush1.bf16.msra.mxu0 %v4779_v33  ;;  %v4849_v33 = vld [vmem:[#allocation5] sm:$0xff]  }
 0x2c6   : > { %1739 = vmatprep.subr.bf16.mxu0 %v4784_v36  ;;  %4276 = vmatpush3.bf16.msra.mxu1 %v4849_v33  ;;  %v4835_v33 = vld [vmem:[#allocation2 + $0x16c] ss:$16 sps:$4 sm:$0xff]  }
 0x2c9   : > { %1740 = vmatpush1.bf16.msra.mxu0 %v4782_v28  ;;  %v4815_v28 = vld [vmem:[#allocation2 + $0xa8] ss:$16 sps:$4 sm:$0xff]  }
 0x2ca   : > { %1741 = vmatprep.subr.bf16.mxu0 %v4787_v53 }
 0x2cd   : > { %1742 = vmatpush1.bf16.msra.mxu0 %v4785_v55  ;;  %v4820_v55 = vld [vmem:[#allocation2 + $0xcc] ss:$16 sps:$4 sm:$0xff]  }
 0x2ce   : > { %1743 = vmatprep.subr.bf16.mxu0 %v4790_v61 }
 0x2d1   : > { %1744 = vmatpush1.bf16.msra.mxu0 %v4788_v59  ;;  %v4818_v59 = vld [vmem:[#allocation2 + $0xc8] ss:$16 sps:$4 sm:$0xff]  }
 0x2d2   : > { %1745 = vmatprep.subr.bf16.mxu0 %v4793_v63  ;;  %v4823_v63 = vld [vmem:[#allocation2 + $0xec] ss:$16 sps:$4 sm:$0xff]  }
 0x2d5   : > { %1746 = vmatpush1.bf16.msra.mxu0 %v4791_v0 }
 0x2d6   : > { %1747 = vmatprep.subr.bf16.mxu0 %v4796_v35 }
 0x2d9   : > { %1748 = vmatpush1.bf16.msra.mxu0 %v4794_v1  ;;  %v4821_v1 = vld [vmem:[#allocation2 + $0xe8] ss:$16 sps:$4 sm:$0xff]  }
 0x2da   : > { %1749 = vmatprep.subr.bf16.mxu0 %v4799_v3  ;;  %v4850_v3 = vld [vmem:[#allocation5 + $0x48] sm:$0xff]  }
 0x2db   : > { %4277 = vmatprep.subr.bf16.mxu1 %v4850_v3  ;;  %v4838_v3 = vld [vmem:[#allocation2 + $0x18c] ss:$16 sps:$4 sm:$0xff]  }
 0x2dd   : > { %1750 = vmatpush1.bf16.msra.mxu0 %v4797_v4 }
 0x2de   : > { %2369 = vmatprep.subr.bf16.mxu0 %v4802_v6  ;;  %v4826_v6 = vld [vmem:[#allocation2 + $0x10c] ss:$16 sps:$4 sm:$0xff]  }
 0x2e0   : > { %1752 = vmatmul.mubr.bf16.vlgmr.msra.gmra.mrb[36].mxu0 %v5646_v2  ;;  %v4814_v2 = vld [vmem:[#allocation2 + $0x8c] ss:$16 sps:$4 sm:$0xff]  }
 0x2e1   : > { %2370 = vmatpush1.bf16.msra.mxu0 %v4800_v8  ;;  %2401 = vmatprep.mubr.bf16.mxu0 %v5457_v40  ;;  %v4812_v40 = vld [vmem:[#allocation2 + $0x88] ss:$16 sps:$4 sm:$0xff]  }
 0x2e2   : > { %2371 = vmatprep.subr.bf16.mxu0 %v4805_v11  ;;  %v4824_v11 = vld [vmem:[#allocation2 + $0x108] ss:$16 sps:$4 sm:$0xff]  }
 0x2e5   : > { %2372 = vmatpush1.bf16.msra.mxu0 %v4803_v12  ;;  %v4829_v12 = vld [vmem:[#allocation2 + $0x12c] ss:$16 sps:$4 sm:$0xff]  }
 0x2e6   : > { %2373 = vmatprep.subr.bf16.mxu0 %v4808_v13 }
 0x2e8   : > { %v5741_v22 = vpop.f32.mrb[64].mxu1 }
 0x2e9   : > { %2374 = vmatpush1.bf16.msra.mxu0 %v4806_v15  ;;  %v5743_v21 = vpop.f32.mrb[65].mxu1  ;;  %v4851_v15 = vld [vmem:[#allocation5 + $0x8] sm:$0xff]  }
 0x2ea   : > { %v5745_v42 = vpop.f32.mrb[66].mxu1  ;;  %2375 = vmatprep.subr.bf16.mxu0 %v4811_v16  ;;  %4278 = vmatpush3.bf16.msra.mxu1 %v4851_v15 }
 0x2eb   : > { %v5747_v45 = vpop.f32.mrb[67].mxu1 }
 0x2ed   : > { %2376 = vmatpush1.bf16.msra.mxu0 %v4809_v25  ;;  %v4827_v25 = vld [vmem:[#allocation2 + $0x128] ss:$16 sps:$4 sm:$0xff]  }
 0x2ee   : > { %2377 = vmatprep.subr.bf16.mxu0 %v4814_v2  ;;  %v4832_v2 = vld [vmem:[#allocation2 + $0x14c] ss:$16 sps:$4 sm:$0xff]  }
 0x2f0   : > { %v5749_v50 = vpop.f32.mrb[68].mxu1 }
 0x2f1   : > { %2378 = vmatpush1.bf16.msra.mxu0 %v4812_v40  ;;  %v5751_v36 = vpop.f32.mrb[69].mxu1 }
 0x2f2   : > { %v5753_v53 = vpop.f32.mrb[70].mxu1  ;;  %2379 = vmatprep.subr.bf16.mxu0 %v4817_v48  ;;  %v4830_v48 = vld [vmem:[#allocation2 + $0x148] ss:$16 sps:$4 sm:$0xff]  }
 0x2f3   : > { %v5755_v61 = vpop.f32.mrb[71].mxu1 }
 0x2f5   : > { %2380 = vmatpush1.bf16.msra.mxu0 %v4815_v28 }
 0x2f6   : > { %2381 = vmatprep.subr.bf16.mxu0 %v4820_v55 }
 0x2f8   : > { %v5757_v0 = vpop.f32.mrb[72].mxu1 }
 0x2f9   : > { %2382 = vmatpush1.bf16.msra.mxu0 %v4818_v59  ;;  %v5759_v35 = vpop.f32.mrb[73].mxu1  ;;  %v4833_v59 = vld [vmem:[#allocation2 + $0x168] ss:$16 sps:$4 sm:$0xff]  }
 0x2fa   : > { %v5761_v4 = vpop.f32.mrb[74].mxu1  ;;  %2383 = vmatprep.subr.bf16.mxu0 %v4823_v63  ;;  %v4853_v63 = vld [vmem:[#allocation5 + $0x50] sm:$0xff]  }
 0x2fb   : > { %v5763_v8 = vpop.f32.mrb[75].mxu1  ;;  %4279 = vmatprep.subr.bf16.mxu1 %v4853_v63  ;;  %v4842_v63 = vld [vmem:[#allocation2 + $0x1c8] ss:$16 sps:$4 sm:$0xff]  }
 0x2fd   : > { %2384 = vmatpush1.bf16.msra.mxu0 %v4821_v1 }
 0x2fe   : > { %2385 = vmatprep.subr.bf16.mxu0 %v4826_v6 }
 0x300   : > { %v5765_v13 = vpop.f32.mrb[76].mxu1 }
 0x301   : > { %2386 = vmatpush1.bf16.msra.mxu0 %v4824_v11  ;;  %v5767_v16 = vpop.f32.mrb[77].mxu1  ;;  %v4836_v11 = vld [vmem:[#allocation2 + $0x188] ss:$16 sps:$4 sm:$0xff]  }
 0x302   : > { %v5769_v23 = vpop.f32.mrb[78].mxu1  ;;  %2387 = vmatprep.subr.bf16.mxu0 %v4829_v12  ;;  %v4841_v12 = vld [vmem:[#allocation2 + $0x1ac] ss:$16 sps:$4 sm:$0xff]  }
 0x303   : > { %6619 = vst [vmem:[#allocation15_spill] sm:$0xff] %v5769_v23  ;;  %v5771_v40 = vpop.f32.mrb[79].mxu1 }
 0x305   : > { %2388 = vmatpush1.bf16.msra.mxu0 %v4827_v25  ;;  %v4855_v25 = vld [vmem:[#allocation5 + $0x10] sm:$0xff]  }
 0x306   : > { %2389 = vmatprep.subr.bf16.mxu0 %v4832_v2  ;;  %4280 = vmatpush3.bf16.msra.mxu1 %v4855_v25 }
 0x308   : > { %v5773_v28 = vpop.f32.mrb[80].mxu1 }
 0x309   : > { %6620 = vst [vmem:[#allocation16_spill] sm:$0xff] %v5773_v28  ;;  %2390 = vmatpush1.bf16.msra.mxu0 %v4830_v48  ;;  %v5775_v55 = vpop.f32.mrb[81].mxu1  ;;  %v4839_v48 = vld [vmem:[#allocation2 + $0x1a8] ss:$16 sps:$4 sm:$0xff]  }
 0x30a   : > { %6621 = vst [vmem:[#allocation17_spill] sm:$0xff] %v5775_v55  ;;  %v5777_v1 = vpop.f32.mrb[82].mxu1  ;;  %2391 = vmatprep.subr.bf16.mxu0 %v4835_v33  ;;  %v4861_v55 = vld [vmem:[#allocation5 + $0x60] sm:$0xff]  }
 0x30b   : > { %6622 = vst [vmem:[#allocation18_spill] sm:$0xff] %v5777_v1  ;;  %v5779_v6 = vpop.f32.mrb[83].mxu1  ;;  %v4844_v1 = vld [vmem:[#allocation2 + $0x1cc] ss:$16 sps:$4 sm:$0xff]  }
 0x30c   : > { %6623 = vst [vmem:[#allocation19_spill] sm:$0xff] %v5779_v6  ;;  %v4857_v6 = vld [vmem:[#allocation5 + $0x58] sm:$0xff]  }
 0x30d   : > { %2392 = vmatpush1.bf16.msra.mxu0 %v4833_v59  ;;  %v4847_v59 = vld [vmem:[#allocation2 + $0x1ec] ss:$16 sps:$4 sm:$0xff]   ;;  %4281 = vmatprep.subr.bf16.mxu1 %v4857_v6 }
 0x30e   : > { %2393 = vmatprep.subr.bf16.mxu0 %v4838_v3 }
 0x310   : > { %v5781_v15 = vpop.f32.mrb[84].mxu1 }
 0x311   : > { %6624 = vst [vmem:[#allocation20_spill] sm:$0xff] %v5781_v15  ;;  %2394 = vmatpush1.bf16.msra.mxu0 %v4836_v11  ;;  %v5783_v2 = vpop.f32.mrb[85].mxu1  ;;  %v4845_v11 = vld [vmem:[#allocation2 + $0x1e8] ss:$16 sps:$4 sm:$0xff]  }
 0x312   : > { %6625 = vst [vmem:[#allocation21_spill] sm:$0xff] %v5783_v2  ;;  %v5785_v28 = vpop.f32.mrb[86].mxu1  ;;  %2395 = vmatprep.subr.bf16.mxu0 %v4841_v12  ;;  %v4859_v2 = vld [vmem:[#allocation5 + $0x18] sm:$0xff]   ;;  %v5795_v12 = vld [vmem:[#allocation5 + $0xc0] sm:$0xff]  }
 0x313   : > { %v5787_v33 = vpop.f32.mrb[87].mxu1  ;;  %4282 = vmatpush3.bf16.msra.mxu1 %v4859_v2  ;;  %v5811_v2 = vld [vmem:[#allocation5 + $0x88] sm:$0xff]  }
 0x314   : > { %4283 = vmatprep.subr.bf16.mxu1 %v4861_v55 }
 0x315   : > { %2396 = vmatpush1.bf16.msra.mxu0 %v4839_v48  ;;  %v5799_v48 = vld [vmem:[#allocation5 + $0x80] sm:$0xff]  }
 0x316   : > { %2397 = vmatprep.subr.bf16.mxu0 %v4844_v1  ;;  %v4863_v1 = vld [vmem:[#allocation5 + $0x20] sm:$0xff]  }
 0x317   : > { %4284 = vmatpush3.bf16.msra.mxu1 %v4863_v1 }
 0x318   : > { %v5789_v3 = vpop.f32.mrb[88].mxu1 }
 0x319   : > { %6626 = vst [vmem:[#allocation22_spill] sm:$0xff] %v5789_v3  ;;  %2398 = vmatpush1.bf16.msra.mxu0 %v4842_v63  ;;  %v5791_v15 = vpop.f32.mrb[89].mxu1  ;;  %v5802_v63 = vld [vmem:[#allocation5 + $0xc8] sm:$0xff]  }
 0x31a   : > { %v5793_v23 = vpop.f32.mrb[90].mxu1  ;;  %2399 = vmatprep.subr.bf16.mxu0 %v4847_v59  ;;  %v5816_v59 = vld [vmem:[#allocation5 + $0xd0] sm:$0xff]  }
 0x31b   : > { %6627 = vst [vmem:[#allocation23_spill] sm:$0xff] %v5793_v23  ;;  %v5797_v25 = vpop.f32.mrb[91].mxu1 }
 0x31d   : > { %2400 = vmatpush1.bf16.msra.mxu0 %v4845_v11 }
 0x31e   : > { %4387 = vmatprep.subr.bf16.mxu0 %v5795_v12 }
 0x320   : > { %2402 = vmatmul.mubr.bf16.vlgmr.msra.gmra.mrb[40].mxu0 %v5452_v24  ;;  %v5805_v23 = vpop.f32.mrb[92].mxu1  ;;  %v5821_v24 = vld [vmem:[#allocation5 + $0x90] sm:$0xff]  }
 0x321   : > { %6628 = vst [vmem:[#allocation24_spill] sm:$0xff] %v5805_v23  ;;  %2411 = vmatprep.mubr.bf16.mxu0 %v5482_v44  ;;  %v5808_v6 = vpop.f32.mrb[93].mxu1  ;;  %4388 = vmatpush3.bf16.msra.mxu0 %v5799_v48 }
 0x322   : > { %v5813_v55 = vpop.f32.mrb[94].mxu1  ;;  %4389 = vmatprep.subr.bf16.mxu0 %v5802_v63 }
 0x323   : > { %6629 = vst [vmem:[#allocation25_spill] sm:$0xff] %v5813_v55  ;;  %v5818_v11 = vpop.f32.mrb[95].mxu1 }
 0x324   : > { %6630 = vst [vmem:[#allocation26_spill] sm:$0xff] %v5818_v11 }
 0x325   : > { %4390 = vmatpush3.bf16.msra.mxu0 %v5811_v2 }
 0x326   : > { %4391 = vmatprep.subr.bf16.mxu0 %v5816_v59 }
 0x328   : > { %2412 = vmatmul.mubr.bf16.gmra.mrb[44].mxu0 %v5474_v38  ;;  %v5825_v44 = vpop.f32.mrb[96].mxu1 }
 0x329   : > { %6631 = vst [vmem:[#allocation27_spill] sm:$0xff] %v5825_v44  ;;  %2421 = vmatprep.mubr.bf16.mxu0 %v5495_v10  ;;  %v5828_v1 = vpop.f32.mrb[97].mxu1  ;;  %4392 = vmatpush3.bf16.msra.mxu0 %v5821_v24 }
 0x32a   : > { %v5831_v55 = vpop.f32.mrb[98].mxu1 }
 0x32b   : > { %6632 = vst [vmem:[#allocation28_spill] sm:$0xff] %v5831_v55  ;;  %v5833_v23 = vpop.f32.mrb[99].mxu1 }
 0x32c   : > { %6633 = vst [vmem:[#allocation29_spill] sm:$0xff] %v5833_v23 }
 0x330   : > { %2422 = vmatmul.mubr.bf16.gmra.mrb[48].mxu0 %v5493_v7  ;;  %v5836_v3 = vpop.f32.mrb[100].mxu1 }
 0x331   : > { %6634 = vst [vmem:[#allocation30_spill] sm:$0xff] %v5836_v3  ;;  %2431 = vmatprep.mubr.bf16.mxu0 %v5505_v34  ;;  %v5839_v11 = vpop.f32.mrb[101].mxu1  ;;  %v4864_v3 = vld [vmem:[#allocation5 + $0x68] sm:$0xff]  }
 0x332   : > { %6635 = vst [vmem:[#allocation31_spill] sm:$0xff] %v5839_v11  ;;  %v5841_v38 = vpop.f32.mrb[102].mxu1  ;;  %v4865_v34 = vld [vmem:[#allocation5 + $0x28] sm:$0xff]   ;;  %4285 = vmatprep.subr.bf16.mxu1 %v4864_v3  ;;  %v5855_v11 = vld [vmem:[#allocation5 + $0xd8] sm:$0xff]  }
 0x333   : > { %6636 = vst [vmem:[#allocation32_spill] sm:$0xff] %v5841_v38  ;;  %v5843_v44 = vpop.f32.mrb[103].mxu1  ;;  %4286 = vmatpush3.bf16.msra.mxu1 %v4865_v34  ;;  %v5857_v38 = vld [vmem:[#allocation5 + $0x98] sm:$0xff]   ;;  %4393 = vmatprep.subr.bf16.mxu0 %v5855_v11 }
 0x334   : > { %6637 = vst [vmem:[#allocation33_spill] sm:$0xff] %v5843_v44  ;;  %v4868_v44 = vld [vmem:[#allocation5 + $0x70] sm:$0xff]   ;;  %4394 = vmatpush3.bf16.msra.mxu0 %v5857_v38 }
 0x335   : > { %4287 = vmatprep.subr.bf16.mxu1 %v4868_v44  ;;  %v5882_v44 = vld [vmem:[#allocation5 + $0xa0] sm:$0xff]  }
 0x338   : > { %2432 = vmatmul.mubr.bf16.gmra.mrb[52].mxu0 %v5503_v31  ;;  %v5846_v10 = vpop.f32.mrb[104].mxu1  ;;  %v4869_v31 = vld [vmem:[#allocation5 + $0x30] sm:$0xff]  }
 0x339   : > { %6638 = vst [vmem:[#allocation34_spill] sm:$0xff] %v5846_v10  ;;  %2441 = vmatprep.mubr.bf16.mxu0 %v5515_v37  ;;  %v5849_v55 = vpop.f32.mrb[105].mxu1  ;;  %v4870_v37 = vld [vmem:[#allocation5 + $0x78] sm:$0xff]   ;;  %4288 = vmatpush3.bf16.msra.mxu1 %v4869_v31 }
 0x33a   : > { %6639 = vst [vmem:[#allocation35_spill] sm:$0xff] %v5849_v55  ;;  %v5851_v23 = vpop.f32.mrb[106].mxu1  ;;  %4289 = vmatprep.subr.bf16.mxu1 %v4870_v37 }
 0x33b   : > { %6640 = vst [vmem:[#allocation36_spill] sm:$0xff] %v5851_v23  ;;  %v5853_v7 = vpop.f32.mrb[107].mxu1 }
 0x33c   : > { %6641 = vst [vmem:[#allocation37_spill] sm:$0xff] %v5853_v7  ;;  %v4871_v7 = vld [vmem:[#allocation5 + $0x38] sm:$0xff]  }
 0x33d   : > { %4290 = vmatpush3.bf16.msra.mxu1 %v4871_v7 }
 0x33e   : > { %4533 = vmatprep.subr.bf16.mxu1 %v5795_v12 }
 0x340   : > { %2442 = vmatmul.mubr.bf16.gmra.mrb[56].mxu0 %v5513_v58  ;;  %v5860_v10 = vpop.f32.mrb[108].mxu1 }
 0x341   : > { %6642 = vst [vmem:[#allocation38_spill] sm:$0xff] %v5860_v10  ;;  %2451 = vmatprep.mubr.bf16.mxu0 %v5525_v32  ;;  %v5864_v23 = vpop.f32.mrb[109].mxu1 }
 0x342   : > { %6643 = vst [vmem:[#allocation39_spill] sm:$0xff] %v5864_v23  ;;  %v5867_v3 = vpop.f32.mrb[110].mxu1 }
 0x343   : > { %6644 = vst [vmem:[#allocation40_spill] sm:$0xff] %v5867_v3  ;;  %v5869_v34 = vpop.f32.mrb[111].mxu1  ;;  %v5880_v3 = vld [vmem:[#allocation5 + $0xe0] sm:$0xff]  }
 0x344   : > { %6645 = vst [vmem:[#allocation41_spill] sm:$0xff] %v5869_v34  ;;  %4395 = vmatprep.subr.bf16.mxu0 %v5880_v3 }
 0x345   : > { %4396 = vmatpush3.bf16.msra.mxu0 %v5882_v44 }
 0x348   : > { %2452 = vmatmul.mubr.bf16.gmra.mrb[60].mxu0 %v5523_v27  ;;  %v5872_v58 = vpop.f32.mrb[112].mxu1 }
 0x349   : > { %6646 = vst [vmem:[#allocation42_spill] sm:$0xff] %v5872_v58  ;;  %2461 = vmatprep.mubr.bf16.mxu0 %v5537_v60  ;;  %v5876_v32 = vpop.f32.mrb[113].mxu1 }
 0x34a   : > { %6647 = vst [vmem:[#allocation43_spill] sm:$0xff] %v5876_v32  ;;  %v5878_v10 = vpop.f32.mrb[114].mxu1 }
 0x34b   : > { %6648 = vst [vmem:[#allocation44_spill] sm:$0xff] %v5878_v10  ;;  %v5884_v31 = vpop.f32.mrb[115].mxu1 }
 0x34c   : > { %6649 = vst [vmem:[#allocation45_spill] sm:$0xff] %v5884_v31 }
 0x350   : > { %2462 = vmatmul.mubr.bf16.gmra.mrb[64].mxu0 %v5535_v56  ;;  %v5889_v27 = vpop.f32.mrb[116].mxu1  ;;  %v5906_v56 = vld [vmem:[#allocation5 + $0xe8] sm:$0xff]  }
 0x351   : > { %6650 = vst [vmem:[#allocation46_spill] sm:$0xff] %v5889_v27  ;;  %2471 = vmatprep.mubr.bf16.mxu0 %v5547_v26  ;;  %v5892_v60 = vpop.f32.mrb[117].mxu1  ;;  %v5908_v27 = vld [vmem:[#allocation5 + $0xa8] sm:$0xff]   ;;  %4397 = vmatprep.subr.bf16.mxu0 %v5906_v56 }
 0x352   : > { %6651 = vst [vmem:[#allocation47_spill] sm:$0xff] %v5892_v60  ;;  %v5894_v12 = vpop.f32.mrb[118].mxu1  ;;  %4398 = vmatpush3.bf16.msra.mxu0 %v5908_v27 }
 0x353   : > { %6652 = vst [vmem:[#allocation48_spill] sm:$0xff] %v5894_v12  ;;  %v5896_v7 = vpop.f32.mrb[119].mxu1 }
 0x354   : > { %6653 = vst [vmem:[#allocation49_spill] sm:$0xff] %v5896_v7 }
 0x358   : > { %2472 = vmatmul.mubr.bf16.gmra.mrb[68].mxu0 %v5545_v20  ;;  %v5899_v37 = vpop.f32.mrb[120].mxu1 }
 0x359   : > { %6654 = vst [vmem:[#allocation50_spill] sm:$0xff] %v5899_v37  ;;  %2481 = vmatprep.mubr.bf16.mxu0 %v5559_v57  ;;  %v5902_v10 = vpop.f32.mrb[121].mxu1 }
 0x35a   : > { %6655 = vst [vmem:[#allocation51_spill] sm:$0xff] %v5902_v10  ;;  %v5904_v58 = vpop.f32.mrb[122].mxu1  ;;  %v5928_v10 = vld [vmem:[#allocation5 + $0xb0] sm:$0xff]  }
 0x35b   : > { %6656 = vst [vmem:[#allocation52_spill] sm:$0xff] %v5904_v58  ;;  %v5910_v26 = vpop.f32.mrb[123].mxu1  ;;  %6662 = vst [vmem:[#allocation58_spill] sm:$0xff] %v5928_v10 }
 0x35c   : > { %6657 = vst [vmem:[#allocation53_spill] sm:$0xff] %v5910_v26  ;;  %v5926_v26 = vld [vmem:[#allocation5 + $0xf0] sm:$0xff]  }
 0x35d   : > { %4399 = vmatprep.subr.bf16.mxu0 %v5926_v26 }
 0x35e   : > { %4400 = vmatpush3.bf16.msra.mxu0 %v5928_v10 }
 0x360   : > { %2482 = vmatmul.mubr.bf16.gmra.mrb[72].mxu0 %v5557_v54  ;;  %v5915_v20 = vpop.f32.mrb[124].mxu1 }
 0x361   : > { %6658 = vst [vmem:[#allocation54_spill] sm:$0xff] %v5915_v20  ;;  %2491 = vmatprep.mubr.bf16.mxu0 %v5569_v29  ;;  %v5918_v57 = vpop.f32.mrb[125].mxu1 }
 0x362   : > { %6659 = vst [vmem:[#allocation55_spill] sm:$0xff] %v5918_v57  ;;  %v5920_v37 = vpop.f32.mrb[126].mxu1  ;;  %v5940_v57 = vld [vmem:[#allocation5 + $0xb8] sm:$0xff]  }
 0x363   : > { %6660 = vst [vmem:[#allocation56_spill] sm:$0xff] %v5920_v37  ;;  %v5922_v58 = vpop.f32.mrb[127].mxu1  ;;  %6664 = vst [vmem:[#allocation60_spill] sm:$0xff] %v5940_v57 }
 0x364   : > { %6661 = vst [vmem:[#allocation57_spill] sm:$0xff] %v5922_v58 }
 0x368   : > { %2492 = vmatmul.mubr.bf16.gmra.mrb[76].mxu0 %v5567_v18 }
 0x369   : > { %2501 = vmatprep.mubr.bf16.mxu0 %v5581_v62  ;;  %v5938_v62 = vld [vmem:[#allocation5 + $0xf8] sm:$0xff]  }
 0x36a   : > { %6663 = vst [vmem:[#allocation59_spill] sm:$0xff] %v5938_v62  ;;  %4401 = vmatprep.subr.bf16.mxu0 %v5938_v62 }
 0x36b   : > { %4402 = vmatpush3.bf16.msra.mxu0 %v5940_v57 }
 0x370   : > { %2502 = vmatmul.mubr.bf16.gmra.mrb[80].mxu0 %v5579_v30  ;;  %v5016_v30 = vmov 1966171168  }
 0x371   : > { %2511 = vmatprep.mubr.bf16.mxu0 %v5591_v47 }
 0x373   : > { %v1712_v54 = vpop.f32.mrb[32].mxu0 }
 0x374   : > { %v1714_v29 = vpop.f32.mrb[33].mxu0 }
 0x375   : > { %v2566_v37 = vcombine.low %v1712_v54, %v1714_v29  ;;  %v2567_v20 = vcombine.high %v1712_v54, %v1714_v29  ;;  %v1716_v58 = vpop.f32.mrb[34].mxu0 }
 0x376   : > { %v1717_v18 = vpop.f32.mrb[35].mxu0 }
 0x378   : > { %2512 = vmatmul.mubr.bf16.gmra.mrb[84].mxu0 %v5589_v41  ;;  %v2571_v41 = vunpack.c.l.s4 %v5016_v30 }
 0x379   : > { %2521 = vmatprep.mubr.bf16.mxu0 %v5603_v5 }
 0x37a   : > { %v2572_v47 = vunpack.c.0.s8 %v2571_v41 }
 0x380   : > { %2522 = vmatmul.mubr.bf16.gmra.mrb[88].mxu0 %v5601_v43  ;;  %v5950_v43 = vsub.s32 %v2572_v47, %v5413_v14 }
 0x381   : > { %2531 = vmatprep.mubr.bf16.mxu0 %v5613_v46 }
 0x388   : > { %2532 = vmatmul.mubr.bf16.gmra.mrb[92].mxu0 %v5611_v52 }
 0x389   : > { %2541 = vmatprep.mubr.bf16.mxu0 %v5625_v39  ;;  %v2576_v39 = vrot.slane %v2566_v37, %v5950_v43  ;;  %v5967_v37 = vld [vmem:[%s6583_s7] sm:$0xf] }
 0x390   : > { %2542 = vmatmul.mubr.bf16.gmra.mrb[96].mxu0 %v5623_v51  ;;  %v5954_v51 = vrot.slane %v2567_v20, %v5950_v43 }
 0x391   : > { %2551 = vmatprep.mubr.bf16.mxu0 %v5635_v49 }
 0x398   : > { %2552 = vmatmul.mubr.bf16.gmra.mrb[100].mxu0 %v5633_v9 }
 0x3b3   : > { %v1753_v5 = vpop.f32.mrb[36].mxu0 }
 0x3b4   : > { %v1755_v46 = vpop.f32.mrb[37].mxu0 }
 0x3b5   : > { %v2568_v58 = vcombine.low %v1753_v5, %v1755_v46  ;;  %v2569_v54 = vcombine.high %v1753_v5, %v1755_v46  ;;  %v1757_v29 = vpop.f32.mrb[38].mxu0  ;;  %v5977_v46 = vrot.slane %v5967_v37, %v5428_v19 }
 0x3b6   : > { %v1758_v52 = vpop.f32.mrb[39].mxu0 }
 0x3b7   : > { %v2590_v49 = vrot.slane %v2568_v58, %v5950_v43  ;;  %v5958_v9 = vrot.slane %v2569_v54, %v5950_v43  ;;  %v5980_v58 = vsub.s32 2, %v5413_v14  ;;  %v5992_v52 = vrot.slane %v5967_v37, %v5422_v17 }
 0x3b9   : > { %v2598_v18 = vcombine.low %v2576_v39, %v2590_v49  ;;  %v2599_v30 = vcombine.high %v2576_v39, %v2590_v49  ;;  %6667 = vst [vmem:[#allocation63_spill] sm:$0xff] %v5980_v58  ;;  %v5995_v39 = vsub.s32 3, %v5413_v14  ;;  %v6005_v47 = vrot.slane %v5967_v37, %v5980_v58 }
 0x3bb   : > { %v5970_v20 = vrot.slane %v2598_v18, %v5950_v43  ;;  %v5973_v5 = vrot.slane %v2599_v30, %v5950_v43  ;;  %6669 = vst [vmem:[#allocation65_spill] sm:$0xff] %v6005_v47 }
 0x3bd   : > { %6665 = vst [vmem:[#allocation61_spill] sm:$0xff] %v5970_v20  ;;  %6666 = vst [vmem:[#allocation62_spill] sm:$0xff] %v5973_v5  ;;  %v5984_v54 = vcombine.high %v5970_v20, %v5970_v20  ;;  %v5988_v29 = vcombine.high %v5973_v5, %v5973_v5  ;;  %v2637_v49 = vrot.slane %v5970_v20, %v5422_v17 }
 0x3be   : > { %v2641_v18 = vrot.slane %v5970_v20, %v5428_v19  ;;  %v2657_v30 = vrot.slane %v5973_v5, %v5428_v19  ;;  %v2653_v41 = vrot.slane %v5973_v5, %v5422_v17 }
 0x3bf   : > { %6668 = vst [vmem:[#allocation64_spill] sm:$0xff] %v5984_v54  ;;  %v6011_v14 = vrot.slane %v5984_v54, %v5428_v19  ;;  %v6015_v12 = vrot.slane %v5984_v54, %v5422_v17  ;;  %v6019_v7 = vrot.slane %v5988_v29, %v5428_v19  ;;  %v2794_v47 = vadd.f32 %v2637_v49, %v5741_v22 }
 0x3c0   : > { %v2795_v60 = vadd.f32 %v2641_v18, %v5743_v21  ;;  %v2799_v31 = vadd.f32 %v2641_v18, %v5747_v45  ;;  %v2798_v5 = vadd.f32 %v2637_v49, %v5745_v42  ;;  %v2803_v20 = vadd.f32 %v2641_v18, %v5751_v36 }
 0x3c1   : > { %v2807_v58 = vadd.f32 %v2641_v18, %v5755_v61  ;;  %v2802_v32 = vadd.f32 %v2637_v49, %v5749_v50  ;;  %v2806_v54 = vadd.f32 %v2637_v49, %v5753_v53  ;;  %v2944_v21 = vadd.f32 %v5992_v52, %v2794_v47 }
 0x3c2   : > { %v2945_v57 = vadd.f32 %v5977_v46, %v2795_v60  ;;  %v2949_v34 = vadd.f32 %v5977_v46, %v2799_v31  ;;  %v2948_v45 = vadd.f32 %v5992_v52, %v2798_v5  ;;  %v2953_v22 = vadd.f32 %v5977_v46, %v2803_v20 }
 0x3c3   : > { %v2957_v42 = vadd.f32 %v5977_v46, %v2807_v58  ;;  %v2952_v36 = vadd.f32 %v5992_v52, %v2802_v32  ;;  %v2956_v61 = vadd.f32 %v5992_v52, %v2806_v54  ;;  %v3072_v23 = vmax.f32 %v2944_v21, 0.0 }
 0x3c4   : > { %v3073_v18 = vmax.f32 %v2945_v57, 0.0  ;;  %v3077_v50 = vmax.f32 %v2949_v34, 0.0  ;;  %v3076_v53 = vmax.f32 %v2948_v45, 0.0  ;;  %v3081_v49 = vmax.f32 %v2953_v22, 0.0 }
 0x3c5   : > { %v3085_v60 = vmax.f32 %v2957_v42, 0.0  ;;  %v3080_v62 = vmax.f32 %v2952_v36, 0.0  ;;  %v3084_v31 = vmax.f32 %v2956_v61, 0.0  ;;  %v2811_v5 = vadd.f32 %v2657_v30, %v5759_v35 }
 0x3c6   : > { %v3201_v55 = vpack.c.bf16 %v3077_v50, %v3073_v18  ;;  %v3200_v47 = vpack.c.bf16 %v3076_v53, %v3072_v23  ;;  %v2815_v20 = vadd.f32 %v2657_v30, %v5763_v8  ;;  %v2810_v32 = vadd.f32 %v2653_v41, %v5757_v0 }
 0x3c7   : > { %v3205_v10 = vpack.c.bf16 %v3085_v60, %v3081_v49  ;;  %v3204_v58 = vpack.c.bf16 %v3084_v31, %v3080_v62  ;;  %v2814_v54 = vadd.f32 %v2653_v41, %v5761_v4  ;;  %v2961_v34 = vadd.f32 %v5977_v46, %v2811_v5  ;;  %v6670_v62 = vld [vmem:[#allocation15_spill] sm:$0xff]  ;;  %v6673_v5 = vld [vmem:[#allocation16_spill] sm:$0xff] }
 0x3c8   : > { %3559 = vmatprep.mubr.bf16.mxu1 %v3201_v55  ;;  %v2965_v57 = vadd.f32 %v5977_v46, %v2815_v20  ;;  %v2819_v21 = vadd.f32 %v2657_v30, %v5767_v16  ;;  %v2823_v45 = vadd.f32 %v2657_v30, %v5771_v40  ;;  %v2960_v35 = vadd.f32 %v5992_v52, %v2810_v32  ;;  %v6672_v60 = vld [vmem:[#allocation19_spill] sm:$0xff]  ;;  %v6674_v32 = vld [vmem:[#allocation18_spill] sm:$0xff] }
 0x3c9   : > { %3560 = vmatmul.mubr.bf16.vlgmr.msra.gmra.mrb[128].mxu1 %v3200_v47  ;;  %v2964_v8 = vadd.f32 %v5992_v52, %v2814_v54  ;;  %v2818_v23 = vadd.f32 %v2653_v41, %v5765_v13  ;;  %v2822_v0 = vadd.f32 %v2653_v41, %v6670_v62  ;;  %v3089_v4 = vmax.f32 %v2961_v34, 0.0  ;;  %v6676_v62 = vld [vmem:[#allocation20_spill] sm:$0xff] }
 0x3ca   : > { %3567 = vmatprep.mubr.bf16.mxu1 %v3205_v10  ;;  %v3093_v55 = vmax.f32 %v2965_v57, 0.0  ;;  %v2969_v22 = vadd.f32 %v5977_v46, %v2819_v21  ;;  %v2973_v42 = vadd.f32 %v5977_v46, %v2823_v45  ;;  %4541 = vmatpush3.bf16.msra.mxu1 %v5799_v48  ;;  %v3088_v16 = vmax.f32 %v2960_v35, 0.0  ;;  %v6671_v10 = vld [vmem:[#allocation17_spill] sm:$0xff] }
 0x3cb   : > { %v3092_v40 = vmax.f32 %v2964_v8, 0.0  ;;  %v2968_v30 = vadd.f32 %v5992_v52, %v2818_v23  ;;  %v2972_v36 = vadd.f32 %v5992_v52, %v2822_v0  ;;  %4534 = vmatprep.subr.bf16.mxu1 %v5802_v63  ;;  %v2827_v18 = vadd.f32 %v6011_v14, %v6671_v10  ;;  %v6675_v57 = vld [vmem:[#allocation21_spill] sm:$0xff] }
 0x3cc   : > { %v3209_v13 = vpack.c.bf16 %v3093_v55, %v3089_v4  ;;  %v3097_v61 = vmax.f32 %v2969_v22, 0.0  ;;  %v3101_v41 = vmax.f32 %v2973_v42, 0.0  ;;  %v2831_v48 = vadd.f32 %v6011_v14, %v6672_v60 }
 0x3cd   : > { %v3208_v50 = vpack.c.bf16 %v3092_v40, %v3088_v16  ;;  %v3096_v53 = vmax.f32 %v2968_v30, 0.0  ;;  %v3100_v49 = vmax.f32 %v2972_v36, 0.0  ;;  %v2977_v47 = vadd.f32 %v5977_v46, %v2827_v18 }
 0x3ce   : > { %v3213_v31 = vpack.c.bf16 %v3101_v41, %v3097_v61  ;;  %v2826_v20 = vadd.f32 %v6015_v12, %v6673_v5  ;;  %v2830_v63 = vadd.f32 %v6015_v12, %v6674_v32  ;;  %4542 = vmatpush3.bf16.msra.mxu1 %v5811_v2  ;;  %v2981_v34 = vadd.f32 %v5977_v46, %v2831_v48  ;;  %v6679_v48 = vld [vmem:[#allocation22_spill] sm:$0xff]  ;;  %v6680_v5 = vld [vmem:[#allocation23_spill] sm:$0xff]  ;;  %v6681_v32 = vld [vmem:[#allocation24_spill] sm:$0xff] }
 0x3cf   : > { %v6065_v54 = vpack.c.bf16 %v3100_v49, %v3096_v53  ;;  %v2835_v21 = vadd.f32 %v6011_v14, %v6675_v57  ;;  %v2839_v45 = vadd.f32 %v6011_v14, %v5787_v33  ;;  %4535 = vmatprep.subr.bf16.mxu1 %v5816_v59  ;;  %v3105_v35 = vmax.f32 %v2977_v47, 0.0  ;;  %v6678_v53 = vld [vmem:[#allocation26_spill] sm:$0xff] }
 0x3d0   : > { %v2976_v8 = vadd.f32 %v5992_v52, %v2826_v20  ;;  %v2980_v23 = vadd.f32 %v5992_v52, %v2830_v63  ;;  %v2834_v2 = vadd.f32 %v6015_v12, %v6676_v62  ;;  %v3109_v0 = vmax.f32 %v2981_v34, 0.0 }
 0x3d1   : > { %3568 = vmatmul.mubr.bf16.gmra.mrb[132].mxu1 %v3204_v58  ;;  %v2985_v4 = vadd.f32 %v5977_v46, %v2835_v21  ;;  %v2989_v55 = vadd.f32 %v5977_v46, %v2839_v45  ;;  %v2838_v22 = vadd.f32 %v6015_v12, %v5785_v28  ;;  %v2843_v42 = vadd.f32 %v6019_v7, %v5791_v15  ;;  %v6682_v21 = vld [vmem:[#allocation25_spill] sm:$0xff] }
 0x3d2   : > { %3575 = vmatprep.mubr.bf16.mxu1 %v3209_v13  ;;  %v3104_v33 = vmax.f32 %v2976_v8, 0.0  ;;  %v3108_v59 = vmax.f32 %v2980_v23, 0.0  ;;  %v2984_v14 = vadd.f32 %v5992_v52, %v2834_v2  ;;  %4543 = vmatpush3.bf16.msra.mxu1 %v5821_v24  ;;  %v6085_v16 = vpack.c.bf16 %v3109_v0, %v3105_v35 }
 0x3d3   : > { %v3113_v58 = vmax.f32 %v2985_v4, 0.0  ;;  %v3117_v40 = vmax.f32 %v2989_v55, 0.0  ;;  %v2988_v30 = vadd.f32 %v5992_v52, %v2838_v22  ;;  %4536 = vmatprep.subr.bf16.mxu1 %v5855_v11  ;;  %v2847_v12 = vadd.f32 %v6019_v7, %v5797_v25 }
 0x3d4   : > { %v6089_v36 = vpack.c.bf16 %v3108_v59, %v3104_v33  ;;  %v3112_v28 = vmax.f32 %v2984_v14, 0.0  ;;  %v2993_v13 = vadd.f32 %v5977_v46, %v2843_v42  ;;  %v6677_v15 = vcombine.low %v5954_v51, %v5958_v9  ;;  %v6683_v59 = vld [vmem:[#allocation29_spill] sm:$0xff] }
 0x3d5   : > { %v6100_v61 = vpack.c.bf16 %v3117_v40, %v3113_v58  ;;  %v3116_v41 = vmax.f32 %v2988_v30, 0.0  ;;  %v2685_v11 = vrot.slane %v5988_v29, %v5422_v17  ;;  %v2997_v10 = vadd.f32 %v5977_v46, %v2847_v12  ;;  %v6685_v30 = vld [vmem:[#allocation31_spill] sm:$0xff]  ;;  %v6686_v12 = vld [vmem:[#allocation33_spill] sm:$0xff] }
 0x3d6   : > { %v6098_v24 = vrot.slane %v6677_v15, %v5950_v43  ;;  %v3121_v18 = vmax.f32 %v2993_v13, 0.0  ;;  %v2851_v25 = vadd.f32 %v6019_v7, %v5808_v6  ;;  %v2855_v49 = vadd.f32 %v6019_v7, %v6678_v53  ;;  %4544 = vmatpush3.bf16.msra.mxu1 %v5857_v38  ;;  %v6688_v15 = vld [vmem:[#allocation28_spill] sm:$0xff] }
 0x3d7   : > { %v6110_v60 = vpack.c.bf16 %v3116_v41, %v3112_v28  ;;  %v2842_v47 = vadd.f32 %v2685_v11, %v6679_v48  ;;  %v2846_v20 = vadd.f32 %v2685_v11, %v6680_v5  ;;  %v2850_v63 = vadd.f32 %v2685_v11, %v6681_v32  ;;  %4537 = vmatprep.subr.bf16.mxu1 %v5880_v3 }
 0x3d8   : > { %v3125_v34 = vmax.f32 %v2997_v10, 0.0  ;;  %v3001_v57 = vadd.f32 %v5977_v46, %v2851_v25  ;;  %v3005_v6 = vadd.f32 %v5977_v46, %v2855_v49  ;;  %v2854_v45 = vadd.f32 %v2685_v11, %v6682_v21  ;;  %v6689_v11 = vld [vmem:[#allocation30_spill] sm:$0xff]  ;;  %v6690_v49 = vld [vmem:[#allocation32_spill] sm:$0xff] }
 0x3d9   : > { %3576 = vmatmul.mubr.bf16.gmra.mrb[136].mxu1 %v3208_v50  ;;  %v2992_v38 = vadd.f32 %v5992_v52, %v2842_v47  ;;  %v2996_v7 = vadd.f32 %v5992_v52, %v2846_v20  ;;  %v3000_v35 = vadd.f32 %v5992_v52, %v2850_v63  ;;  %v2705_v8 = vrot.slane %v6098_v24, %v5428_v19 }
 0x3da   : > { %3583 = vmatprep.mubr.bf16.mxu1 %v3213_v31  ;;  %v6124_v23 = vpack.c.bf16 %v3125_v34, %v3121_v18  ;;  %v3129_v3 = vmax.f32 %v3001_v57, 0.0  ;;  %v3133_v62 = vmax.f32 %v3005_v6, 0.0  ;;  %v3004_v2 = vadd.f32 %v5992_v52, %v2854_v45  ;;  %4545 = vmatpush3.bf16.msra.mxu1 %v5882_v44  ;;  %v6691_v57 = vld [vmem:[#allocation58_spill] sm:$0xff]  ;;  %v6692_v45 = vld [vmem:[#allocation35_spill] sm:$0xff] }
 0x3db   : > { %v3120_v0 = vmax.f32 %v2992_v38, 0.0  ;;  %v3124_v50 = vmax.f32 %v2996_v7, 0.0  ;;  %v3128_v4 = vmax.f32 %v3000_v35, 0.0  ;;  %v2859_v55 = vadd.f32 %v2705_v8, %v5828_v1  ;;  %4538 = vmatprep.subr.bf16.mxu1 %v5906_v56  ;;  %v6693_v7 = vld [vmem:[#allocation59_spill] sm:$0xff] }
 0x3dc   : > { %v6132_v22 = vrot.slane %v5967_v37, %v5995_v39  ;;  %v6134_v31 = vpack.c.bf16 %v3133_v62, %v3129_v3  ;;  %v3132_v33 = vmax.f32 %v3004_v2, 0.0  ;;  %v2863_v14 = vadd.f32 %v2705_v8, %v6683_v59  ;;  %v6694_v3 = vld [vmem:[#allocation37_spill] sm:$0xff]  ;;  %v6695_v59 = vld [vmem:[#allocation39_spill] sm:$0xff] }
 0x3dd   : > { %v6684_v44 = vcombine.high %v5954_v51, %v5958_v9  ;;  %v6143_v58 = vpack.c.bf16 %v3124_v50, %v3120_v0  ;;  %v3009_v1 = vadd.f32 %v5977_v46, %v2859_v55  ;;  %v2701_v56 = vrot.slane %v6098_v24, %v5422_v17 }
 0x3de   : > { %v6148_v37 = vpack.c.bf16 %v3132_v33, %v3128_v4  ;;  %v3013_v40 = vadd.f32 %v5977_v46, %v2863_v14  ;;  %v2867_v28 = vadd.f32 %v2705_v8, %v6685_v30  ;;  %v2871_v13 = vadd.f32 %v2705_v8, %v6686_v12  ;;  %4546 = vmatpush3.bf16.msra.mxu1 %v5908_v27  ;;  %v6698_v30 = vld [vmem:[#allocation34_spill] sm:$0xff]  ;;  %v6699_v12 = vld [vmem:[#allocation36_spill] sm:$0xff] }
 0x3df   : > { %v6141_v42 = vrot.slane %v6684_v44, %v5950_v43  ;;  %v3137_v51 = vmax.f32 %v3009_v1, 0.0  ;;  %v6687_v43 = vld [vmem:[#allocation27_spill] sm:$0xff]  ;;  %v2862_v41 = vadd.f32 %v2701_v56, %v6688_v15  ;;  %v2866_v10 = vadd.f32 %v2701_v56, %v6689_v11  ;;  %4539 = vmatprep.subr.bf16.mxu1 %v5926_v26  ;;  %v6696_v44 = vld [vmem:[#allocation41_spill] sm:$0xff]  ;;  %v6701_v11 = vld [vmem:[#allocation40_spill] sm:$0xff] }
 0x3e0   : > { %v2858_v9 = vadd.f32 %v2701_v56, %v6687_v43  ;;  %v3141_v18 = vmax.f32 %v3013_v40, 0.0  ;;  %v3017_v25 = vadd.f32 %v5977_v46, %v2867_v28  ;;  %v3021_v53 = vadd.f32 %v5977_v46, %v2871_v13 }
 0x3e1   : > { %v2870_v48 = vadd.f32 %v2701_v56, %v6690_v49  ;;  %3584 = vmatmul.mubr.bf16.gmra.mrb[140].mxu1 %v6065_v54  ;;  %v3012_v47 = vadd.f32 %v5992_v52, %v2862_v41  ;;  %v3016_v5 = vadd.f32 %v5992_v52, %v2866_v10  ;;  %v2721_v20 = vrot.slane %v6141_v42, %v5428_v19  ;;  %v6697_v56 = vld [vmem:[#allocation60_spill] sm:$0xff] }
 0x3e2   : > { %v3008_v27 = vadd.f32 %v5992_v52, %v2858_v9  ;;  %3591 = vmatprep.mubr.bf16.mxu1 %v6085_v16  ;;  %v6168_v26 = vpack.c.bf16 %v3141_v18, %v3137_v51  ;;  %v3145_v32 = vmax.f32 %v3017_v25, 0.0  ;;  %v3149_v63 = vmax.f32 %v3021_v53, 0.0  ;;  %4547 = vmatpush3.bf16.msra.mxu1 %v6691_v57  ;;  %v6700_v51 = vld [vmem:[#allocation38_spill] sm:$0xff]  ;;  %v6703_v57 = vld [vmem:[#allocation63_spill] sm:$0xff] }
 0x3e3   : > { %v3020_v34 = vadd.f32 %v5992_v52, %v2870_v48  ;;  %v3140_v6 = vmax.f32 %v3012_v47, 0.0  ;;  %v3144_v21 = vmax.f32 %v3016_v5, 0.0  ;;  %v2875_v38 = vadd.f32 %v2721_v20, %v6692_v45  ;;  %4540 = vmatprep.subr.bf16.mxu1 %v6693_v7 }
 0x3e4   : > { %v3136_v54 = vmax.f32 %v3008_v27, 0.0  ;;  %v6176_v35 = vcombine.high %v6098_v24, %v6098_v24  ;;  %v6178_v16 = vpack.c.bf16 %v3149_v63, %v3145_v32  ;;  %v2879_v62 = vadd.f32 %v2721_v20, %v6694_v3  ;;  %v6702_v63 = vld [vmem:[#allocation43_spill] sm:$0xff] }
 0x3e5   : > { %v3148_v8 = vmax.f32 %v3020_v34, 0.0  ;;  %v6183_v2 = vcombine.high %v6141_v42, %v6141_v42  ;;  %v3025_v50 = vadd.f32 %v5977_v46, %v2875_v38  ;;  %v2717_v4 = vrot.slane %v6141_v42, %v5422_v17  ;;  %v6705_v38 = vld [vmem:[#allocation45_spill] sm:$0xff] }
 0x3e6   : > { %v6185_v0 = vpack.c.bf16 %v3140_v6, %v3136_v54  ;;  %v3029_v33 = vadd.f32 %v5977_v46, %v2879_v62  ;;  %v2883_v14 = vadd.f32 %v2721_v20, %v6695_v59  ;;  %v2887_v1 = vadd.f32 %v2721_v20, %v6696_v44  ;;  %4548 = vmatpush3.bf16.msra.mxu1 %v6697_v56  ;;  %v6704_v54 = vld [vmem:[#allocation61_spill] sm:$0xff]  ;;  %v6708_v56 = vld [vmem:[#allocation42_spill] sm:$0xff] }
 0x3e7   : > { %v6190_v55 = vpack.c.bf16 %v3148_v8, %v3144_v21  ;;  %v3153_v40 = vmax.f32 %v3025_v50, 0.0  ;;  %v2874_v28 = vadd.f32 %v2717_v4, %v6698_v30  ;;  %v2878_v13 = vadd.f32 %v2717_v4, %v6699_v12  ;;  %v6709_v30 = vld [vmem:[#allocation44_spill] sm:$0xff]  ;;  %v6710_v12 = vld [vmem:[#allocation46_spill] sm:$0xff] }
 0x3e8   : > { %v2882_v43 = vadd.f32 %v2717_v4, %v6700_v51  ;;  %v3157_v9 = vmax.f32 %v3029_v33, 0.0  ;;  %v3033_v15 = vadd.f32 %v5977_v46, %v2883_v14  ;;  %v3037_v41 = vadd.f32 %v5977_v46, %v2887_v1  ;;  %v6706_v33 = vld [vmem:[#allocation47_spill] sm:$0xff]  ;;  %v6707_v14 = vld [vmem:[#allocation49_spill] sm:$0xff] }
 0x3e9   : > { %v2886_v10 = vadd.f32 %v2717_v4, %v6701_v11  ;;  %3592 = vmatmul.mubr.bf16.gmra.mrb[144].mxu1 %v6089_v36  ;;  %v3024_v18 = vadd.f32 %v5992_v52, %v2874_v28  ;;  %v3028_v25 = vadd.f32 %v5992_v52, %v2878_v13  ;;  %v2737_v49 = vrot.slane %v6176_v35, %v5428_v19 }
 0x3ea   : > { %v3032_v53 = vadd.f32 %v5992_v52, %v2882_v43  ;;  %3599 = vmatprep.mubr.bf16.mxu1 %v6100_v61  ;;  %v6209_v48 = vpack.c.bf16 %v3157_v9, %v3153_v40  ;;  %v3161_v27 = vmax.f32 %v3033_v15, 0.0  ;;  %v3165_v47 = vmax.f32 %v3037_v41, 0.0  ;;  %v6711_v15 = vld [vmem:[#allocation48_spill] sm:$0xff] }
 0x3eb   : > { %v3036_v5 = vadd.f32 %v5992_v52, %v2886_v10  ;;  %v3152_v20 = vmax.f32 %v3024_v18, 0.0  ;;  %v3156_v32 = vmax.f32 %v3028_v25, 0.0  ;;  %v2891_v34 = vadd.f32 %v2737_v49, %v6702_v63 }
 0x3ec   : > { %v3160_v36 = vmax.f32 %v3032_v53, 0.0  ;;  %v6215_v6 = vrot.slane %v6704_v54, %v6703_v57  ;;  %v6217_v21 = vpack.c.bf16 %v3165_v47, %v3161_v27  ;;  %v2895_v61 = vadd.f32 %v2737_v49, %v6705_v38  ;;  %v6713_v38 = vld [vmem:[#allocation53_spill] sm:$0xff] }
 0x3ed   : > { %v3164_v45 = vmax.f32 %v3036_v5, 0.0  ;;  %v6222_v7 = vrot.slane %v6704_v54, %v5995_v39  ;;  %v6224_v8 = vpack.c.bf16 %v3156_v32, %v3152_v20  ;;  %v3041_v3 = vadd.f32 %v5977_v46, %v2891_v34 }
 0x3ee   : > { %v2733_v62 = vrot.slane %v6176_v35, %v5422_v17  ;;  %v3045_v4 = vadd.f32 %v5977_v46, %v2895_v61  ;;  %v2899_v59 = vadd.f32 %v2737_v49, %v6706_v33  ;;  %v2903_v44 = vadd.f32 %v2737_v49, %v6707_v14  ;;  %v6714_v33 = vld [vmem:[#allocation65_spill] sm:$0xff] }
 0x3ef   : > { %v6229_v50 = vpack.c.bf16 %v3164_v45, %v3160_v36  ;;  %v3169_v1 = vmax.f32 %v3041_v3, 0.0  ;;  %v2753_v25 = vrot.slane %v6183_v2, %v5428_v19  ;;  %v6712_v36 = vld [vmem:[#allocation51_spill] sm:$0xff] }
 0x3f0   : > { %v2890_v40 = vadd.f32 %v2733_v62, %v6708_v56  ;;  %v2894_v28 = vadd.f32 %v2733_v62, %v6709_v30  ;;  %v2898_v13 = vadd.f32 %v2733_v62, %v6710_v12  ;;  %v3173_v51 = vmax.f32 %v3045_v4, 0.0 }
 0x3f1   : > { %v3049_v43 = vadd.f32 %v5977_v46, %v2899_v59  ;;  %v3053_v9 = vadd.f32 %v5977_v46, %v2903_v44  ;;  %v2902_v41 = vadd.f32 %v2733_v62, %v6711_v15  ;;  %3600 = vmatmul.mubr.bf16.gmra.mrb[148].mxu1 %v6110_v60  ;;  %v2907_v63 = vadd.f32 %v2753_v25, %v6712_v36 }
 0x3f2   : > { %v3040_v11 = vadd.f32 %v5992_v52, %v2890_v40  ;;  %v3044_v10 = vadd.f32 %v5992_v52, %v2894_v28  ;;  %v3048_v18 = vadd.f32 %v5992_v52, %v2898_v13  ;;  %3607 = vmatprep.mubr.bf16.mxu1 %v6124_v23  ;;  %v6247_v53 = vpack.c.bf16 %v3173_v51, %v3169_v1 }
 0x3f3   : > { %v3177_v49 = vmax.f32 %v3049_v43, 0.0  ;;  %v3181_v27 = vmax.f32 %v3053_v9, 0.0  ;;  %v3052_v47 = vadd.f32 %v5992_v52, %v2902_v41  ;;  %v2403_v5 = vpop.f32.mrb[40].mxu0  ;;  %v2911_v23 = vadd.f32 %v2753_v25, %v6713_v38  ;;  %v6715_v41 = vld [vmem:[#allocation55_spill] sm:$0xff] }
 0x3f4   : > { %v3168_v20 = vmax.f32 %v3040_v11, 0.0  ;;  %v3172_v60 = vmax.f32 %v3044_v10, 0.0  ;;  %v3176_v32 = vmax.f32 %v3048_v18, 0.0  ;;  %v2796_v34 = vadd.f32 %v6215_v6, %v2403_v5  ;;  %v2405_v54 = vpop.f32.mrb[41].mxu0  ;;  %v6716_v10 = vld [vmem:[#allocation57_spill] sm:$0xff] }
 0x3f5   : > { %v6252_v45 = vpack.c.bf16 %v3181_v27, %v3177_v49  ;;  %v3180_v19 = vmax.f32 %v3052_v47, 0.0  ;;  %v2797_v61 = vadd.f32 %v6222_v7, %v2405_v54  ;;  %v2407_v3 = vpop.f32.mrb[42].mxu0  ;;  %v3057_v4 = vadd.f32 %v5977_v46, %v2907_v63  ;;  %v6717_v47 = vld [vmem:[#allocation50_spill] sm:$0xff] }
 0x3f6   : > { %v6256_v62 = vpack.c.bf16 %v3172_v60, %v3168_v20  ;;  %v2946_v59 = vadd.f32 %v6714_v33, %v2796_v34  ;;  %v2800_v14 = vadd.f32 %v6215_v6, %v2407_v3  ;;  %v2409_v44 = vpop.f32.mrb[43].mxu0  ;;  %v3061_v56 = vadd.f32 %v5977_v46, %v2911_v23  ;;  %v6718_v20 = vld [vmem:[#allocation52_spill] sm:$0xff] }
 0x3f7   : > { %v6261_v1 = vpack.c.bf16 %v3180_v19, %v3176_v32  ;;  %v2947_v40 = vadd.f32 %v6132_v22, %v2797_v61  ;;  %v2801_v30 = vadd.f32 %v6222_v7, %v2409_v44  ;;  %v3185_v28 = vmax.f32 %v3057_v4, 0.0 }
 0x3f8   : > { %v3074_v12 = vmax.f32 %v2946_v59, 0.0  ;;  %v2950_v13 = vadd.f32 %v6714_v33, %v2800_v14  ;;  %v3189_v51 = vmax.f32 %v3061_v56, 0.0  ;;  %v2749_v43 = vrot.slane %v6183_v2, %v5422_v17 }
 0x3f9   : > { %v3075_v9 = vmax.f32 %v2947_v40, 0.0  ;;  %v2951_v15 = vadd.f32 %v6132_v22, %v2801_v30  ;;  %3608 = vmatmul.mubr.bf16.gmra.mrb[152].mxu1 %v6143_v58  ;;  %v2915_v11 = vadd.f32 %v2753_v25, %v6715_v41  ;;  %v2919_v18 = vadd.f32 %v2753_v25, %v6716_v10  ;;  %v6719_v58 = vld [vmem:[#allocation54_spill] sm:$0xff] }
 0x3fa   : > { %v3078_v49 = vmax.f32 %v2950_v13, 0.0  ;;  %3615 = vmatprep.mubr.bf16.mxu1 %v6134_v31  ;;  %v6274_v27 = vpack.c.bf16 %v3189_v51, %v3185_v28  ;;  %v2906_v5 = vadd.f32 %v2749_v43, %v6717_v47  ;;  %v2910_v60 = vadd.f32 %v2749_v43, %v6718_v20  ;;  %v6720_v13 = vld [vmem:[#allocation56_spill] sm:$0xff] }
 0x3fb   : > { %v3079_v32 = vmax.f32 %v2951_v15, 0.0  ;;  %v2413_v17 = vpop.f32.mrb[44].mxu0  ;;  %v3065_v36 = vadd.f32 %v5977_v46, %v2915_v11  ;;  %v3069_v63 = vadd.f32 %v5977_v46, %v2919_v18  ;;  %v2914_v34 = vadd.f32 %v2749_v43, %v6719_v58  ;;  %v6721_v18 = vld [vmem:[#allocation62_spill] sm:$0xff] }
 0x3fc   : > { %v3202_v54 = vpack.c.bf16 %v3078_v49, %v3074_v12  ;;  %v2804_v25 = vadd.f32 %v6215_v6, %v2413_v17  ;;  %v2415_v19 = vpop.f32.mrb[45].mxu0  ;;  %v3056_v31 = vadd.f32 %v5992_v52, %v2906_v5  ;;  %v3060_v38 = vadd.f32 %v5992_v52, %v2910_v60 }
 0x3fd   : > { %v2805_v23 = vadd.f32 %v6222_v7, %v2415_v19  ;;  %v2417_v61 = vpop.f32.mrb[46].mxu0  ;;  %v3203_v3 = vpack.c.bf16 %v3079_v32, %v3075_v9  ;;  %v3193_v4 = vmax.f32 %v3065_v36, 0.0  ;;  %v3197_v59 = vmax.f32 %v3069_v63, 0.0 }
 0x3fe   : > { %v2954_v14 = vadd.f32 %v6714_v33, %v2804_v25  ;;  %v2808_v46 = vadd.f32 %v6215_v6, %v2417_v61  ;;  %v2419_v44 = vpop.f32.mrb[47].mxu0  ;;  %v3184_v56 = vmax.f32 %v3056_v31, 0.0  ;;  %v3188_v40 = vmax.f32 %v3060_v38, 0.0 }
 0x3ff   : > { %v2955_v30 = vadd.f32 %v6132_v22, %v2805_v23  ;;  %v2809_v28 = vadd.f32 %v6222_v7, %v2419_v44  ;;  %3720 = vmatprep.mubr.bf16.mxu0 %v3203_v3  ;;  %v6289_v12 = vpack.c.bf16 %v3197_v59, %v3193_v4  ;;  %v2918_v51 = vadd.f32 %v2749_v43, %v6720_v13 }
 0x400   : > { %v2958_v9 = vadd.f32 %v6714_v33, %v2808_v46  ;;  %3721 = vmatmul.mubr.bf16.vlgmr.msra.gmra.mrb[104].mxu0 %v3202_v54  ;;  %v6293_v15 = vpack.c.bf16 %v3188_v40, %v3184_v56  ;;  %v3064_v41 = vadd.f32 %v5992_v52, %v2914_v34  ;;  %v3082_v10 = vmax.f32 %v2954_v14, 0.0 }
 0x401   : > { %v2959_v6 = vadd.f32 %v6132_v22, %v2809_v28  ;;  %3616 = vmatmul.mubr.bf16.gmra.mrb[156].mxu1 %v6148_v37  ;;  %v3068_v11 = vadd.f32 %v5992_v52, %v2918_v51  ;;  %v2661_v43 = vrot.slane %v6721_v18, %v6703_v57  ;;  %v3083_v47 = vmax.f32 %v2955_v30, 0.0 }
 0x402   : > { %v3086_v7 = vmax.f32 %v2958_v9, 0.0  ;;  %3623 = vmatprep.mubr.bf16.mxu1 %v6168_v26  ;;  %v3192_v49 = vmax.f32 %v3064_v41, 0.0  ;;  %v2665_v60 = vrot.slane %v6721_v18, %v5995_v39 }
 0x403   : > { %v3087_v5 = vmax.f32 %v2959_v6, 0.0  ;;  %v2423_v20 = vpop.f32.mrb[48].mxu0  ;;  %v3196_v32 = vmax.f32 %v3068_v11, 0.0 }
 0x404   : > { %v2812_v17 = vadd.f32 %v2661_v43, %v2423_v20  ;;  %v2425_v36 = vpop.f32.mrb[49].mxu0  ;;  %v3206_v37 = vpack.c.bf16 %v3086_v7, %v3082_v10  ;;  %v6722_v7 = vld [vmem:[#allocation64_spill] sm:$0xff] }
 0x405   : > { %v2813_v63 = vadd.f32 %v2665_v60, %v2425_v36  ;;  %v2427_v52 = vpop.f32.mrb[50].mxu0  ;;  %v3207_v58 = vpack.c.bf16 %v3087_v5, %v3083_v47  ;;  %v6304_v34 = vpack.c.bf16 %v3196_v32, %v3192_v49  ;;  %v2677_v18 = vrot.slane %v6722_v7, %v6703_v57 }
 0x406   : > { %v2962_v26 = vadd.f32 %v6714_v33, %v2812_v17  ;;  %v2816_v54 = vadd.f32 %v2661_v43, %v2427_v52  ;;  %v2429_v25 = vpop.f32.mrb[51].mxu0  ;;  %v2681_v5 = vrot.slane %v6722_v7, %v5995_v39 }
 0x407   : > { %v2963_v19 = vadd.f32 %v6132_v22, %v2813_v63  ;;  %v2817_v31 = vadd.f32 %v2665_v60, %v2429_v25  ;;  %3728 = vmatprep.mubr.bf16.mxu0 %v3207_v58 }
 0x408   : > { %v2966_v38 = vadd.f32 %v6714_v33, %v2816_v54  ;;  %3729 = vmatmul.mubr.bf16.gmra.mrb[108].mxu0 %v3206_v37  ;;  %v3090_v61 = vmax.f32 %v2962_v26, 0.0 }
 0x409   : > { %v2967_v23 = vadd.f32 %v6132_v22, %v2817_v31  ;;  %3624 = vmatmul.mubr.bf16.gmra.mrb[160].mxu1 %v6185_v0  ;;  %v3091_v4 = vmax.f32 %v2963_v19, 0.0 }
 0x40a   : > { %v3094_v3 = vmax.f32 %v2966_v38, 0.0  ;;  %3631 = vmatprep.mubr.bf16.mxu1 %v6178_v16 }
 0x40b   : > { %v3095_v59 = vmax.f32 %v2967_v23, 0.0  ;;  %v2433_v14 = vpop.f32.mrb[52].mxu0 }
 0x40c   : > { %v2820_v46 = vadd.f32 %v2661_v43, %v2433_v14  ;;  %v2435_v44 = vpop.f32.mrb[53].mxu0  ;;  %v3210_v56 = vpack.c.bf16 %v3094_v3, %v3090_v61 }
 0x40d   : > { %v2821_v40 = vadd.f32 %v2665_v60, %v2435_v44  ;;  %v2437_v30 = vpop.f32.mrb[54].mxu0  ;;  %v3211_v28 = vpack.c.bf16 %v3095_v59, %v3091_v4 }
 0x40e   : > { %v2970_v13 = vadd.f32 %v6714_v33, %v2820_v46  ;;  %v2824_v51 = vadd.f32 %v2661_v43, %v2437_v30  ;;  %v2439_v9 = vpop.f32.mrb[55].mxu0 }
 0x40f   : > { %v2971_v41 = vadd.f32 %v6132_v22, %v2821_v40  ;;  %v2825_v0 = vadd.f32 %v2665_v60, %v2439_v9  ;;  %3736 = vmatprep.mubr.bf16.mxu0 %v3211_v28  ;;  %v2693_v9 = vrot.slane %v5988_v29, %v6703_v57 }
 0x410   : > { %v2974_v6 = vadd.f32 %v6714_v33, %v2824_v51  ;;  %3737 = vmatmul.mubr.bf16.gmra.mrb[112].mxu0 %v3210_v56  ;;  %v3098_v11 = vmax.f32 %v2970_v13, 0.0 }
 0x411   : > { %v2975_v16 = vadd.f32 %v6132_v22, %v2825_v0  ;;  %3632 = vmatmul.mubr.bf16.gmra.mrb[164].mxu1 %v6190_v55  ;;  %v3099_v43 = vmax.f32 %v2971_v41, 0.0 }
 0x412   : > { %v3102_v10 = vmax.f32 %v2974_v6, 0.0  ;;  %3639 = vmatprep.mubr.bf16.mxu1 %v6209_v48 }
 0x413   : > { %v3103_v49 = vmax.f32 %v2975_v16, 0.0  ;;  %v2443_v47 = vpop.f32.mrb[56].mxu0  ;;  %v2697_v16 = vrot.slane %v5988_v29, %v5995_v39 }
 0x414   : > { %v2828_v20 = vadd.f32 %v2677_v18, %v2443_v47  ;;  %v2445_v60 = vpop.f32.mrb[57].mxu0  ;;  %v3214_v32 = vpack.c.bf16 %v3102_v10, %v3098_v11 }
 0x415   : > { %v2829_v17 = vadd.f32 %v2681_v5, %v2445_v60  ;;  %v2447_v36 = vpop.f32.mrb[58].mxu0  ;;  %v3215_v37 = vpack.c.bf16 %v3103_v49, %v3099_v43 }
 0x416   : > { %v2978_v55 = vadd.f32 %v6714_v33, %v2828_v20  ;;  %v2832_v63 = vadd.f32 %v2677_v18, %v2447_v36  ;;  %v2449_v52 = vpop.f32.mrb[59].mxu0 }
 0x417   : > { %v2979_v48 = vadd.f32 %v6132_v22, %v2829_v17  ;;  %v2833_v58 = vadd.f32 %v2681_v5, %v2449_v52  ;;  %3744 = vmatprep.mubr.bf16.mxu0 %v3215_v37 }
 0x418   : > { %v2982_v26 = vadd.f32 %v6714_v33, %v2832_v63  ;;  %3745 = vmatmul.mubr.bf16.gmra.mrb[116].mxu0 %v3214_v32  ;;  %v3106_v25 = vmax.f32 %v2978_v55, 0.0 }
 0x419   : > { %v2983_v54 = vadd.f32 %v6132_v22, %v2833_v58  ;;  %3640 = vmatmul.mubr.bf16.gmra.mrb[168].mxu1 %v6224_v8  ;;  %v3107_v31 = vmax.f32 %v2979_v48, 0.0 }
 0x41a   : > { %v3110_v19 = vmax.f32 %v2982_v26, 0.0  ;;  %3647 = vmatprep.mubr.bf16.mxu1 %v6217_v21 }
 0x41b   : > { %v3111_v38 = vmax.f32 %v2983_v54, 0.0  ;;  %v2453_v23 = vpop.f32.mrb[60].mxu0 }
 0x41c   : > { %v2836_v61 = vadd.f32 %v2677_v18, %v2453_v23  ;;  %v2455_v3 = vpop.f32.mrb[61].mxu0  ;;  %v3218_v4 = vpack.c.bf16 %v3110_v19, %v3106_v25 }
 0x41d   : > { %v2837_v59 = vadd.f32 %v2681_v5, %v2455_v3  ;;  %v2457_v14 = vpop.f32.mrb[62].mxu0  ;;  %v3219_v46 = vpack.c.bf16 %v3111_v38, %v3107_v31 }
 0x41e   : > { %v2986_v44 = vadd.f32 %v6714_v33, %v2836_v61  ;;  %v2840_v56 = vadd.f32 %v2677_v18, %v2457_v14  ;;  %v2459_v40 = vpop.f32.mrb[63].mxu0 }
 0x41f   : > { %v2987_v30 = vadd.f32 %v6132_v22, %v2837_v59  ;;  %v2841_v8 = vadd.f32 %v2681_v5, %v2459_v40  ;;  %3752 = vmatprep.mubr.bf16.mxu0 %v3219_v46 }
 0x420   : > { %v2990_v28 = vadd.f32 %v6714_v33, %v2840_v56  ;;  %3753 = vmatmul.mubr.bf16.gmra.mrb[120].mxu0 %v3218_v4  ;;  %v3114_v13 = vmax.f32 %v2986_v44, 0.0  ;;  %v2709_v4 = vrot.slane %v6098_v24, %v6703_v57  ;;  %v2713_v44 = vrot.slane %v6098_v24, %v5995_v39 }
 0x421   : > { %v2991_v21 = vadd.f32 %v6132_v22, %v2841_v8  ;;  %3648 = vmatmul.mubr.bf16.gmra.mrb[172].mxu1 %v6229_v50  ;;  %v3115_v41 = vmax.f32 %v2987_v30, 0.0 }
 0x422   : > { %v3118_v51 = vmax.f32 %v2990_v28, 0.0  ;;  %3655 = vmatprep.mubr.bf16.mxu1 %v6247_v53 }
 0x423   : > { %v3119_v0 = vmax.f32 %v2991_v21, 0.0  ;;  %v2463_v6 = vpop.f32.mrb[64].mxu0 }
 0x424   : > { %v2844_v11 = vadd.f32 %v2693_v9, %v2463_v6  ;;  %v2465_v10 = vpop.f32.mrb[65].mxu0  ;;  %v3222_v7 = vpack.c.bf16 %v3118_v51, %v3114_v13 }
 0x425   : > { %v2845_v18 = vadd.f32 %v2697_v16, %v2465_v10  ;;  %v2467_v43 = vpop.f32.mrb[66].mxu0  ;;  %v3223_v49 = vpack.c.bf16 %v3119_v0, %v3115_v41 }
 0x426   : > { %v2994_v50 = vadd.f32 %v6714_v33, %v2844_v11  ;;  %v2848_v47 = vadd.f32 %v2693_v9, %v2467_v43  ;;  %v2469_v5 = vpop.f32.mrb[67].mxu0 }
 0x427   : > { %v2995_v53 = vadd.f32 %v6132_v22, %v2845_v18  ;;  %v2849_v20 = vadd.f32 %v2697_v16, %v2469_v5  ;;  %3760 = vmatprep.mubr.bf16.mxu0 %v3223_v49 }
 0x428   : > { %v2998_v60 = vadd.f32 %v6714_v33, %v2848_v47  ;;  %3761 = vmatmul.mubr.bf16.gmra.mrb[124].mxu0 %v3222_v7  ;;  %v3122_v29 = vmax.f32 %v2994_v50, 0.0 }
 0x429   : > { %v2999_v32 = vadd.f32 %v6132_v22, %v2849_v20  ;;  %3656 = vmatmul.mubr.bf16.gmra.mrb[176].mxu1 %v6256_v62  ;;  %v3123_v36 = vmax.f32 %v2995_v53, 0.0 }
 0x42a   : > { %v3126_v17 = vmax.f32 %v2998_v60, 0.0  ;;  %3663 = vmatprep.mubr.bf16.mxu1 %v6252_v45 }
 0x42b   : > { %v3127_v37 = vmax.f32 %v2999_v32, 0.0  ;;  %v2473_v55 = vpop.f32.mrb[68].mxu0 }
 0x42c   : > { %v2852_v63 = vadd.f32 %v2693_v9, %v2473_v55  ;;  %v2475_v52 = vpop.f32.mrb[69].mxu0  ;;  %v3226_v48 = vpack.c.bf16 %v3126_v17, %v3122_v29 }
 0x42d   : > { %v2853_v58 = vadd.f32 %v2697_v16, %v2475_v52  ;;  %v2477_v26 = vpop.f32.mrb[70].mxu0  ;;  %v3227_v54 = vpack.c.bf16 %v3127_v37, %v3123_v36  ;;  %v2725_v36 = vrot.slane %v6141_v42, %v6703_v57  ;;  %v2729_v52 = vrot.slane %v6141_v42, %v5995_v39 }
 0x42e   : > { %v3002_v25 = vadd.f32 %v6714_v33, %v2852_v63  ;;  %v2856_v19 = vadd.f32 %v2693_v9, %v2477_v26  ;;  %v2479_v31 = vpop.f32.mrb[71].mxu0 }
 0x42f   : > { %v3003_v38 = vadd.f32 %v6132_v22, %v2853_v58  ;;  %v2857_v62 = vadd.f32 %v2697_v16, %v2479_v31  ;;  %3768 = vmatprep.mubr.bf16.mxu0 %v3227_v54 }
 0x430   : > { %v3006_v23 = vadd.f32 %v6714_v33, %v2856_v19  ;;  %3769 = vmatmul.mubr.bf16.gmra.mrb[128].mxu0 %v3226_v48  ;;  %v3130_v61 = vmax.f32 %v3002_v25, 0.0 }
 0x431   : > { %v3007_v45 = vadd.f32 %v6132_v22, %v2857_v62  ;;  %3664 = vmatmul.mubr.bf16.gmra.mrb[180].mxu1 %v6261_v1  ;;  %v3131_v59 = vmax.f32 %v3003_v38, 0.0 }
 0x432   : > { %v3134_v3 = vmax.f32 %v3006_v23, 0.0  ;;  %3671 = vmatprep.mubr.bf16.mxu1 %v6274_v27 }
 0x433   : > { %v3135_v14 = vmax.f32 %v3007_v45, 0.0  ;;  %v2483_v46 = vpop.f32.mrb[72].mxu0 }
 0x434   : > { %v2860_v56 = vadd.f32 %v2709_v4, %v2483_v46  ;;  %v2485_v40 = vpop.f32.mrb[73].mxu0  ;;  %v3230_v30 = vpack.c.bf16 %v3134_v3, %v3130_v61 }
 0x435   : > { %v2861_v8 = vadd.f32 %v2713_v44, %v2485_v40  ;;  %v2487_v28 = vpop.f32.mrb[74].mxu0  ;;  %v3231_v21 = vpack.c.bf16 %v3135_v14, %v3131_v59 }
 0x436   : > { %v3010_v1 = vadd.f32 %v6714_v33, %v2860_v56  ;;  %v2864_v13 = vadd.f32 %v2709_v4, %v2487_v28  ;;  %v2489_v51 = vpop.f32.mrb[75].mxu0 }
 0x437   : > { %v3011_v27 = vadd.f32 %v6132_v22, %v2861_v8  ;;  %v2865_v9 = vadd.f32 %v2713_v44, %v2489_v51  ;;  %3776 = vmatprep.mubr.bf16.mxu0 %v3231_v21 }
 0x438   : > { %v3014_v41 = vadd.f32 %v6714_v33, %v2864_v13  ;;  %3777 = vmatmul.mubr.bf16.gmra.mrb[132].mxu0 %v3230_v30  ;;  %v3138_v24 = vmax.f32 %v3010_v1, 0.0 }
 0x439   : > { %v3015_v0 = vadd.f32 %v6132_v22, %v2865_v9  ;;  %3672 = vmatmul.mubr.bf16.gmra.mrb[184].mxu1 %v6293_v15  ;;  %v3139_v16 = vmax.f32 %v3011_v27, 0.0 }
 0x43a   : > { %v3142_v6 = vmax.f32 %v3014_v41, 0.0  ;;  %3679 = vmatprep.mubr.bf16.mxu1 %v6289_v12 }
 0x43b   : > { %v3143_v11 = vmax.f32 %v3015_v0, 0.0  ;;  %v2493_v10 = vpop.f32.mrb[76].mxu0 }
 0x43c   : > { %v2868_v7 = vadd.f32 %v2709_v4, %v2493_v10  ;;  %v2495_v18 = vpop.f32.mrb[77].mxu0  ;;  %v3234_v43 = vpack.c.bf16 %v3142_v6, %v3138_v24  ;;  %v2741_v24 = vrot.slane %v6176_v35, %v6703_v57  ;;  %v2745_v10 = vrot.slane %v6176_v35, %v5995_v39 }
 0x43d   : > { %v2869_v49 = vadd.f32 %v2713_v44, %v2495_v18  ;;  %v2497_v50 = vpop.f32.mrb[78].mxu0  ;;  %v3235_v47 = vpack.c.bf16 %v3143_v11, %v3139_v16 }
 0x43e   : > { %v3018_v5 = vadd.f32 %v6714_v33, %v2868_v7  ;;  %v2872_v53 = vadd.f32 %v2709_v4, %v2497_v50  ;;  %v2499_v20 = vpop.f32.mrb[79].mxu0 }
 0x43f   : > { %v3019_v60 = vadd.f32 %v6132_v22, %v2869_v49  ;;  %v2873_v15 = vadd.f32 %v2713_v44, %v2499_v20  ;;  %3784 = vmatprep.mubr.bf16.mxu0 %v3235_v47 }
 0x440   : > { %v3022_v32 = vadd.f32 %v6714_v33, %v2872_v53  ;;  %3785 = vmatmul.mubr.bf16.gmra.mrb[136].mxu0 %v3234_v43  ;;  %v3146_v29 = vmax.f32 %v3018_v5, 0.0 }
 0x441   : > { %v3023_v12 = vadd.f32 %v6132_v22, %v2873_v15  ;;  %3680 = vmatmul.mubr.bf16.gmra.mrb[188].mxu1 %v6304_v34  ;;  %v3147_v37 = vmax.f32 %v3019_v60, 0.0 }
 0x442   : > { %v3150_v17 = vmax.f32 %v3022_v32, 0.0 }
 0x443   : > { %v3151_v55 = vmax.f32 %v3023_v12, 0.0  ;;  %v2503_v63 = vpop.f32.mrb[80].mxu0 }
 0x444   : > { %v2876_v48 = vadd.f32 %v2725_v36, %v2503_v63  ;;  %v2505_v58 = vpop.f32.mrb[81].mxu0  ;;  %v3238_v26 = vpack.c.bf16 %v3150_v17, %v3146_v29 }
 0x445   : > { %v2877_v54 = vadd.f32 %v2729_v52, %v2505_v58  ;;  %v2507_v25 = vpop.f32.mrb[82].mxu0  ;;  %v3239_v19 = vpack.c.bf16 %v3151_v55, %v3147_v37 }
 0x446   : > { %v3026_v31 = vadd.f32 %v6714_v33, %v2876_v48  ;;  %v2880_v34 = vadd.f32 %v2725_v36, %v2507_v25  ;;  %v2509_v38 = vpop.f32.mrb[83].mxu0 }
 0x447   : > { %v3027_v62 = vadd.f32 %v6132_v22, %v2877_v54  ;;  %v2881_v23 = vadd.f32 %v2729_v52, %v2509_v38  ;;  %3792 = vmatprep.mubr.bf16.mxu0 %v3239_v19 }
 0x448   : > { %v3030_v45 = vadd.f32 %v6714_v33, %v2880_v34  ;;  %3793 = vmatmul.mubr.bf16.gmra.mrb[140].mxu0 %v3238_v26  ;;  %v3154_v42 = vmax.f32 %v3026_v31, 0.0 }
 0x449   : > { %v3031_v61 = vadd.f32 %v6132_v22, %v2881_v23  ;;  %v3155_v4 = vmax.f32 %v3027_v62, 0.0 }
 0x44a   : > { %v3158_v3 = vmax.f32 %v3030_v45, 0.0 }
 0x44b   : > { %v3159_v59 = vmax.f32 %v3031_v61, 0.0  ;;  %v2513_v14 = vpop.f32.mrb[84].mxu0  ;;  %v2757_v61 = vrot.slane %v6183_v2, %v6703_v57 }
 0x44c   : > { %v2884_v46 = vadd.f32 %v2725_v36, %v2513_v14  ;;  %v2515_v44 = vpop.f32.mrb[85].mxu0  ;;  %v3242_v56 = vpack.c.bf16 %v3158_v3, %v3154_v42 }
 0x44d   : > { %v2885_v40 = vadd.f32 %v2729_v52, %v2515_v44  ;;  %v2517_v30 = vpop.f32.mrb[86].mxu0  ;;  %v3243_v8 = vpack.c.bf16 %v3159_v59, %v3155_v4  ;;  %v2761_v59 = vrot.slane %v6183_v2, %v5995_v39 }
 0x44e   : > { %v3034_v28 = vadd.f32 %v6714_v33, %v2884_v46  ;;  %v2888_v21 = vadd.f32 %v2725_v36, %v2517_v30  ;;  %v2519_v1 = vpop.f32.mrb[87].mxu0 }
 0x44f   : > { %v3035_v13 = vadd.f32 %v6132_v22, %v2885_v40  ;;  %v2889_v51 = vadd.f32 %v2729_v52, %v2519_v1  ;;  %3800 = vmatprep.mubr.bf16.mxu0 %v3243_v8 }
 0x450   : > { %v3038_v27 = vadd.f32 %v6714_v33, %v2888_v21  ;;  %3801 = vmatmul.mubr.bf16.gmra.mrb[144].mxu0 %v3242_v56  ;;  %v3162_v41 = vmax.f32 %v3034_v28, 0.0 }
 0x451   : > { %v3039_v9 = vadd.f32 %v6132_v22, %v2889_v51  ;;  %v3163_v6 = vmax.f32 %v3035_v13, 0.0 }
 0x452   : > { %v3166_v0 = vmax.f32 %v3038_v27, 0.0 }
 0x453   : > { %v3167_v16 = vmax.f32 %v3039_v9, 0.0  ;;  %v2523_v11 = vpop.f32.mrb[88].mxu0 }
 0x454   : > { %v2892_v7 = vadd.f32 %v2741_v24, %v2523_v11  ;;  %v2525_v18 = vpop.f32.mrb[89].mxu0  ;;  %v3246_v43 = vpack.c.bf16 %v3166_v0, %v3162_v41 }
 0x455   : > { %v2893_v49 = vadd.f32 %v2745_v10, %v2525_v18  ;;  %v2527_v50 = vpop.f32.mrb[90].mxu0  ;;  %v3247_v47 = vpack.c.bf16 %v3167_v16, %v3163_v6 }
 0x456   : > { %v3042_v5 = vadd.f32 %v6714_v33, %v2892_v7  ;;  %v2896_v53 = vadd.f32 %v2741_v24, %v2527_v50  ;;  %v2529_v20 = vpop.f32.mrb[91].mxu0 }
 0x457   : > { %v3043_v60 = vadd.f32 %v6132_v22, %v2893_v49  ;;  %v2897_v15 = vadd.f32 %v2745_v10, %v2529_v20  ;;  %3808 = vmatprep.mubr.bf16.mxu0 %v3247_v47 }
 0x458   : > { %v3046_v32 = vadd.f32 %v6714_v33, %v2896_v53  ;;  %3809 = vmatmul.mubr.bf16.gmra.mrb[148].mxu0 %v3246_v43  ;;  %v3170_v35 = vmax.f32 %v3042_v5, 0.0 }
 0x459   : > { %v3047_v12 = vadd.f32 %v6132_v22, %v2897_v15  ;;  %v3171_v17 = vmax.f32 %v3043_v60, 0.0 }
 0x45a   : > { %v3174_v29 = vmax.f32 %v3046_v32, 0.0 }
 0x45b   : > { %v3175_v36 = vmax.f32 %v3047_v12, 0.0  ;;  %v2533_v37 = vpop.f32.mrb[92].mxu0 }
 0x45c   : > { %v2900_v55 = vadd.f32 %v2741_v24, %v2533_v37  ;;  %v2535_v63 = vpop.f32.mrb[93].mxu0  ;;  %v3250_v52 = vpack.c.bf16 %v3174_v29, %v3170_v35 }
 0x45d   : > { %v2901_v48 = vadd.f32 %v2745_v10, %v2535_v63  ;;  %v2537_v58 = vpop.f32.mrb[94].mxu0  ;;  %v3251_v26 = vpack.c.bf16 %v3175_v36, %v3171_v17 }
 0x45e   : > { %v3050_v54 = vadd.f32 %v6714_v33, %v2900_v55  ;;  %v2904_v25 = vadd.f32 %v2741_v24, %v2537_v58  ;;  %v2539_v19 = vpop.f32.mrb[95].mxu0 }
 0x45f   : > { %v3051_v31 = vadd.f32 %v6132_v22, %v2901_v48  ;;  %v2905_v34 = vadd.f32 %v2745_v10, %v2539_v19  ;;  %3816 = vmatprep.mubr.bf16.mxu0 %v3251_v26 }
 0x460   : > { %v3054_v38 = vadd.f32 %v6714_v33, %v2904_v25  ;;  %3817 = vmatmul.mubr.bf16.gmra.mrb[152].mxu0 %v3250_v52  ;;  %v3178_v23 = vmax.f32 %v3050_v54, 0.0 }
 0x461   : > { %v3055_v62 = vadd.f32 %v6132_v22, %v2905_v34  ;;  %v3179_v42 = vmax.f32 %v3051_v31, 0.0 }
 0x462   : > { %v3182_v45 = vmax.f32 %v3054_v38, 0.0 }
 0x463   : > { %v3183_v3 = vmax.f32 %v3055_v62, 0.0  ;;  %v2543_v4 = vpop.f32.mrb[96].mxu0 }
 0x464   : > { %v2908_v14 = vadd.f32 %v2757_v61, %v2543_v4  ;;  %v2545_v46 = vpop.f32.mrb[97].mxu0  ;;  %v3254_v44 = vpack.c.bf16 %v3182_v45, %v3178_v23 }
 0x465   : > { %v2909_v56 = vadd.f32 %v2761_v59, %v2545_v46  ;;  %v2547_v40 = vpop.f32.mrb[98].mxu0  ;;  %v3255_v30 = vpack.c.bf16 %v3183_v3, %v3179_v42 }
 0x466   : > { %v3058_v8 = vadd.f32 %v6714_v33, %v2908_v14  ;;  %v2912_v28 = vadd.f32 %v2757_v61, %v2547_v40  ;;  %v2549_v21 = vpop.f32.mrb[99].mxu0 }
 0x467   : > { %v3059_v1 = vadd.f32 %v6132_v22, %v2909_v56  ;;  %v2913_v13 = vadd.f32 %v2761_v59, %v2549_v21  ;;  %3824 = vmatprep.mubr.bf16.mxu0 %v3255_v30 }
 0x468   : > { %v3062_v57 = vadd.f32 %v6714_v33, %v2912_v28  ;;  %3825 = vmatmul.mubr.bf16.gmra.mrb[156].mxu0 %v3254_v44  ;;  %v3186_v39 = vmax.f32 %v3058_v8, 0.0 }
 0x469   : > { %v3063_v51 = vadd.f32 %v6132_v22, %v2913_v13  ;;  %v3187_v27 = vmax.f32 %v3059_v1, 0.0 }
 0x46a   : > { %v3190_v2 = vmax.f32 %v3062_v57, 0.0 }
 0x46b   : > { %v3191_v9 = vmax.f32 %v3063_v51, 0.0  ;;  %v2553_v41 = vpop.f32.mrb[100].mxu0 }
 0x46c   : > { %v3258_v0 = vpack.c.bf16 %v3190_v2, %v3186_v39  ;;  %v2916_v24 = vadd.f32 %v2757_v61, %v2553_v41  ;;  %v2555_v6 = vpop.f32.mrb[101].mxu0 }
 0x46d   : > { %v2917_v16 = vadd.f32 %v2761_v59, %v2555_v6  ;;  %v2557_v11 = vpop.f32.mrb[102].mxu0  ;;  %v3259_v10 = vpack.c.bf16 %v3191_v9, %v3187_v27  ;;  %v6424_v27 = vld [vmem:[%s6585_s9] ss:$0 sm:$0xff] }
 0x46e   : > { %v3066_v7 = vadd.f32 %v6714_v33, %v2916_v24  ;;  %v2920_v18 = vadd.f32 %v2757_v61, %v2557_v11  ;;  %v2559_v43 = vpop.f32.mrb[103].mxu0 }
 0x46f   : > { %v3067_v49 = vadd.f32 %v6132_v22, %v2917_v16  ;;  %v2921_v50 = vadd.f32 %v2761_v59, %v2559_v43  ;;  %3832 = vmatprep.mubr.bf16.mxu1 %v3259_v10 }
 0x470   : > { %v3070_v47 = vadd.f32 %v6714_v33, %v2920_v18  ;;  %3833 = vmatmul.mubr.bf16.vlgmr.msra.gmra.mrb[192].mxu1 %v3258_v0  ;;  %v3194_v53 = vmax.f32 %v3066_v7, 0.0 }
 0x471   : > { %v3071_v5 = vadd.f32 %v6132_v22, %v2921_v50  ;;  %v3195_v60 = vmax.f32 %v3067_v49, 0.0 }
 0x472   : > { %v3198_v20 = vmax.f32 %v3070_v47, 0.0 }
 0x473   : > { %v3199_v15 = vmax.f32 %v3071_v5, 0.0 }
 0x474   : > { %v3262_v32 = vpack.c.bf16 %v3198_v20, %v3194_v53 }
 0x475   : > { %v3263_v12 = vpack.c.bf16 %v3199_v15, %v3195_v60 }
 0x477   : > { %3840 = vmatprep.mubr.bf16.mxu1 %v3263_v12 }
 0x478   : > { %3841 = vmatmul.mubr.bf16.gmra.mrb[196].mxu1 %v3262_v32 }
 0x49c   : > { %v4291_v35 = vpop.f32.mrb[128].mxu1 }
 0x49d   : > { %v4292_v29 = vpop.f32.mrb[129].mxu1 }
 0x49e   : > { %v4293_v17 = vadd.f32 %v4292_v29, %v4291_v35  ;;  %v4294_v36 = vpop.f32.mrb[130].mxu1 }
 0x49f   : > { %v4295_v37 = vpop.f32.mrb[131].mxu1 }
 0x4a0   : > { %v4296_v55 = vadd.f32 %v4295_v37, %v4294_v36  ;;  %v3562_v24 = vadd.f32 %v4293_v17, %v6424_v27 }
 0x4a2   : > { %v3565_v43 = vadd.f32 %v4296_v55, %v6424_v27 }
 0x4a4   : > { %v4297_v63 = vpop.f32.mrb[132].mxu1 }
 0x4a5   : > { %v4298_v52 = vpop.f32.mrb[133].mxu1 }
 0x4a6   : > { %v4299_v33 = vadd.f32 %v4298_v52, %v4297_v63  ;;  %v4300_v48 = vpop.f32.mrb[134].mxu1 }
 0x4a7   : > { %v4301_v58 = vpop.f32.mrb[135].mxu1 }
 0x4a8   : > { %v4302_v22 = vadd.f32 %v4301_v58, %v4300_v48  ;;  %v3570_v12 = vadd.f32 %v4299_v33, %v6424_v27 }
 0x4aa   : > { %v3573_v55 = vadd.f32 %v4302_v22, %v6424_v27 }
 0x4ac   : > { %v4303_v26 = vpop.f32.mrb[136].mxu1 }
 0x4ad   : > { %v4304_v54 = vpop.f32.mrb[137].mxu1 }
 0x4ae   : > { %v6401_v25 = vadd.f32 %v4304_v54, %v4303_v26  ;;  %v4306_v19 = vpop.f32.mrb[138].mxu1 }
 0x4af   : > { %v4307_v31 = vpop.f32.mrb[139].mxu1 }
 0x4b0   : > { %v6403_v34 = vadd.f32 %v4307_v31, %v4306_v19 }
 0x4b4   : > { %v4309_v38 = vpop.f32.mrb[140].mxu1 }
 0x4b5   : > { %v4310_v62 = vpop.f32.mrb[141].mxu1 }
 0x4b6   : > { %v6405_v23 = vadd.f32 %v4310_v62, %v4309_v38  ;;  %v4312_v45 = vpop.f32.mrb[142].mxu1 }
 0x4b7   : > { %v4313_v61 = vpop.f32.mrb[143].mxu1 }
 0x4b8   : > { %v6407_v42 = vadd.f32 %v4313_v61, %v4312_v45  ;;  %v3578_v45 = vadd.f32 %v6401_v25, %v6424_v27 }
 0x4bc   : > { %v4315_v3 = vpop.f32.mrb[144].mxu1 }
 0x4bd   : > { %v4316_v4 = vpop.f32.mrb[145].mxu1 }
 0x4be   : > { %v6409_v59 = vadd.f32 %v4316_v4, %v4315_v3  ;;  %v4318_v14 = vpop.f32.mrb[146].mxu1 }
 0x4bf   : > { %v4319_v46 = vpop.f32.mrb[147].mxu1 }
 0x4c0   : > { %v6411_v44 = vadd.f32 %v4319_v46, %v4318_v14 }
 0x4c4   : > { %v4321_v56 = vpop.f32.mrb[148].mxu1 }
 0x4c5   : > { %v4322_v40 = vpop.f32.mrb[149].mxu1 }
 0x4c6   : > { %v6413_v30 = vadd.f32 %v4322_v40, %v4321_v56  ;;  %v4324_v8 = vpop.f32.mrb[150].mxu1  ;;  %v3581_v56 = vadd.f32 %v6403_v34, %v6424_v27 }
 0x4c7   : > { %v4325_v28 = vpop.f32.mrb[151].mxu1 }
 0x4c8   : > { %v6415_v21 = vadd.f32 %v4325_v28, %v4324_v8 }
 0x4cc   : > { %v4327_v1 = vpop.f32.mrb[152].mxu1 }
 0x4cd   : > { %v4328_v13 = vpop.f32.mrb[153].mxu1 }
 0x4ce   : > { %v6417_v57 = vadd.f32 %v4328_v13, %v4327_v1  ;;  %v4330_v51 = vpop.f32.mrb[154].mxu1 }
 0x4cf   : > { %v4331_v39 = vpop.f32.mrb[155].mxu1 }
 0x4d0   : > { %v6419_v2 = vadd.f32 %v4331_v39, %v4330_v51 }
 0x4d3   : > { %v4403_v9 = vpop.f32.mrb[104].mxu0 }
 0x4d4   : > { %v4333_v41 = vpop.f32.mrb[156].mxu1  ;;  %v4404_v0 = vpop.f32.mrb[105].mxu0 }
 0x4d5   : > { %v4334_v6 = vpop.f32.mrb[157].mxu1  ;;  %v4405_v16 = vadd.f32 %v4404_v0, %v4403_v9  ;;  %v4406_v11 = vpop.f32.mrb[106].mxu0  ;;  %v3586_v0 = vadd.f32 %v6405_v23, %v6424_v27 }
 0x4d6   : > { %v6427_v10 = vadd.f32 %v4334_v6, %v4333_v41  ;;  %v4336_v7 = vpop.f32.mrb[158].mxu1  ;;  %v4407_v18 = vpop.f32.mrb[107].mxu0 }
 0x4d7   : > { %v3723_v49 = vadd.f32 %v4405_v16, %v3562_v24  ;;  %v4337_v50 = vpop.f32.mrb[159].mxu1  ;;  %v4408_v47 = vadd.f32 %v4407_v18, %v4406_v11  ;;  %v3589_v18 = vadd.f32 %v6407_v42, %v6424_v27 }
 0x4d8   : > { %v6430_v5 = vadd.f32 %v4337_v50, %v4336_v7 }
 0x4d9   : > { %v3726_v53 = vadd.f32 %v4408_v47, %v3565_v43 }
 0x4db   : > { %v3849_v20 = vmax.f32 %v3723_v49, %v3726_v53  ;;  %v4409_v60 = vpop.f32.mrb[108].mxu0 }
 0x4dc   : > { %v4339_v15 = vpop.f32.mrb[160].mxu1  ;;  %v4410_v32 = vpop.f32.mrb[109].mxu0 }
 0x4dd   : > { %v4340_v35 = vpop.f32.mrb[161].mxu1  ;;  %v4411_v29 = vadd.f32 %v4410_v32, %v4409_v60  ;;  %v4412_v17 = vpop.f32.mrb[110].mxu0 }
 0x4de   : > { %v6433_v36 = vadd.f32 %v4340_v35, %v4339_v15  ;;  %v4342_v37 = vpop.f32.mrb[162].mxu1  ;;  %v4413_v63 = vpop.f32.mrb[111].mxu0 }
 0x4df   : > { %v3731_v52 = vadd.f32 %v4411_v29, %v3570_v12  ;;  %v4343_v48 = vpop.f32.mrb[163].mxu1  ;;  %v4414_v58 = vadd.f32 %v4413_v63, %v4412_v17  ;;  %v3594_v29 = vadd.f32 %v6409_v59, %v6424_v27 }
 0x4e0   : > { %v6436_v26 = vadd.f32 %v4343_v48, %v4342_v37 }
 0x4e1   : > { %v3850_v54 = vmax.f32 %v3849_v20, %v3731_v52  ;;  %v3734_v19 = vadd.f32 %v4414_v58, %v3573_v55  ;;  %v3597_v55 = vadd.f32 %v6411_v44, %v6424_v27  ;;  %v3602_v44 = vadd.f32 %v6413_v30, %v6424_v27 }
 0x4e3   : > { %v3851_v31 = vmax.f32 %v3850_v54, %v3734_v19  ;;  %v4415_v38 = vpop.f32.mrb[112].mxu0 }
 0x4e4   : > { %v4345_v62 = vpop.f32.mrb[164].mxu1  ;;  %v4416_v33 = vpop.f32.mrb[113].mxu0 }
 0x4e5   : > { %v4346_v61 = vpop.f32.mrb[165].mxu1  ;;  %v4417_v3 = vadd.f32 %v4416_v33, %v4415_v38  ;;  %v4418_v4 = vpop.f32.mrb[114].mxu0  ;;  %v3852_v51 = vrot.slane %v3851_v31, 4 }
 0x4e6   : > { %v6440_v14 = vadd.f32 %v4346_v61, %v4345_v62  ;;  %v4348_v22 = vpop.f32.mrb[166].mxu1  ;;  %v4419_v46 = vpop.f32.mrb[115].mxu0 }
 0x4e7   : > { %v3739_v40 = vadd.f32 %v4417_v3, %v3578_v45  ;;  %v4349_v8 = vpop.f32.mrb[167].mxu1  ;;  %v4420_v28 = vadd.f32 %v4419_v46, %v4418_v4  ;;  %v3853_v43 = vmax.f32 %v3851_v31, %v3852_v51  ;;  %v3605_v51 = vadd.f32 %v6415_v21, %v6424_v27 }
 0x4e8   : > { %v6444_v1 = vadd.f32 %v4349_v8, %v4348_v22  ;;  %v3610_v21 = vadd.f32 %v6417_v57, %v6424_v27 }
 0x4e9   : > { %v3742_v13 = vadd.f32 %v4420_v28, %v3581_v56  ;;  %v3854_v15 = vrot.slane %v3853_v43, 2 }
 0x4eb   : > { %v3858_v39 = vmax.f32 %v3739_v40, %v3742_v13  ;;  %v4421_v9 = vpop.f32.mrb[116].mxu0  ;;  %v3855_v54 = vmax.f32 %v3853_v43, %v3854_v15 }
 0x4ec   : > { %v4351_v25 = vpop.f32.mrb[168].mxu1  ;;  %v4422_v41 = vpop.f32.mrb[117].mxu0 }
 0x4ed   : > { %v4352_v24 = vpop.f32.mrb[169].mxu1  ;;  %v4423_v6 = vadd.f32 %v4422_v41, %v4421_v9  ;;  %v4424_v16 = vpop.f32.mrb[118].mxu0  ;;  %v3856_v61 = vrot.slane %v3855_v54, 1 }
 0x4ee   : > { %v6448_v11 = vadd.f32 %v4352_v24, %v4351_v25  ;;  %v4354_v34 = vpop.f32.mrb[170].mxu1  ;;  %v4425_v7 = vpop.f32.mrb[119].mxu0 }
 0x4ef   : > { %v3747_v49 = vadd.f32 %v4423_v6, %v3586_v0  ;;  %v4355_v50 = vpop.f32.mrb[171].mxu1  ;;  %v4426_v47 = vadd.f32 %v4425_v7, %v4424_v16  ;;  %v3857_v41 = vmax.f32 %v3855_v54, %v3856_v61 }
 0x4f0   : > { %v6452_v53 = vadd.f32 %v4355_v50, %v4354_v34 }
 0x4f1   : > { %v3859_v20 = vmax.f32 %v3858_v39, %v3747_v49  ;;  %v3750_v60 = vadd.f32 %v4426_v47, %v3589_v18 }
 0x4f3   : > { %v3860_v23 = vmax.f32 %v3859_v20, %v3750_v60  ;;  %v4427_v32 = vpop.f32.mrb[120].mxu0 }
 0x4f4   : > { %v4357_v12 = vpop.f32.mrb[172].mxu1  ;;  %v4428_v35 = vpop.f32.mrb[121].mxu0 }
 0x4f5   : > { %v3861_v17 = vrot.slane %v3860_v23, 4  ;;  %v4358_v37 = vpop.f32.mrb[173].mxu1  ;;  %v4429_v63 = vadd.f32 %v4428_v35, %v4427_v32  ;;  %v4430_v42 = vpop.f32.mrb[122].mxu0 }
 0x4f6   : > { %v6458_v52 = vadd.f32 %v4358_v37, %v4357_v12  ;;  %v4360_v48 = vpop.f32.mrb[174].mxu1  ;;  %v4431_v58 = vpop.f32.mrb[123].mxu0 }
 0x4f7   : > { %v3862_v19 = vmax.f32 %v3860_v23, %v3861_v17  ;;  %v3755_v31 = vadd.f32 %v4429_v63, %v3594_v29  ;;  %v4361_v38 = vpop.f32.mrb[175].mxu1  ;;  %v4432_v62 = vadd.f32 %v4431_v58, %v4430_v42  ;;  %v3613_v29 = vadd.f32 %v6419_v2, %v6424_v27 }
 0x4f8   : > { %v6460_v33 = vadd.f32 %v4361_v38, %v4360_v48 }
 0x4f9   : > { %v3863_v45 = vrot.slane %v3862_v19, 2  ;;  %v3758_v59 = vadd.f32 %v4432_v62, %v3597_v55  ;;  %v3618_v62 = vadd.f32 %v6427_v10, %v6424_v27 }
 0x4fb   : > { %v3864_v3 = vmax.f32 %v3862_v19, %v3863_v45  ;;  %v3867_v4 = vmax.f32 %v3755_v31, %v3758_v59  ;;  %v4433_v22 = vpop.f32.mrb[124].mxu0 }
 0x4fc   : > { %v4363_v46 = vpop.f32.mrb[176].mxu1  ;;  %v4434_v56 = vpop.f32.mrb[125].mxu0 }
 0x4fd   : > { %v3865_v40 = vrot.slane %v3864_v3, 1  ;;  %v4364_v8 = vpop.f32.mrb[177].mxu1  ;;  %v4435_v28 = vadd.f32 %v4434_v56, %v4433_v22  ;;  %v4436_v13 = vpop.f32.mrb[126].mxu0 }
 0x4fe   : > { %v6466_v39 = vadd.f32 %v4364_v8, %v4363_v46  ;;  %v4366_v9 = vpop.f32.mrb[178].mxu1  ;;  %v4437_v25 = vpop.f32.mrb[127].mxu0  ;;  %v3621_v46 = vadd.f32 %v6430_v5, %v6424_v27 }
 0x4ff   : > { %v3866_v0 = vmax.f32 %v3864_v3, %v3865_v40  ;;  %v3763_v24 = vadd.f32 %v4435_v28, %v3602_v44  ;;  %v4367_v6 = vpop.f32.mrb[179].mxu1  ;;  %v4438_v16 = vadd.f32 %v4437_v25, %v4436_v13 }
 0x500   : > { %v6468_v34 = vadd.f32 %v4367_v6, %v4366_v9 }
 0x501   : > { %v3929_v30 = vsel %vm1333_vm3, %v3866_v0, %v3857_v41  ;;  %v3868_v7 = vmax.f32 %v3867_v4, %v3763_v24  ;;  %v3766_v18 = vadd.f32 %v4438_v16, %v3605_v51  ;;  %v3626_v24 = vadd.f32 %v6433_v36, %v6424_v27 }
 0x503   : > { %v3869_v43 = vmax.f32 %v3868_v7, %v3766_v18  ;;  %v4439_v49 = vpop.f32.mrb[128].mxu0 }
 0x504   : > { %v4369_v50 = vpop.f32.mrb[180].mxu1  ;;  %v4440_v47 = vpop.f32.mrb[129].mxu0 }
 0x505   : > { %v3870_v20 = vrot.slane %v3869_v43, 4  ;;  %v4370_v60 = vpop.f32.mrb[181].mxu1  ;;  %v4441_v15 = vadd.f32 %v4440_v47, %v4439_v49  ;;  %v4442_v23 = vpop.f32.mrb[130].mxu0 }
 0x506   : > { %v6473_v32 = vadd.f32 %v4370_v60, %v4369_v50  ;;  %v4372_v12 = vpop.f32.mrb[182].mxu1  ;;  %v4443_v35 = vpop.f32.mrb[131].mxu0 }
 0x507   : > { %v3871_v17 = vmax.f32 %v3869_v43, %v3870_v20  ;;  %v3771_v37 = vadd.f32 %v4441_v15, %v3610_v21  ;;  %v4373_v63 = vpop.f32.mrb[183].mxu1  ;;  %v4444_v42 = vadd.f32 %v4443_v35, %v4442_v23 }
 0x508   : > { %v6477_v55 = vadd.f32 %v4373_v63, %v4372_v12 }
 0x509   : > { %v3872_v48 = vrot.slane %v3871_v17, 2  ;;  %v3774_v58 = vadd.f32 %v4444_v42, %v3613_v29 }
 0x50b   : > { %v3873_v57 = vmax.f32 %v3871_v17, %v3872_v48  ;;  %v3876_v54 = vmax.f32 %v3771_v37, %v3774_v58  ;;  %v4445_v19 = vpop.f32.mrb[132].mxu0  ;;  %v3634_v17 = vadd.f32 %v6440_v14, %v6424_v27  ;;  %v3642_v14 = vadd.f32 %v6448_v11, %v6424_v27 }
 0x50c   : > { %v4375_v31 = vpop.f32.mrb[184].mxu1  ;;  %v4446_v38 = vpop.f32.mrb[133].mxu0 }
 0x50d   : > { %v3874_v45 = vrot.slane %v3873_v57, 1  ;;  %v4376_v59 = vpop.f32.mrb[185].mxu1  ;;  %v4447_v61 = vadd.f32 %v4446_v38, %v4445_v19  ;;  %v4448_v2 = vpop.f32.mrb[134].mxu0 }
 0x50e   : > { %v6481_v3 = vadd.f32 %v4376_v59, %v4375_v31  ;;  %v4378_v4 = vpop.f32.mrb[186].mxu1  ;;  %v4449_v22 = vpop.f32.mrb[135].mxu0 }
 0x50f   : > { %v3875_v56 = vmax.f32 %v3873_v57, %v3874_v45  ;;  %v3779_v44 = vadd.f32 %v4447_v61, %v3618_v62  ;;  %v4379_v40 = vpop.f32.mrb[187].mxu1  ;;  %v4450_v8 = vadd.f32 %v4449_v22, %v4448_v2 }
 0x510   : > { %v6485_v28 = vadd.f32 %v4379_v40, %v4378_v4 }
 0x511   : > { %v3930_v13 = vsel %vm1335_vm4, %v3875_v56, %v3929_v30  ;;  %v3877_v10 = vmax.f32 %v3876_v54, %v3779_v44  ;;  %v3782_v51 = vadd.f32 %v4450_v8, %v3621_v46  ;;  %v3629_v30 = vadd.f32 %v6436_v26, %v6424_v27 }
 0x512   : > { %v3637_v26 = vadd.f32 %v6444_v1, %v6424_v27  ;;  %v3645_v1 = vadd.f32 %v6452_v53, %v6424_v27 }
 0x513   : > { %v3878_v9 = vmax.f32 %v3877_v10, %v3782_v51  ;;  %v4451_v25 = vpop.f32.mrb[136].mxu0 }
 0x514   : > { %v4381_v41 = vpop.f32.mrb[188].mxu1  ;;  %v4452_v0 = vpop.f32.mrb[137].mxu0 }
 0x515   : > { %v3879_v6 = vrot.slane %v3878_v9, 4  ;;  %v4382_v16 = vpop.f32.mrb[189].mxu1  ;;  %v4453_v5 = vadd.f32 %v4452_v0, %v4451_v25  ;;  %v4454_v7 = vpop.f32.mrb[138].mxu0  ;;  %v3650_v25 = vadd.f32 %v6458_v52, %v6424_v27  ;;  %v3658_v52 = vadd.f32 %v6466_v39, %v6424_v27 }
 0x516   : > { %v6490_v18 = vadd.f32 %v4382_v16, %v4381_v41  ;;  %v4384_v43 = vpop.f32.mrb[190].mxu1  ;;  %v4455_v49 = vpop.f32.mrb[139].mxu0 }
 0x517   : > { %v3880_v50 = vmax.f32 %v3878_v9, %v3879_v6  ;;  %v3787_v47 = vadd.f32 %v4453_v5, %v3626_v24  ;;  %v4385_v21 = vpop.f32.mrb[191].mxu1  ;;  %v4456_v20 = vadd.f32 %v4455_v49, %v4454_v7  ;;  %v3653_v6 = vadd.f32 %v6460_v33, %v6424_v27 }
 0x518   : > { %v6494_v60 = vadd.f32 %v4385_v21, %v4384_v43  ;;  %v3661_v33 = vadd.f32 %v6468_v34, %v6424_v27 }
 0x519   : > { %v3881_v15 = vrot.slane %v3880_v50, 2  ;;  %v3790_v23 = vadd.f32 %v4456_v20, %v3629_v30 }
 0x51b   : > { %v3882_v36 = vmax.f32 %v3880_v50, %v3881_v15  ;;  %v3885_v12 = vmax.f32 %v3787_v47, %v3790_v23  ;;  %v4457_v35 = vpop.f32.mrb[140].mxu0 }
 0x51c   : > { %v4458_v29 = vpop.f32.mrb[141].mxu0 }
 0x51d   : > { %v3883_v37 = vrot.slane %v3882_v36, 1  ;;  %v4459_v63 = vadd.f32 %v4458_v29, %v4457_v35  ;;  %v4460_v42 = vpop.f32.mrb[142].mxu0 }
 0x51e   : > { %v4461_v48 = vpop.f32.mrb[143].mxu0 }
 0x51f   : > { %v3884_v58 = vmax.f32 %v3882_v36, %v3883_v37  ;;  %v3795_v57 = vadd.f32 %v4459_v63, %v3634_v17  ;;  %v4462_v54 = vadd.f32 %v4461_v48, %v4460_v42 }
 0x521   : > { %v3931_v19 = vsel %vm1337_vm5, %v3884_v58, %v3930_v13  ;;  %v3886_v31 = vmax.f32 %v3885_v12, %v3795_v57  ;;  %v3798_v38 = vadd.f32 %v4462_v54, %v3637_v26  ;;  %v3666_v26 = vadd.f32 %v6473_v32, %v6424_v27 }
 0x522   : > { %v3674_v32 = vadd.f32 %v6481_v3, %v6424_v27  ;;  %v3682_v3 = vadd.f32 %v6490_v18, %v6424_v27 }
 0x523   : > { %v3887_v62 = vmax.f32 %v3886_v31, %v3798_v38  ;;  %v4463_v45 = vpop.f32.mrb[144].mxu0 }
 0x524   : > { %v4464_v59 = vpop.f32.mrb[145].mxu0 }
 0x525   : > { %v3888_v61 = vrot.slane %v3887_v62, 4  ;;  %v4465_v2 = vadd.f32 %v4464_v59, %v4463_v45  ;;  %v4466_v4 = vpop.f32.mrb[146].mxu0 }
 0x526   : > { %v4467_v22 = vpop.f32.mrb[147].mxu0 }
 0x527   : > { %v3889_v46 = vmax.f32 %v3887_v62, %v3888_v61  ;;  %v3803_v56 = vadd.f32 %v4465_v2, %v3642_v14  ;;  %v4468_v44 = vadd.f32 %v4467_v22, %v4466_v4 }
 0x529   : > { %v3890_v40 = vrot.slane %v3889_v46, 2  ;;  %v3806_v8 = vadd.f32 %v4468_v44, %v3645_v1 }
 0x52b   : > { %v3891_v13 = vmax.f32 %v3889_v46, %v3890_v40  ;;  %v3894_v10 = vmax.f32 %v3803_v56, %v3806_v8  ;;  %v4469_v51 = vpop.f32.mrb[148].mxu0 }
 0x52c   : > { %v4470_v9 = vpop.f32.mrb[149].mxu0 }
 0x52d   : > { %v3892_v11 = vrot.slane %v3891_v13, 1  ;;  %v4471_v41 = vadd.f32 %v4470_v9, %v4469_v51  ;;  %v4472_v0 = vpop.f32.mrb[150].mxu0 }
 0x52e   : > { %v4473_v24 = vpop.f32.mrb[151].mxu0 }
 0x52f   : > { %v3893_v53 = vmax.f32 %v3891_v13, %v3892_v11  ;;  %v3811_v16 = vadd.f32 %v4471_v41, %v3650_v25  ;;  %v4474_v5 = vadd.f32 %v4473_v24, %v4472_v0 }
 0x531   : > { %v3895_v7 = vmax.f32 %v3894_v10, %v3811_v16  ;;  %v3814_v43 = vadd.f32 %v4474_v5, %v3653_v6  ;;  %v3932_v49 = vsel %vm1339_vm6, %v3893_v53, %v3931_v19  ;;  %v3669_v19 = vadd.f32 %v6477_v55, %v6424_v27 }
 0x532   : > { %v3677_v55 = vadd.f32 %v6485_v28, %v6424_v27  ;;  %v3685_v28 = vadd.f32 %v6494_v60, %v6424_v27 }
 0x533   : > { %v3896_v30 = vmax.f32 %v3895_v7, %v3814_v43  ;;  %v4475_v50 = vpop.f32.mrb[152].mxu0 }
 0x534   : > { %v4476_v47 = vpop.f32.mrb[153].mxu0 }
 0x535   : > { %v3897_v21 = vrot.slane %v3896_v30, 4  ;;  %v4477_v20 = vadd.f32 %v4476_v47, %v4475_v50  ;;  %v4478_v15 = vpop.f32.mrb[154].mxu0 }
 0x536   : > { %v4479_v23 = vpop.f32.mrb[155].mxu0 }
 0x537   : > { %v3898_v36 = vmax.f32 %v3896_v30, %v3897_v21  ;;  %v3819_v12 = vadd.f32 %v4477_v20, %v3658_v52  ;;  %v4480_v35 = vadd.f32 %v4479_v23, %v4478_v15 }
 0x539   : > { %v3899_v29 = vrot.slane %v3898_v36, 2  ;;  %v3822_v17 = vadd.f32 %v4480_v35, %v3661_v33 }
 0x53b   : > { %v3900_v37 = vmax.f32 %v3898_v36, %v3899_v29  ;;  %v3903_v63 = vmax.f32 %v3819_v12, %v3822_v17  ;;  %v4481_v42 = vpop.f32.mrb[156].mxu0 }
 0x53c   : > { %v4482_v48 = vpop.f32.mrb[157].mxu0 }
 0x53d   : > { %v3901_v39 = vrot.slane %v3900_v37, 1  ;;  %v4483_v58 = vadd.f32 %v4482_v48, %v4481_v42  ;;  %v4484_v57 = vpop.f32.mrb[158].mxu0 }
 0x53e   : > { %v4485_v54 = vpop.f32.mrb[159].mxu0 }
 0x53f   : > { %v3902_v34 = vmax.f32 %v3900_v37, %v3901_v39  ;;  %v3827_v31 = vadd.f32 %v4483_v58, %v3666_v26  ;;  %v4486_v38 = vadd.f32 %v4485_v54, %v4484_v57 }
 0x541   : > { %v3904_v62 = vmax.f32 %v3903_v63, %v3827_v31  ;;  %v3830_v45 = vadd.f32 %v4486_v38, %v3669_v19  ;;  %v3933_v59 = vsel %vm1341_vm7, %v3902_v34, %v3932_v49 }
 0x543   : > { %v3905_v14 = vmax.f32 %v3904_v62, %v3830_v45  ;;  %v4487_v61 = vpop.f32.mrb[192].mxu1 }
 0x544   : > { %v4488_v2 = vpop.f32.mrb[193].mxu1 }
 0x545   : > { %v3906_v4 = vrot.slane %v3905_v14, 4  ;;  %v4489_v22 = vadd.f32 %v4488_v2, %v4487_v61  ;;  %v4490_v1 = vpop.f32.mrb[194].mxu1 }
 0x546   : > { %v4491_v46 = vpop.f32.mrb[195].mxu1 }
 0x547   : > { %v3907_v56 = vmax.f32 %v3905_v14, %v3906_v4  ;;  %v3835_v44 = vadd.f32 %v4489_v22, %v3674_v32  ;;  %v4492_v40 = vadd.f32 %v4491_v46, %v4490_v1 }
 0x549   : > { %v3908_v8 = vrot.slane %v3907_v56, 2  ;;  %v3838_v13 = vadd.f32 %v4492_v40, %v3677_v55 }
 0x54b   : > { %v3909_v10 = vmax.f32 %v3907_v56, %v3908_v8  ;;  %v3912_v51 = vmax.f32 %v3835_v44, %v3838_v13  ;;  %v4493_v9 = vpop.f32.mrb[196].mxu1 }
 0x54c   : > { %v4494_v25 = vpop.f32.mrb[197].mxu1 }
 0x54d   : > { %v3910_v11 = vrot.slane %v3909_v10, 1  ;;  %v4495_v41 = vadd.f32 %v4494_v25, %v4493_v9  ;;  %v4496_v0 = vpop.f32.mrb[198].mxu1 }
 0x54e   : > { %v4497_v24 = vpop.f32.mrb[199].mxu1 }
 0x54f   : > { %v3911_v6 = vmax.f32 %v3909_v10, %v3910_v11  ;;  %v3843_v53 = vadd.f32 %v4495_v41, %v3682_v3  ;;  %v4498_v16 = vadd.f32 %v4497_v24, %v4496_v0 }
 0x551   : > { %v3913_v5 = vmax.f32 %v3912_v51, %v3843_v53  ;;  %v3846_v7 = vadd.f32 %v4498_v16, %v3685_v28  ;;  %v3934_v43 = vsel %vm1343_vm8, %v3911_v6, %v3933_v59 }
 0x553   : > { %v3914_v49 = vmax.f32 %v3913_v5, %v3846_v7 }
 0x555   : > { %v3915_v30 = vrot.slane %v3914_v49, 4 }
 0x557   : > { %v3916_v50 = vmax.f32 %v3914_v49, %v3915_v30 }
 0x559   : > { %v3917_v18 = vrot.slane %v3916_v50, 2 }
 0x55b   : > { %v3918_v47 = vmax.f32 %v3916_v50, %v3917_v18 }
 0x55d   : > { %v3919_v52 = vrot.slane %v3918_v47, 1 }
 0x55f   : > { %v3920_v27 = vmax.f32 %v3918_v47, %v3919_v52 }
 0x561   : > { %v3935_v60 = vsel %vm1345_vm9, %v3920_v27, %v3934_v43 }
 0x562   : > { %3937 = vst [vmem:[%s383_s11] sm:$0xff] %v3935_v60 }
 0x563   : > { %4949 = shalt.err (!%p4946_p11)
}
 0x564   : > { %s4950_s29 = scalar_lea.hbm %s6533_s12, 128  ;;  %s4954_s15 = scalar_lea.hbm %s6586_s10, 640 }
 0x565   : > { %p4951_p13 = scmp.ne.s32.totalorder %s6533_s12, %s4950_s29  ;;  %p4955_p6 = scmp.lt.u32.totalorder %s6533_s12, %s6586_s10 }
 0x566   : > { %p4956_p9 = scmp.lt.u32.totalorder %s4954_s15, %s4950_s29  ;;  %p4958_p12 = scmp.lt.u32.totalorder %s4950_s29, %s6533_s12 }
 0x567   : > { %p4952_p0 = pnand %p4951_p13, %p6723_p1 }
 0x568   : > { %p4957_p10 = por %p4956_p9, %p4955_p6 }
 0x569   : > { %p4953_p5 = pneg %p4952_p0 }
 0x56a   : > { %p4959_p2 = por %p4958_p12, %p4957_p10 }
 0x56c   : > { %p4960_p3 = pnand %p4959_p2, %p4953_p5 }
 0x56e   : > { %4963 = shalt.err (!%p4960_p3)
}
 0x56f   : > { %4557 = dma.vmem_to_hbm [thread:$0]  (%p6723_p1), %s6535_s28, 128, %s6533_s12, %s3939_s18  }
 0x570 PF: > { %s6724_s11 = sld [smem:[#allocation14_spill]]  ;;  %p4574_p4 = scmp.ge.s32.totalorder %s5006_s16, 2 }
 0x571   : > { %s3964_s25 = sand.u32 1, %s4994_s13  }
 0x572   : > { %s3965_s30 = scalar_lea.sflag [#allocation4], %s3964_s25 }
 0x576   : > { %p6725_p7 = scmp.ne.s32.totalorder %s6724_s11, 0 }
 0x578   : > { %p4567_p8 = pnand %p4574_p4, %p6725_p7 }
 0x57a   : > { %4989 = dma.done.wait (!%p4567_p8), %s3965_s30, 128  }
 0x57b   : > { %4991 = vsyncadd (!%p4567_p8), %s3965_s30, 4294967168  ;;  %s6726_s16 = sld [smem:[#allocation12_spill]]  ;;  %s6727_s20 = sld [smem:[#allocation11_spill]] }
 0x57c   : > { %s6728_s15 = sld [smem:[#allocation13_spill]]  ;;  %s6729_s13 = smov %s4998_s14 }
 0x581   : > { %p22_p11 = scmp.ge.s32.totalorder %s6726_s16, 7   ;;  %s6730_s14 = smov %s6727_s20 }
 0x583   :  { %24 = sbr.rel (!%p22_p11) target bundleno = 5 (0x5), region = 104 }
 0x58a   :  { %3970 = vsyncpa [#allocation3], 1 }
 0x58b   :  { %3972 = vsyncpa [#allocation3 + $0x1], 1 }
 0x58c   :  { %3973 = vsyncpa [#allocation6], 1 }
 0x58d   :  { %3974 = vsyncpa [#allocation4], 1 }
 0x58e   :  { %3976 = vsyncpa [#allocation4 + $0x1], 1 }

</bundles_post_ra>
